<compile_context>
chip_gen: v6e
topology: v6e:2x2x1
jax: 0.10.0
libtpu: 0.0.40
codegen_flags: <defaults>
</compile_context>

<pallas_src>
import functools

import jax
import jax.numpy as jnp
from jax.experimental import pallas as pl
from jax.experimental.pallas import tpu as pltpu


NUM_CLASSES = 2
CONV_C_PAD = 128     # conv output channels padded 64 -> 128 (lane-dense)
FC_N_PAD = 128       # fusion head output padded 2 -> 128 (lane-dense store)


# ----------------------------------------------------------------------------
# Single fused kernel:
#   conv (im2col matmul + ReLU) -> GAP accumulate            (per spatial tile)
#   -> backbone proj (ReLU) -> resnet.fc                      (finalize)
#   -> LayerNorm(CLS) -> pooler(tanh) -> cat([img,txt]) @ W+b (finalize)
# ----------------------------------------------------------------------------
def _fused_kernel(patches_ref, conv_w_ref, conv_b_ref,
                  backbone_w_hbm, backbone_b_ref,
                  rfc_w_hbm, rfc_b_ref,
                  cls_ref, ln_g_ref, ln_b_ref,
                  pooler_w_hbm, pooler_b_ref,
                  wi_ref, wt_ref, fcb_ref,
                  o_ref,
                  gap_acc, bw_buf, rfcw_buf, pw_buf, sem,
                  *, hw_total, sub_chunk, eps):
    t = pl.program_id(0)

    @pl.when(t == 0)
    def _init():
        gap_acc[...] = jnp.zeros_like(gap_acc)
        # Prefetch the finalize-only weights; overlaps with the conv loop.
        pltpu.make_async_copy(backbone_w_hbm, bw_buf, sem.at[0]).start()
        pltpu.make_async_copy(rfc_w_hbm, rfcw_buf, sem.at[1]).start()
        pltpu.make_async_copy(pooler_w_hbm, pw_buf, sem.at[2]).start()

    B, TH, Kp = patches_ref.shape
    Cc = conv_w_ref.shape[1]
    n_sub = TH // sub_chunk
    # Chunked conv + GAP accumulation: bounds the fp32 conv intermediate so the
    # spatial tile can grow without blowing VMEM/vreg pressure.
    for c in range(n_sub):  # static, small trip count (tile_hw / sub_chunk)
        xc = patches_ref[:, c * sub_chunk:(c + 1) * sub_chunk, :]        # bf16
        xc = xc.reshape(B * sub_chunk, Kp)
        conv = jnp.dot(xc, conv_w_ref[...], preferred_element_type=jnp.float32)
        conv = jnp.maximum(conv + conv_b_ref[...], 0.0)                  # fp32
        gap_acc[...] += jnp.sum(conv.reshape(B, sub_chunk, Cc), axis=1)  # [B, Cc]

    @pl.when(t == pl.num_programs(0) - 1)
    def _finalize():
        # Weight DMAs issued at step 0 must have landed before these matmuls.
        pltpu.make_async_copy(backbone_w_hbm, bw_buf, sem.at[0]).wait()
        pltpu.make_async_copy(rfc_w_hbm, rfcw_buf, sem.at[1]).wait()
        pltpu.make_async_copy(pooler_w_hbm, pw_buf, sem.at[2]).wait()

        # ---- image head: GAP mean -> backbone proj (ReLU) -> resnet.fc ----
        pooled = gap_acc[...] * (1.0 / hw_total)                         # fp32 [B, Cc]
        h = jnp.dot(pooled.astype(jnp.bfloat16), bw_buf[...],
                    preferred_element_type=jnp.float32) + backbone_b_ref[...]
        h = jnp.maximum(h, 0.0)                                          # [B, 2048]
        img = jnp.dot(h.astype(jnp.bfloat16), rfcw_buf[...],
                      preferred_element_type=jnp.float32) + rfc_b_ref[...]  # [B, 256]

        # ---- text head: LayerNorm(CLS) -> pooler dense + tanh ----
        xt = cls_ref[...]                                                # fp32 [B, 768]
        mean = jnp.mean(xt, axis=-1, keepdims=True)
        var = jnp.mean((xt - mean) ** 2, axis=-1, keepdims=True)
        hln = (xt - mean) * jax.lax.rsqrt(var + eps) * ln_g_ref[...] + ln_b_ref[...]
        txt = jnp.tanh(
            jnp.dot(hln.astype(jnp.bfloat16), pw_buf[...],
                    preferred_element_type=jnp.float32) + pooler_b_ref[...])  # pooler_output

        # ---- fusion head: cat([img, txt], dim=1) @ W + b as split matmuls ----
        # dropout(p=0.3) is identity in eval mode.
        # TODO(synk): training-mode dropout (pltpu.prng_random_bits mask) not enabled.
        y = jnp.dot(img.astype(jnp.bfloat16), wi_ref[...],
                    preferred_element_type=jnp.float32)
        y = y + jnp.dot(txt.astype(jnp.bfloat16), wt_ref[...],
                        preferred_element_type=jnp.float32)
        o_ref[...] = (y + fcb_ref[...]).astype(o_ref.dtype)              # [B, N_pad]


def pallas_multimodal_fused(patches, conv_w, conv_b, backbone_w, backbone_b,
                            rfc_w, rfc_b, cls_emb, ln_g, ln_b,
                            pooler_w, pooler_b, wi, wt, fcb,
                            *, max_tile_hw=2048, max_sub_chunk=512, eps=1e-12):
    B, HW, Kp = patches.shape
    Cc = conv_w.shape[1]
    D = backbone_w.shape[1]      # 2048
    F = rfc_w.shape[1]           # 256
    Ht = pooler_w.shape[0]       # 768
    Np = wi.shape[1]             # 128 (lane-padded classes)

    tile_hw = HW if HW <= max_tile_hw else max_tile_hw
    assert HW % tile_hw == 0 and tile_hw % 8 == 0, "spatial tile must divide HW"
    sub = tile_hw if tile_hw <= max_sub_chunk else max_sub_chunk
    assert tile_hw % sub == 0
    grid = (HW // tile_hw,)

    return pl.pallas_call(
        functools.partial(_fused_kernel, hw_total=float(HW), sub_chunk=sub, eps=eps),
        out_shape=jax.ShapeDtypeStruct((B, Np), jnp.float32),
        grid_spec=pltpu.PrefetchScalarGridSpec(
            num_scalar_prefetch=0,
            grid=grid,
            in_specs=[
                pl.BlockSpec((B, tile_hw, Kp), lambda t: (0, t, 0)),   # im2col tile
                pl.BlockSpec((Kp, Cc), lambda t: (0, 0)),              # conv_w
                pl.BlockSpec((1, Cc), lambda t: (0, 0)),               # conv_b
                pl.BlockSpec(memory_space=pl.ANY),                     # backbone_w (manual DMA)
                pl.BlockSpec((1, D), lambda t: (0, 0)),                # backbone_b
                pl.BlockSpec(memory_space=pl.ANY),                     # resnet_fc_w (manual DMA)
                pl.BlockSpec((1, F), lambda t: (0, 0)),                # resnet_fc_b
                pl.BlockSpec((B, Ht), lambda t: (0, 0)),               # cls embedding
                pl.BlockSpec((1, Ht), lambda t: (0, 0)),               # ln_gamma
                pl.BlockSpec((1, Ht), lambda t: (0, 0)),               # ln_beta
                pl.BlockSpec(memory_space=pl.ANY),                     # pooler_w (manual DMA)
                pl.BlockSpec((1, Ht), lambda t: (0, 0)),               # pooler_b
                pl.BlockSpec((F, Np), lambda t: (0, 0)),               # fc_w (image half)
                pl.BlockSpec((Ht, Np), lambda t: (0, 0)),              # fc_w (text half)
                pl.BlockSpec((1, Np), lambda t: (0, 0)),               # fc_b
            ],
            out_specs=pl.BlockSpec((B, Np), lambda t: (0, 0)),
            scratch_shapes=[
                pltpu.VMEM((B, Cc), jnp.float32),       # GAP accumulator
                pltpu.VMEM((Cc, D), jnp.bfloat16),      # backbone_w landing buffer
                pltpu.VMEM((D, F), jnp.bfloat16),       # resnet_fc_w landing buffer
                pltpu.VMEM((Ht, Ht), jnp.bfloat16),     # pooler_w landing buffer
                pltpu.SemaphoreType.DMA((3,)),
            ],
        ),
        # the single grid axis is a spatial reduction into gap_acc / the output.
        compiler_params=pltpu.CompilerParams(
            dimension_semantics=("arbitrary",),
            vmem_limit_bytes=32 * 1024 * 1024),
    )(patches, conv_w, conv_b, backbone_w, backbone_b, rfc_w, rfc_b,
      cls_emb, ln_g, ln_b, pooler_w, pooler_b, wi, wt, fcb)


# ----------------------------------------------------------------------------
# Glue (im2col, parameter setup, padding) in plain JAX
# ----------------------------------------------------------------------------
def im2col_3x3(x_nhwc, pad=1):
    # TODO(synk): for large images replace with in-kernel shifted-window
    # accumulation to avoid the 9x HBM read amplification; negligible at 16x16.
    B, H, W, C = x_nhwc.shape
    xp = jnp.pad(x_nhwc, ((0, 0), (pad, pad), (pad, pad), (0, 0)))
    patches = []
    for ky in range(3):
        for kx in range(3):
            patches.append(xp[:, ky:ky + H, kx:kx + W, :])
    p = jnp.concatenate(patches, axis=-1)          # [B, H, W, 9*C]
    return p.reshape(B, H * W, 9 * C)


def init_params(key):
    ks = jax.random.split(key, 8)
    s = 0.02
    p = {}
    # --- image branch (stand-in ResNet-50 backbone + real resnet.fc head) ---
    p["conv_w"] = s * jax.random.normal(ks[0], (9 * 3, 64), jnp.float32)       # 3x3 conv, 3->64
    p["conv_b"] = jnp.zeros((64,), jnp.float32)
    p["backbone_w"] = s * jax.random.normal(ks[1], (64, 2048), jnp.float32)    # stand-in stages -> 2048
    p["backbone_b"] = jnp.zeros((2048,), jnp.float32)
    p["resnet_fc_w"] = s * jax.random.normal(ks[2], (2048, 256), jnp.float32)  # nn.Linear(2048, 256)
    p["resnet_fc_b"] = jnp.zeros((256,), jnp.float32)
    # --- text branch (BERT embeddings + pooler) ---
    p["word_emb"] = s * jax.random.normal(ks[3], (1000, 768), jnp.float32)
    p["pos_emb"] = s * jax.random.normal(ks[4], (64, 768), jnp.float32)
    p["ln_gamma"] = jnp.ones((768,), jnp.float32)
    p["ln_beta"] = jnp.zeros((768,), jnp.float32)
    p["pooler_w"] = s * jax.random.normal(ks[5], (768, 768), jnp.float32)      # BERT pooler dense
    p["pooler_b"] = jnp.zeros((768,), jnp.float32)
    # --- fusion head: nn.Linear(256 + 768, 2) split into image/text halves ---
    p["fc_w_img"] = s * jax.random.normal(ks[6], (256, NUM_CLASSES), jnp.float32)
    p["fc_w_txt"] = s * jax.random.normal(ks[7], (768, NUM_CLASSES), jnp.float32)
    p["fc_b"] = jnp.zeros((NUM_CLASSES,), jnp.float32)
    return p


def prepare_inference_params(p):
    """Zero-pad to lane-friendly shapes and cast matmul weights to bf16.

    Padding uses zero weights/bias so forward semantics are unchanged; biases,
    LayerNorm params and embeddings stay fp32 (elementwise math in fp32).
    """
    q = {}
    Kc, Co = p["conv_w"].shape                                     # (27, 64)
    K_pad = ((Kc + 31) // 32) * 32                                 # 27 -> 32
    conv_w = jnp.zeros((K_pad, CONV_C_PAD), jnp.float32).at[:Kc, :Co].set(p["conv_w"])
    q["conv_w"] = conv_w.astype(jnp.bfloat16)
    q["conv_b"] = jnp.zeros((1, CONV_C_PAD), jnp.float32).at[:, :Co].set(p["conv_b"][None])
    bw = jnp.zeros((CONV_C_PAD, 2048), jnp.float32).at[:Co, :].set(p["backbone_w"])
    q["backbone_w"] = bw.astype(jnp.bfloat16)
    q["backbone_b"] = p["backbone_b"][None]
    q["resnet_fc_w"] = p["resnet_fc_w"].astype(jnp.bfloat16)
    q["resnet_fc_b"] = p["resnet_fc_b"][None]

    q["word_emb"] = p["word_emb"]
    q["pos_emb"] = p["pos_emb"]
    q["ln_gamma"] = p["ln_gamma"][None]
    q["ln_beta"] = p["ln_beta"][None]
    q["pooler_w"] = p["pooler_w"].astype(jnp.bfloat16)
    q["pooler_b"] = p["pooler_b"][None]

    wi = jnp.zeros((256, FC_N_PAD), jnp.float32).at[:, :NUM_CLASSES].set(p["fc_w_img"])
    wt = jnp.zeros((768, FC_N_PAD), jnp.float32).at[:, :NUM_CLASSES].set(p["fc_w_txt"])
    q["fc_w_img"] = wi.astype(jnp.bfloat16)
    q["fc_w_txt"] = wt.astype(jnp.bfloat16)
    q["fc_b"] = jnp.zeros((1, FC_N_PAD), jnp.float32).at[:, :NUM_CLASSES].set(p["fc_b"])
    return q


def multimodal_forward(params, image_nchw, text_ids):
    B = image_nchw.shape[0]

    # ---- image branch input: NCHW -> NHWC -> im2col (no batch padding) ----
    x = jnp.transpose(image_nchw, (0, 2, 3, 1)).astype(jnp.float32)
    patches = im2col_3x3(x)                                           # [B, H*W, 27]
    K = patches.shape[-1]
    K_pad = params["conv_w"].shape[0]
    patches = jnp.pad(patches, ((0, 0), (0, 0), (0, K_pad - K)))
    patches = patches.astype(jnp.bfloat16)                            # halve HBM->VMEM traffic

    # ---- text branch input: [CLS] embedding only (stand-in; no encoder) ----
    # TODO(synk): 12 transformer encoder layers of bert-base-uncased not reproduced.
    cls_ids = text_ids[:, 0]
    cls_emb = jnp.take(params["word_emb"], cls_ids, axis=0) + params["pos_emb"][0][None, :]

    logits_pad = pallas_multimodal_fused(
        patches, params["conv_w"], params["conv_b"],
        params["backbone_w"], params["backbone_b"],
        params["resnet_fc_w"], params["resnet_fc_b"],
        cls_emb, params["ln_gamma"], params["ln_beta"],
        params["pooler_w"], params["pooler_b"],
        params["fc_w_img"], params["fc_w_txt"], params["fc_b"])       # [B, 128]

    return logits_pad[:B, :NUM_CLASSES]


if __name__ == "__main__":
    key = jax.random.PRNGKey(0)
    k_p, k_img, k_txt = jax.random.split(key, 3)

    params = prepare_inference_params(init_params(k_p))
    B = 2
    image = jax.random.normal(k_img, (B, 3, 16, 16), jnp.float32)   # NCHW like PyTorch
    text_ids = jax.random.randint(k_txt, (B, 8), 0, 1000)           # token ids, seq len 8

    out = multimodal_forward(params, image, text_ids)
    out = jax.block_until_ready(out)
    assert out.shape == (B, 2) and out.dtype == jnp.float32
    print("KERNEL_OK")
</pallas_src>

<mosaic_0001>
module attributes {stable_mosaic.version = 11 : i64} {
  func.func @_fused_kernel(%arg0: i32, %arg1: memref<2x256x32xbf16, #tpu.memory_space<vmem>>, %arg2: memref<32x128xbf16, #tpu.memory_space<vmem>>, %arg3: memref<1x128xf32, #tpu.memory_space<vmem>>, %arg4: memref<128x2048xbf16, #tpu.memory_space<any>>, %arg5: memref<1x2048xf32, #tpu.memory_space<vmem>>, %arg6: memref<2048x256xbf16, #tpu.memory_space<any>>, %arg7: memref<1x256xf32, #tpu.memory_space<vmem>>, %arg8: memref<2x768xf32, #tpu.memory_space<vmem>>, %arg9: memref<1x768xf32, #tpu.memory_space<vmem>>, %arg10: memref<1x768xf32, #tpu.memory_space<vmem>>, %arg11: memref<768x768xbf16, #tpu.memory_space<any>>, %arg12: memref<1x768xf32, #tpu.memory_space<vmem>>, %arg13: memref<256x128xbf16, #tpu.memory_space<vmem>>, %arg14: memref<768x128xbf16, #tpu.memory_space<vmem>>, %arg15: memref<1x128xf32, #tpu.memory_space<vmem>>, %arg16: memref<2x128xf32, #tpu.memory_space<vmem>>, %arg17: memref<2x128xf32, #tpu.memory_space<vmem>>, %arg18: memref<128x2048xbf16, #tpu.memory_space<vmem>>, %arg19: memref<2048x256xbf16, #tpu.memory_space<vmem>>, %arg20: memref<768x768xbf16, #tpu.memory_space<vmem>>, %arg21: memref<3x!tpu.dma_semaphore, #tpu.memory_space<semaphore_mem>>) attributes {dimension_semantics = [#tpu.dimension_semantics<arbitrary>], iteration_bounds = array<i64: 1>, scalar_prefetch = 0 : i64, scratch_operands = 5 : i64, tpu.core_type = #tpu.core_type<tc>, window_params = [{transform_indices = @transform_0, window_bounds = array<i64: 2, 256, 32>}, {pipeline_mode = #tpu.pipeline_mode<synchronous>, transform_indices = @transform_1, window_bounds = array<i64: 32, 128>}, {pipeline_mode = #tpu.pipeline_mode<synchronous>, transform_indices = @transform_2, window_bounds = array<i64: 1, 128>}, {}, {pipeline_mode = #tpu.pipeline_mode<synchronous>, transform_indices = @transform_4, window_bounds = array<i64: 1, 2048>}, {}, {pipeline_mode = #tpu.pipeline_mode<synchronous>, transform_indices = @transform_6, window_bounds = array<i64: 1, 256>}, {pipeline_mode = #tpu.pipeline_mode<synchronous>, transform_indices = @transform_7, window_bounds = array<i64: 2, 768>}, {pipeline_mode = #tpu.pipeline_mode<synchronous>, transform_indices = @transform_8, window_bounds = array<i64: 1, 768>}, {pipeline_mode = #tpu.pipeline_mode<synchronous>, transform_indices = @transform_9, window_bounds = array<i64: 1, 768>}, {}, {pipeline_mode = #tpu.pipeline_mode<synchronous>, transform_indices = @transform_11, window_bounds = array<i64: 1, 768>}, {pipeline_mode = #tpu.pipeline_mode<synchronous>, transform_indices = @transform_12, window_bounds = array<i64: 256, 128>}, {pipeline_mode = #tpu.pipeline_mode<synchronous>, transform_indices = @transform_13, window_bounds = array<i64: 768, 128>}, {pipeline_mode = #tpu.pipeline_mode<synchronous>, transform_indices = @transform_14, window_bounds = array<i64: 1, 128>}, {pipeline_mode = #tpu.pipeline_mode<synchronous>, transform_indices = @transform_15, window_bounds = array<i64: 2, 128>}]} {
    %c0_i32 = arith.constant 0 : i32
    %0 = arith.cmpi eq, %arg0, %c0_i32 : i32
    %1 = arith.extui %0 : i1 to i32
    %c0_i32_0 = arith.constant 0 : i32
    %2 = arith.cmpi ne, %1, %c0_i32_0 : i32
    scf.if %2 {
      %cst_15 = arith.constant 0.000000e+00 : f32
      %20 = vector.broadcast %cst_15 : f32 to vector<2x128xf32>
      %c0_16 = arith.constant 0 : index
      %c0_17 = arith.constant 0 : index
      %21 = vector.load %arg17[%c0_16, %c0_17] : memref<2x128xf32, #tpu.memory_space<vmem>>, vector<2x128xf32>
      tpu.vector_store %arg17[%c0_16, %c0_17], %20 {strides = array<i32>} : memref<2x128xf32, #tpu.memory_space<vmem>>, vector<2x128xf32>,
      %c0_i32_18 = arith.constant 0 : i32
      %22 = tpu.memref_slice %arg21[%c0_i32_18] : memref<3x!tpu.dma_semaphore, #tpu.memory_space<semaphore_mem>> -> memref<1x!tpu.dma_semaphore, #tpu.memory_space<semaphore_mem>>
      %23 = tpu.memref_squeeze %22 : memref<1x!tpu.dma_semaphore, #tpu.memory_space<semaphore_mem>> -> memref<!tpu.dma_semaphore, #tpu.memory_space<semaphore_mem>>
      tpu.enqueue_dma source(%arg4 : memref<128x2048xbf16, #tpu.memory_space<any>>) target(%arg18 : memref<128x2048xbf16, #tpu.memory_space<vmem>>) target_semaphore(%23 : memref<!tpu.dma_semaphore, #tpu.memory_space<semaphore_mem>>)
      %c1_i32 = arith.constant 1 : i32
      %24 = tpu.memref_slice %arg21[%c1_i32] : memref<3x!tpu.dma_semaphore, #tpu.memory_space<semaphore_mem>> -> memref<1x!tpu.dma_semaphore, #tpu.memory_space<semaphore_mem>>
      %25 = tpu.memref_squeeze %24 : memref<1x!tpu.dma_semaphore, #tpu.memory_space<semaphore_mem>> -> memref<!tpu.dma_semaphore, #tpu.memory_space<semaphore_mem>>
      tpu.enqueue_dma source(%arg6 : memref<2048x256xbf16, #tpu.memory_space<any>>) target(%arg19 : memref<2048x256xbf16, #tpu.memory_space<vmem>>) target_semaphore(%25 : memref<!tpu.dma_semaphore, #tpu.memory_space<semaphore_mem>>)
      %c2_i32 = arith.constant 2 : i32
      %26 = tpu.memref_slice %arg21[%c2_i32] : memref<3x!tpu.dma_semaphore, #tpu.memory_space<semaphore_mem>> -> memref<1x!tpu.dma_semaphore, #tpu.memory_space<semaphore_mem>>
      %27 = tpu.memref_squeeze %26 : memref<1x!tpu.dma_semaphore, #tpu.memory_space<semaphore_mem>> -> memref<!tpu.dma_semaphore, #tpu.memory_space<semaphore_mem>>
      tpu.enqueue_dma source(%arg11 : memref<768x768xbf16, #tpu.memory_space<any>>) target(%arg20 : memref<768x768xbf16, #tpu.memory_space<vmem>>) target_semaphore(%27 : memref<!tpu.dma_semaphore, #tpu.memory_space<semaphore_mem>>)
    } else {
    }
    %c0 = arith.constant 0 : index
    %c0_1 = arith.constant 0 : index
    %c0_2 = arith.constant 0 : index
    %3 = vector.load %arg1[%c0, %c0_1, %c0_2] : memref<2x256x32xbf16, #tpu.memory_space<vmem>>, vector<2x256x32xbf16>
    %4 = vector.shape_cast %3 : vector<2x256x32xbf16> to vector<512x32xbf16>
    %c0_3 = arith.constant 0 : index
    %c0_4 = arith.constant 0 : index
    %5 = vector.load %arg2[%c0_3, %c0_4] : memref<32x128xbf16, #tpu.memory_space<vmem>>, vector<32x128xbf16>
    %cst = arith.constant dense<0.000000e+00> : vector<512x128xf32>
    %6 = tpu.matmul %4, %5, %cst {dimension_numbers = #tpu.dot_dimension_numbers<[1], [0], [0], [1], [0, 0, 1, 1], [], []>} : vector<512x32xbf16>, vector<32x128xbf16>, vector<512x128xf32> -> vector<512x128xf32>
    %c0_5 = arith.constant 0 : index
    %c0_6 = arith.constant 0 : index
    %7 = vector.load %arg3[%c0_5, %c0_6] : memref<1x128xf32, #tpu.memory_space<vmem>>, vector<1x128xf32>
    %8 = vector.broadcast %7 : vector<1x128xf32> to vector<512x128xf32>
    %9 = arith.addf %6, %8 : vector<512x128xf32>
    %cst_7 = arith.constant 0.000000e+00 : f32
    %10 = vector.broadcast %cst_7 : f32 to vector<512x128xf32>
    %11 = arith.maximumf %9, %10 : vector<512x128xf32>
    %c0_8 = arith.constant 0 : index
    %c0_9 = arith.constant 0 : index
    %12 = vector.load %arg17[%c0_8, %c0_9] : memref<2x128xf32, #tpu.memory_space<vmem>>, vector<2x128xf32>
    %13 = vector.shape_cast %11 : vector<512x128xf32> to vector<2x256x128xf32>
    %cst_10 = arith.constant dense<0.000000e+00> : vector<2x128xf32>
    %14 = vector.multi_reduction <add>, %13, %cst_10 [1] : vector<2x256x128xf32> to vector<2x128xf32>
    %15 = arith.addf %12, %14 : vector<2x128xf32>
    %c0_11 = arith.constant 0 : index
    %c0_12 = arith.constant 0 : index
    %16 = vector.load %arg17[%c0_11, %c0_12] : memref<2x128xf32, #tpu.memory_space<vmem>>, vector<2x128xf32>
    tpu.vector_store %arg17[%c0_11, %c0_12], %15 {strides = array<i32>} : memref<2x128xf32, #tpu.memory_space<vmem>>, vector<2x128xf32>,
    %c0_i32_13 = arith.constant 0 : i32
    %17 = arith.cmpi eq, %arg0, %c0_i32_13 : i32
    %18 = arith.extui %17 : i1 to i32
    %c0_i32_14 = arith.constant 0 : i32
    %19 = arith.cmpi ne, %18, %c0_i32_14 : i32
    scf.if %19 {
      %c0_i32_15 = arith.constant 0 : i32
      %20 = tpu.memref_slice %arg21[%c0_i32_15] : memref<3x!tpu.dma_semaphore, #tpu.memory_space<semaphore_mem>> -> memref<1x!tpu.dma_semaphore, #tpu.memory_space<semaphore_mem>>
      %21 = tpu.memref_squeeze %20 : memref<1x!tpu.dma_semaphore, #tpu.memory_space<semaphore_mem>> -> memref<!tpu.dma_semaphore, #tpu.memory_space<semaphore_mem>>
      tpu.wait_dma2 semaphore(%21 : memref<!tpu.dma_semaphore, #tpu.memory_space<semaphore_mem>>) src(%arg4 : memref<128x2048xbf16, #tpu.memory_space<any>>) dst(%arg18 : memref<128x2048xbf16, #tpu.memory_space<vmem>>)
      %c1_i32 = arith.constant 1 : i32
      %22 = tpu.memref_slice %arg21[%c1_i32] : memref<3x!tpu.dma_semaphore, #tpu.memory_space<semaphore_mem>> -> memref<1x!tpu.dma_semaphore, #tpu.memory_space<semaphore_mem>>
      %23 = tpu.memref_squeeze %22 : memref<1x!tpu.dma_semaphore, #tpu.memory_space<semaphore_mem>> -> memref<!tpu.dma_semaphore, #tpu.memory_space<semaphore_mem>>
      tpu.wait_dma2 semaphore(%23 : memref<!tpu.dma_semaphore, #tpu.memory_space<semaphore_mem>>) src(%arg6 : memref<2048x256xbf16, #tpu.memory_space<any>>) dst(%arg19 : memref<2048x256xbf16, #tpu.memory_space<vmem>>)
      %c2_i32 = arith.constant 2 : i32
      %24 = tpu.memref_slice %arg21[%c2_i32] : memref<3x!tpu.dma_semaphore, #tpu.memory_space<semaphore_mem>> -> memref<1x!tpu.dma_semaphore, #tpu.memory_space<semaphore_mem>>
      %25 = tpu.memref_squeeze %24 : memref<1x!tpu.dma_semaphore, #tpu.memory_space<semaphore_mem>> -> memref<!tpu.dma_semaphore, #tpu.memory_space<semaphore_mem>>
      tpu.wait_dma2 semaphore(%25 : memref<!tpu.dma_semaphore, #tpu.memory_space<semaphore_mem>>) src(%arg11 : memref<768x768xbf16, #tpu.memory_space<any>>) dst(%arg20 : memref<768x768xbf16, #tpu.memory_space<vmem>>)
      %c0_16 = arith.constant 0 : index
      %c0_17 = arith.constant 0 : index
      %26 = vector.load %arg17[%c0_16, %c0_17] : memref<2x128xf32, #tpu.memory_space<vmem>>, vector<2x128xf32>
      %cst_18 = arith.constant 3.906250e-03 : f32
      %27 = vector.broadcast %cst_18 : f32 to vector<2x128xf32>
      %28 = arith.mulf %26, %27 : vector<2x128xf32>
      %29 = arith.truncf %28 : vector<2x128xf32> to vector<2x128xbf16>
      %c0_19 = arith.constant 0 : index
      %c0_20 = arith.constant 0 : index
      %30 = vector.load %arg18[%c0_19, %c0_20] : memref<128x2048xbf16, #tpu.memory_space<vmem>>, vector<128x2048xbf16>
      %cst_21 = arith.constant dense<0.000000e+00> : vector<2x2048xf32>
      %31 = tpu.matmul %29, %30, %cst_21 {dimension_numbers = #tpu.dot_dimension_numbers<[1], [0], [0], [1], [0, 0, 1, 1], [], []>} : vector<2x128xbf16>, vector<128x2048xbf16>, vector<2x2048xf32> -> vector<2x2048xf32>
      %c0_22 = arith.constant 0 : index
      %c0_23 = arith.constant 0 : index
      %32 = vector.load %arg5[%c0_22, %c0_23] : memref<1x2048xf32, #tpu.memory_space<vmem>>, vector<1x2048xf32>
      %33 = vector.broadcast %32 : vector<1x2048xf32> to vector<2x2048xf32>
      %34 = arith.addf %31, %33 : vector<2x2048xf32>
      %cst_24 = arith.constant 0.000000e+00 : f32
      %35 = vector.broadcast %cst_24 : f32 to vector<2x2048xf32>
      %36 = arith.maximumf %34, %35 : vector<2x2048xf32>
      %37 = arith.truncf %36 : vector<2x2048xf32> to vector<2x2048xbf16>
      %c0_25 = arith.constant 0 : index
      %c0_26 = arith.constant 0 : index
      %38 = vector.load %arg19[%c0_25, %c0_26] : memref<2048x256xbf16, #tpu.memory_space<vmem>>, vector<2048x256xbf16>
      %cst_27 = arith.constant dense<0.000000e+00> : vector<2x256xf32>
      %39 = tpu.matmul %37, %38, %cst_27 {dimension_numbers = #tpu.dot_dimension_numbers<[1], [0], [0], [1], [0, 0, 1, 1], [], []>} : vector<2x2048xbf16>, vector<2048x256xbf16>, vector<2x256xf32> -> vector<2x256xf32>
      %c0_28 = arith.constant 0 : index
      %c0_29 = arith.constant 0 : index
      %40 = vector.load %arg7[%c0_28, %c0_29] : memref<1x256xf32, #tpu.memory_space<vmem>>, vector<1x256xf32>
      %41 = vector.broadcast %40 : vector<1x256xf32> to vector<2x256xf32>
      %42 = arith.addf %39, %41 : vector<2x256xf32>
      %c0_30 = arith.constant 0 : index
      %c0_31 = arith.constant 0 : index
      %43 = vector.load %arg8[%c0_30, %c0_31] : memref<2x768xf32, #tpu.memory_space<vmem>>, vector<2x768xf32>
      %cst_32 = arith.constant dense<0.000000e+00> : vector<2xf32>
      %44 = vector.multi_reduction <add>, %43, %cst_32 [1] : vector<2x768xf32> to vector<2xf32>
      %45 = vector.shape_cast %44 : vector<2xf32> to vector<2x1xf32>
      %cst_33 = arith.constant 7.680000e+02 : f32
      %46 = vector.broadcast %cst_33 : f32 to vector<2x1xf32>
      %47 = arith.divf %45, %46 : vector<2x1xf32>
      %48 = vector.broadcast %47 : vector<2x1xf32> to vector<2x768xf32>
      %49 = arith.subf %43, %48 : vector<2x768xf32>
      %50 = arith.mulf %49, %49 : vector<2x768xf32>
      %cst_34 = arith.constant dense<0.000000e+00> : vector<2xf32>
      %51 = vector.multi_reduction <add>, %50, %cst_34 [1] : vector<2x768xf32> to vector<2xf32>
      %52 = vector.shape_cast %51 : vector<2xf32> to vector<2x1xf32>
      %cst_35 = arith.constant 7.680000e+02 : f32
      %53 = vector.broadcast %cst_35 : f32 to vector<2x1xf32>
      %54 = arith.divf %52, %53 : vector<2x1xf32>
      %55 = vector.broadcast %47 : vector<2x1xf32> to vector<2x768xf32>
      %56 = arith.subf %43, %55 : vector<2x768xf32>
      %cst_36 = arith.constant 9.99999996E-13 : f32
      %57 = vector.broadcast %cst_36 : f32 to vector<2x1xf32>
      %58 = arith.addf %54, %57 : vector<2x1xf32>
      %59 = math.rsqrt %58 : vector<2x1xf32>
      %60 = vector.broadcast %59 : vector<2x1xf32> to vector<2x768xf32>
      %61 = arith.mulf %56, %60 : vector<2x768xf32>
      %c0_37 = arith.constant 0 : index
      %c0_38 = arith.constant 0 : index
      %62 = vector.load %arg9[%c0_37, %c0_38] : memref<1x768xf32, #tpu.memory_space<vmem>>, vector<1x768xf32>
      %63 = vector.broadcast %62 : vector<1x768xf32> to vector<2x768xf32>
      %64 = arith.mulf %61, %63 : vector<2x768xf32>
      %c0_39 = arith.constant 0 : index
      %c0_40 = arith.constant 0 : index
      %65 = vector.load %arg10[%c0_39, %c0_40] : memref<1x768xf32, #tpu.memory_space<vmem>>, vector<1x768xf32>
      %66 = vector.broadcast %65 : vector<1x768xf32> to vector<2x768xf32>
      %67 = arith.addf %64, %66 : vector<2x768xf32>
      %68 = arith.truncf %67 : vector<2x768xf32> to vector<2x768xbf16>
      %c0_41 = arith.constant 0 : index
      %c0_42 = arith.constant 0 : index
      %69 = vector.load %arg20[%c0_41, %c0_42] : memref<768x768xbf16, #tpu.memory_space<vmem>>, vector<768x768xbf16>
      %cst_43 = arith.constant dense<0.000000e+00> : vector<2x768xf32>
      %70 = tpu.matmul %68, %69, %cst_43 {dimension_numbers = #tpu.dot_dimension_numbers<[1], [0], [0], [1], [0, 0, 1, 1], [], []>} : vector<2x768xbf16>, vector<768x768xbf16>, vector<2x768xf32> -> vector<2x768xf32>
      %c0_44 = arith.constant 0 : index
      %c0_45 = arith.constant 0 : index
      %71 = vector.load %arg12[%c0_44, %c0_45] : memref<1x768xf32, #tpu.memory_space<vmem>>, vector<1x768xf32>
      %72 = vector.broadcast %71 : vector<1x768xf32> to vector<2x768xf32>
      %73 = arith.addf %70, %72 : vector<2x768xf32>
      %74 = math.tanh %73 : vector<2x768xf32>
      %75 = arith.truncf %42 : vector<2x256xf32> to vector<2x256xbf16>
      %c0_46 = arith.constant 0 : index
      %c0_47 = arith.constant 0 : index
      %76 = vector.load %arg13[%c0_46, %c0_47] : memref<256x128xbf16, #tpu.memory_space<vmem>>, vector<256x128xbf16>
      %cst_48 = arith.constant dense<0.000000e+00> : vector<2x128xf32>
      %77 = tpu.matmul %75, %76, %cst_48 {dimension_numbers = #tpu.dot_dimension_numbers<[1], [0], [0], [1], [0, 0, 1, 1], [], []>} : vector<2x256xbf16>, vector<256x128xbf16>, vector<2x128xf32> -> vector<2x128xf32>
      %78 = arith.truncf %74 : vector<2x768xf32> to vector<2x768xbf16>
      %c0_49 = arith.constant 0 : index
      %c0_50 = arith.constant 0 : index
      %79 = vector.load %arg14[%c0_49, %c0_50] : memref<768x128xbf16, #tpu.memory_space<vmem>>, vector<768x128xbf16>
      %cst_51 = arith.constant dense<0.000000e+00> : vector<2x128xf32>
      %80 = tpu.matmul %78, %79, %cst_51 {dimension_numbers = #tpu.dot_dimension_numbers<[1], [0], [0], [1], [0, 0, 1, 1], [], []>} : vector<2x768xbf16>, vector<768x128xbf16>, vector<2x128xf32> -> vector<2x128xf32>
      %81 = arith.addf %77, %80 : vector<2x128xf32>
      %c0_52 = arith.constant 0 : index
      %c0_53 = arith.constant 0 : index
      %82 = vector.load %arg15[%c0_52, %c0_53] : memref<1x128xf32, #tpu.memory_space<vmem>>, vector<1x128xf32>
      %83 = vector.broadcast %82 : vector<1x128xf32> to vector<2x128xf32>
      %84 = arith.addf %81, %83 : vector<2x128xf32>
      %c0_54 = arith.constant 0 : index
      %c0_55 = arith.constant 0 : index
      %85 = vector.load %arg16[%c0_54, %c0_55] : memref<2x128xf32, #tpu.memory_space<vmem>>, vector<2x128xf32>
      tpu.vector_store %arg16[%c0_54, %c0_55], %84 {strides = array<i32>} : memref<2x128xf32, #tpu.memory_space<vmem>>, vector<2x128xf32>,
    } else {
    }
    return
  }
  func.func @transform_0(%arg0: i32) -> (i32, i32, i32) {
    %c0_i32 = arith.constant 0 : i32
    %c0_i32_0 = arith.constant 0 : i32
    %c0_i32_1 = arith.constant 0 : i32
    return %c0_i32, %arg0, %c0_i32_0 : i32, i32, i32
  }
  func.func @transform_1(%arg0: i32) -> (i32, i32) {
    %c0_i32 = arith.constant 0 : i32
    %c0_i32_0 = arith.constant 0 : i32
    %c0_i32_1 = arith.constant 0 : i32
    return %c0_i32, %c0_i32_0 : i32, i32
  }
  func.func @transform_2(%arg0: i32) -> (i32, i32) {
    %c0_i32 = arith.constant 0 : i32
    %c0_i32_0 = arith.constant 0 : i32
    %c0_i32_1 = arith.constant 0 : i32
    return %c0_i32, %c0_i32_0 : i32, i32
  }
  func.func @transform_4(%arg0: i32) -> (i32, i32) {
    %c0_i32 = arith.constant 0 : i32
    %c0_i32_0 = arith.constant 0 : i32
    %c0_i32_1 = arith.constant 0 : i32
    return %c0_i32, %c0_i32_0 : i32, i32
  }
  func.func @transform_6(%arg0: i32) -> (i32, i32) {
    %c0_i32 = arith.constant 0 : i32
    %c0_i32_0 = arith.constant 0 : i32
    %c0_i32_1 = arith.constant 0 : i32
    return %c0_i32, %c0_i32_0 : i32, i32
  }
  func.func @transform_7(%arg0: i32) -> (i32, i32) {
    %c0_i32 = arith.constant 0 : i32
    %c0_i32_0 = arith.constant 0 : i32
    %c0_i32_1 = arith.constant 0 : i32
    return %c0_i32, %c0_i32_0 : i32, i32
  }
  func.func @transform_8(%arg0: i32) -> (i32, i32) {
    %c0_i32 = arith.constant 0 : i32
    %c0_i32_0 = arith.constant 0 : i32
    %c0_i32_1 = arith.constant 0 : i32
    return %c0_i32, %c0_i32_0 : i32, i32
  }
  func.func @transform_9(%arg0: i32) -> (i32, i32) {
    %c0_i32 = arith.constant 0 : i32
    %c0_i32_0 = arith.constant 0 : i32
    %c0_i32_1 = arith.constant 0 : i32
    return %c0_i32, %c0_i32_0 : i32, i32
  }
  func.func @transform_11(%arg0: i32) -> (i32, i32) {
    %c0_i32 = arith.constant 0 : i32
    %c0_i32_0 = arith.constant 0 : i32
    %c0_i32_1 = arith.constant 0 : i32
    return %c0_i32, %c0_i32_0 : i32, i32
  }
  func.func @transform_12(%arg0: i32) -> (i32, i32) {
    %c0_i32 = arith.constant 0 : i32
    %c0_i32_0 = arith.constant 0 : i32
    %c0_i32_1 = arith.constant 0 : i32
    return %c0_i32, %c0_i32_0 : i32, i32
  }
  func.func @transform_13(%arg0: i32) -> (i32, i32) {
    %c0_i32 = arith.constant 0 : i32
    %c0_i32_0 = arith.constant 0 : i32
    %c0_i32_1 = arith.constant 0 : i32
    return %c0_i32, %c0_i32_0 : i32, i32
  }
  func.func @transform_14(%arg0: i32) -> (i32, i32) {
    %c0_i32 = arith.constant 0 : i32
    %c0_i32_0 = arith.constant 0 : i32
    %c0_i32_1 = arith.constant 0 : i32
    return %c0_i32, %c0_i32_0 : i32, i32
  }
  func.func @transform_15(%arg0: i32) -> (i32, i32) {
    %c0_i32 = arith.constant 0 : i32
    %c0_i32_0 = arith.constant 0 : i32
    %c0_i32_1 = arith.constant 0 : i32
    return %c0_i32, %c0_i32_0 : i32, i32
  }
}

</mosaic_0001>

<bundles_post_ra>
// kernel: tpu_custom_call.1
= control target key start
LH: loop header
LB: loop body
LE: loop exit
PB: predicated region body
PF: predicated region fallthrough
CT: control target
= control target key end

     0   :  { %20 = vsyncpa [#allocation8], 0  ;;  %s10177_s0 = inlined_call_operand.vmem [shape: bf16[2,256,32], index: 0, kind: input, shape index: {}]   ;;  %s10178_s1 = inlined_call_operand.hbm [shape: bf16[32,128], index: 1, kind: input, shape index: {}]   ;;  %s10179_s2 = inlined_call_operand.hbm [shape: f32[1,128], index: 2, kind: input, shape index: {}]   ;;  %s10180_s3 = inlined_call_operand.hbm [shape: bf16[128,2048], index: 3, kind: input, shape index: {}]   ;;  %s10181_s4 = inlined_call_operand.hbm [shape: f32[1,2048], index: 4, kind: input, shape index: {}]   ;;  %s10182_s5 = inlined_call_operand.hbm [shape: bf16[2048,256], index: 5, kind: input, shape index: {}]   ;;  %s10183_s6 = inlined_call_operand.hbm [shape: f32[1,256], index: 6, kind: input, shape index: {}]   ;;  %s10184_s7 = inlined_call_operand.hbm [shape: f32[2,768], index: 7, kind: input, shape index: {}]   ;;  %s10185_s8 = inlined_call_operand.hbm [shape: f32[1,768], index: 8, kind: input, shape index: {}]   ;;  %s10186_s9 = inlined_call_operand.hbm [shape: f32[1,768], index: 9, kind: input, shape index: {}]   ;;  %s10187_s10 = inlined_call_operand.hbm [shape: bf16[768,768], index: 10, kind: input, shape index: {}]   ;;  %s10188_s11 = inlined_call_operand.hbm [shape: f32[1,768], index: 11, kind: input, shape index: {}]   ;;  %s10189_s12 = inlined_call_operand.hbm [shape: bf16[256,128], index: 12, kind: input, shape index: {}]   ;;  %s10190_s13 = inlined_call_operand.hbm [shape: bf16[768,128], index: 13, kind: input, shape index: {}]   ;;  %s10191_s14 = inlined_call_operand.hbm [shape: f32[1,128], index: 14, kind: input, shape index: {}]   ;;  %s10192_s15 = inlined_call_operand.hbm [shape: f32[2,128], index: 15, kind: output, shape index: {}]  }
   0x1   :  { %21 = vsyncpa [#allocation11], 0 }
   0x2   :  { %22 = vsyncpa [#allocation14], 0 }
   0x3   :  { %23 = vsyncpa [#allocation17], 0 }
   0x4   :  { %24 = vsyncpa [#allocation20], 0 }
   0x5   :  { %25 = vsyncpa [#allocation23], 0 }
   0x6   :  { %26 = vsyncpa [#allocation9], 0  ;;  %s9514_s18 = smov [#allocation10]   ;;  %s9515_s20 = smov [#allocation13]  }
   0x7   :  { %s47_s19 = sshll.u32 %s9514_s18, 4  ;;  %s67_s21 = sshll.u32 %s9515_s20, 4  ;;  %s48_s19 = int_to_ptr.vmem [resolvable:$true] %s47_s19  ;;  %s68_s21 = int_to_ptr.vmem [resolvable:$true] %s67_s21 }
   0x8   :  { %s9202_s22 = scalar_lea.vmem %s48_s19, 16  ;;  %s9206_s23 = scalar_lea.vmem %s48_s19, 32 }
   0x9   :  { %p9203_p0 = scmp.ne.s32.totalorder %s48_s19, %s9202_s22  ;;  %p9207_p1 = scmp.lt.s32.totalorder %s48_s19, %s48_s19 }
   0xa   :  { %p9208_p2 = scmp.lt.s32.totalorder %s9206_s23, %s9202_s22 }
   0xc   :  { %p9209_p3 = por %p9208_p2, %p9207_p1 }
   0xe   :  { %p9210_p4 = pnand %p9209_p3, %p9203_p0 }
  0x10   :  { %9213 = shalt.err (!%p9210_p4)
}
  0x11   :  { %50 = dma.hbm_to_vmem [thread:$0]  %s10179_s2, 16, %s48_s19, [#allocation11]  }
  0x12   :  { %s9222_s26 = scalar_lea.vmem %s68_s21, 32  ;;  %p9227_p6 = scmp.lt.s32.totalorder %s68_s21, %s68_s21 }
  0x13   :  { %p9223_p5 = scmp.ne.s32.totalorder %s68_s21, %s9222_s26  ;;  %p9228_p7 = scmp.lt.s32.totalorder %s9222_s26, %s9222_s26 }
  0x15   :  { %p9229_p8 = por %p9228_p7, %p9227_p6 }
  0x17   :  { %p9230_p9 = pnand %p9229_p8, %p9223_p5 }
  0x19   :  { %9233 = shalt.err (!%p9230_p9)
}
  0x1a   :  { %70 = dma.hbm_to_vmem [thread:$0]  %s10183_s6, 32, %s68_s21, [#allocation14]  }
  0x1b   :  { %s9516_s29 = smov [#allocation16]   ;;  %s9517_s16 = smov [#allocation19]  }
  0x1c   :  { %s87_s30 = sshll.u32 %s9516_s29, 4  ;;  %s107_s17 = sshll.u32 %s9517_s16, 4  ;;  %s88_s30 = int_to_ptr.vmem [resolvable:$true] %s87_s30  ;;  %s108_s17 = int_to_ptr.vmem [resolvable:$true] %s107_s17 }
  0x1d   :  { %s9242_s18 = scalar_lea.vmem %s88_s30, 96  ;;  %p9247_p11 = scmp.lt.s32.totalorder %s88_s30, %s88_s30 }
  0x1e   :  { %p9243_p10 = scmp.ne.s32.totalorder %s88_s30, %s9242_s18  ;;  %p9248_p12 = scmp.lt.s32.totalorder %s9242_s18, %s9242_s18 }
  0x20   :  { %p9249_p13 = por %p9248_p12, %p9247_p11 }
  0x22   :  { %p9250_p0 = pnand %p9249_p13, %p9243_p10 }
  0x24   :  { %9253 = shalt.err (!%p9250_p0)
}
  0x25   :  { %90 = dma.hbm_to_vmem [thread:$0]  %s10185_s8, 96, %s88_s30, [#allocation17]  }
  0x26   :  { %s9262_s20 = scalar_lea.vmem %s108_s17, 96  ;;  %p9267_p2 = scmp.lt.s32.totalorder %s108_s17, %s108_s17 }
  0x27   :  { %p9263_p1 = scmp.ne.s32.totalorder %s108_s17, %s9262_s20  ;;  %p9268_p3 = scmp.lt.s32.totalorder %s9262_s20, %s9262_s20 }
  0x29   :  { %p9269_p4 = por %p9268_p3, %p9267_p2 }
  0x2b   :  { %p9270_p5 = pnand %p9269_p4, %p9263_p1 }
  0x2d   :  { %9273 = shalt.err (!%p9270_p5)
}
  0x2e   :  { %110 = dma.hbm_to_vmem [thread:$0]  %s10188_s11, 96, %s108_s17, [#allocation20]  }
  0x2f   :  { %s9518_s22 = smov [#allocation22]   ;;  %s9519_s24 = smov [#allocation7]  }
  0x30   :  { %s128_s23 = sshll.u32 %s9518_s22, 4  ;;  %s34_s25 = sshll.u32 %s9519_s24, 4  ;;  %s129_s23 = int_to_ptr.vmem [resolvable:$true] %s128_s23  ;;  %s35_s25 = int_to_ptr.vmem [resolvable:$true] %s34_s25 }
  0x31   :  { %s9282_s26 = scalar_lea.vmem %s129_s23, 6144  ;;  %p9287_p7 = scmp.lt.s32.totalorder %s129_s23, %s129_s23 }
  0x32   :  { %p9283_p6 = scmp.ne.s32.totalorder %s129_s23, %s9282_s26  ;;  %p9288_p8 = scmp.lt.s32.totalorder %s9282_s26, %s9282_s26 }
  0x34   :  { %p9289_p9 = por %p9288_p8, %p9287_p7 }
  0x36   :  { %p9290_p10 = pnand %p9289_p9, %p9283_p6 }
  0x38   :  { %9293 = shalt.err (!%p9290_p10)
}
  0x39   :  { %s9520_s8 = smov 64   ;;  %s9521_s27 = smov 4  }
  0x3a   :  { %134 = dma.hbm_to_vmem [thread:$0]  %s10190_s13, 6144, %s129_s23, [#allocation23], %s9520_s8, %s9520_s8, %s9521_s27  }
  0x3b   :  { %s9302_s29 = scalar_lea.vmem %s35_s25, 256  ;;  %p9307_p12 = scmp.lt.s32.totalorder %s35_s25, %s35_s25 }
  0x3c   :  { %p9303_p11 = scmp.ne.s32.totalorder %s35_s25, %s9302_s29  ;;  %p9308_p13 = scmp.lt.s32.totalorder %s9302_s29, %s9302_s29 }
  0x3e   :  { %p9309_p0 = por %p9308_p13, %p9307_p12 }
  0x40   :  { %p9310_p1 = pnand %p9309_p0, %p9303_p11 }
  0x42   :  { %9313 = shalt.err (!%p9310_p1)
}
  0x43   :  { %40 = dma.hbm_to_vmem [thread:$0]  %s10178_s1, 256, %s35_s25, [#allocation8], %s9520_s8, %s9520_s8, %s9521_s27  }
  0x44   :  { %s9522_s17 = smov [#allocation12]   ;;  %s9523_s2 = smov [#allocation15]  }
  0x45   :  { %s57_s18 = sshll.u32 %s9522_s17, 4  ;;  %s77_s19 = sshll.u32 %s9523_s2, 4  ;;  %s58_s18 = int_to_ptr.vmem [resolvable:$true] %s57_s18  ;;  %s78_s19 = int_to_ptr.vmem [resolvable:$true] %s77_s19 }
  0x46   :  { %s9322_s13 = scalar_lea.vmem %s58_s18, 256  ;;  %p9327_p3 = scmp.lt.s32.totalorder %s58_s18, %s58_s18 }
  0x47   :  { %p9323_p2 = scmp.ne.s32.totalorder %s58_s18, %s9322_s13  ;;  %p9328_p4 = scmp.lt.s32.totalorder %s9322_s13, %s9322_s13 }
  0x49   :  { %p9329_p5 = por %p9328_p4, %p9327_p3 }
  0x4b   :  { %p9330_p6 = pnand %p9329_p5, %p9323_p2 }
  0x4d   :  { %9333 = shalt.err (!%p9330_p6)
}
  0x4e   :  { %60 = dma.hbm_to_vmem [thread:$0]  %s10181_s4, 256, %s58_s18, [#allocation11]  }
  0x4f   :  { %s9342_s21 = scalar_lea.vmem %s78_s19, 192  ;;  %p9347_p8 = scmp.lt.s32.totalorder %s78_s19, %s78_s19 }
  0x50   :  { %p9343_p7 = scmp.ne.s32.totalorder %s78_s19, %s9342_s21  ;;  %p9348_p9 = scmp.lt.s32.totalorder %s9342_s21, %s9342_s21 }
  0x52   :  { %p9349_p10 = por %p9348_p9, %p9347_p8 }
  0x54   :  { %p9350_p11 = pnand %p9349_p10, %p9343_p7 }
  0x56   :  { %9353 = shalt.err (!%p9350_p11)
}
  0x57   :  { %80 = dma.hbm_to_vmem [thread:$0]  %s10184_s7, 192, %s78_s19, [#allocation14]  }
  0x58   :  { %s9524_s23 = smov [#allocation18]   ;;  %s9525_s25 = smov [#allocation21]  }
  0x59   :  { %s97_s24 = sshll.u32 %s9524_s23, 4  ;;  %s116_s26 = sshll.u32 %s9525_s25, 4  ;;  %s98_s24 = int_to_ptr.vmem [resolvable:$true] %s97_s24  ;;  %s117_s26 = int_to_ptr.vmem [resolvable:$true] %s116_s26 }
  0x5a   :  { %s9362_s28 = scalar_lea.vmem %s98_s24, 96  ;;  %p9367_p13 = scmp.lt.s32.totalorder %s98_s24, %s98_s24 }
  0x5b   :  { %p9363_p12 = scmp.ne.s32.totalorder %s98_s24, %s9362_s28  ;;  %p9368_p0 = scmp.lt.s32.totalorder %s9362_s28, %s9362_s28 }
  0x5d   :  { %p9369_p1 = por %p9368_p0, %p9367_p13 }
  0x5f   :  { %p9370_p2 = pnand %p9369_p1, %p9363_p12 }
  0x61   :  { %9373 = shalt.err (!%p9370_p2)
}
  0x62   :  { %100 = dma.hbm_to_vmem [thread:$0]  %s10186_s9, 96, %s98_s24, [#allocation17]  }
  0x63   :  { %s9382_s29 = scalar_lea.vmem %s117_s26, 2048  ;;  %p9387_p4 = scmp.lt.s32.totalorder %s117_s26, %s117_s26 }
  0x64   :  { %p9383_p3 = scmp.ne.s32.totalorder %s117_s26, %s9382_s29  ;;  %p9388_p5 = scmp.lt.s32.totalorder %s9382_s29, %s9382_s29 }
  0x66   :  { %p9389_p6 = por %p9388_p5, %p9387_p4 }
  0x68   :  { %p9390_p7 = pnand %p9389_p6, %p9383_p3 }
  0x6a   :  { %9393 = shalt.err (!%p9390_p7)
}
  0x6b   :  { %122 = dma.hbm_to_vmem [thread:$0]  %s10189_s12, 2048, %s117_s26, [#allocation20], %s9520_s8, %s9520_s8, %s9521_s27  }
  0x6c   :  { %s9526_s16 = smov [#allocation24]  }
  0x6d   :  { %s141_s17 = sshll.u32 %s9526_s16, 4  ;;  %s142_s17 = int_to_ptr.vmem [resolvable:$true] %s141_s17 }
  0x6e   :  { %s9402_s18 = scalar_lea.vmem %s142_s17, 16  ;;  %s9406_s9 = scalar_lea.vmem %s142_s17, 32 }
  0x6f   :  { %p9403_p8 = scmp.ne.s32.totalorder %s142_s17, %s9402_s18  ;;  %p9407_p9 = scmp.lt.s32.totalorder %s142_s17, %s142_s17 }
  0x70   :  { %p9408_p10 = scmp.lt.s32.totalorder %s9406_s9, %s9402_s18 }
  0x72   :  { %p9409_p11 = por %p9408_p10, %p9407_p9 }
  0x74   :  { %p9410_p12 = pnand %p9409_p11, %p9403_p8 }
  0x76   :  { %9413 = shalt.err (!%p9410_p12)
}
  0x77   :  { %144 = dma.hbm_to_vmem [thread:$0]  %s10191_s14, 16, %s142_s17, [#allocation23]  }
  0x78   :  { %9494 = dma.done.wait [#allocation8], 256  }
  0x79   :  { %9495 = vsyncadd [#allocation8], 4294967040 }
  0x7a   :  { %9496 = dma.done.wait [#allocation11], 272  }
  0x7b   :  { %9497 = vsyncadd [#allocation11], 4294967024 }
  0x7c   :  { %9498 = dma.done.wait [#allocation14], 224  }
  0x7d   :  { %9499 = vsyncadd [#allocation14], 4294967072 }
  0x7e   :  { %9500 = dma.done.wait [#allocation17], 192  }
  0x7f   :  { %9501 = vsyncadd [#allocation17], 4294967104 }
  0x80   :  { %9502 = dma.done.wait [#allocation20], 2144  }
  0x81   :  { %9503 = vsyncadd [#allocation20], 4294965152 }
  0x82   :  { %9504 = dma.done.wait [#allocation23], 6160  }
  0x83   :  { %9505 = vsyncadd [#allocation23], 4294961136  ;;  %v8261_v0 = vld [vmem:[#allocation7 + $0x8] sm:$0xff]   ;;  %v8262_v1 = vld [vmem:[#allocation7] sm:$0xff]   ;;  %vm466_vm0 = vcmask 261120   ;;  %v9527_v36 = vmov 0.0  }
  0x84   :  { %8172 = vmatprep.subr.bf16.mxu0 %v8261_v0  ;;  %v8263_v2 = vld [vmem:[%s10177_s0] sm:$0xff]   ;;  %v8264_v3 = vld [vmem:[%s10177_s0 + $0x8] sm:$0xff]   ;;  %v8265_v4 = vld [vmem:[%s10177_s0 + $0x10] sm:$0xff]   ;;  %183 = vst [vmem:[#allocation2] sm:$0x3] %v9527_v36  ;;  %s9529_s26 = smov [#allocation4]  }
  0x85   :  { %8173 = vmatpush3.bf16.msra.mxu0 %v8261_v0  ;;  %8176 = vmatprep.mubr.msk.bf16.mxu0 %vm466_vm0, %v8263_v2  ;;  %v8266_v5 = vld [vmem:[%s10177_s0 + $0x18] sm:$0xff]   ;;  %v8267_v6 = vld [vmem:[%s10177_s0 + $0x20] sm:$0xff]   ;;  %v8268_v7 = vld [vmem:[%s10177_s0 + $0x28] sm:$0xff]   ;;  %s203_s28 = sshll.u32 %s9529_s26, 4  ;;  %s204_s28 = int_to_ptr.vmem [resolvable:$true] %s203_s28 }
  0x86   :  { %8174 = vmatprep.subr.bf16.mxu0 %v8262_v1  ;;  %v8269_v8 = vld [vmem:[%s10177_s0 + $0x30] sm:$0xff]   ;;  %v8270_v9 = vld [vmem:[%s10177_s0 + $0x38] sm:$0xff]   ;;  %v8271_v10 = vld [vmem:[%s10177_s0 + $0x40] sm:$0xff]  }
  0x87   :  { %v8272_v11 = vld [vmem:[%s10177_s0 + $0x48] sm:$0xff]   ;;  %v8273_v12 = vld [vmem:[%s10177_s0 + $0x50] sm:$0xff]   ;;  %v8274_v13 = vld [vmem:[%s10177_s0 + $0x58] sm:$0xff]  }
  0x88   :  { %v8275_v14 = vld [vmem:[%s10177_s0 + $0x60] sm:$0xff]   ;;  %v8276_v15 = vld [vmem:[%s10177_s0 + $0x68] sm:$0xff]   ;;  %v8277_v16 = vld [vmem:[%s10177_s0 + $0x70] sm:$0xff]  }
  0x89   :  { %8175 = vmatpush3.bf16.msra.mxu0 %v8262_v1  ;;  %v8278_v17 = vld [vmem:[%s10177_s0 + $0x78] sm:$0xff]   ;;  %v8279_v18 = vld [vmem:[%s10177_s0 + $0x80] sm:$0xff]   ;;  %v8280_v19 = vld [vmem:[%s10177_s0 + $0x88] sm:$0xff]  }
  0x8a   :  { %v8281_v20 = vld [vmem:[%s10177_s0 + $0x90] sm:$0xff]   ;;  %v8282_v21 = vld [vmem:[%s10177_s0 + $0x98] sm:$0xff]   ;;  %v8283_v22 = vld [vmem:[%s10177_s0 + $0xa0] sm:$0xff]  }
  0x8b   :  { %v8284_v23 = vld [vmem:[%s10177_s0 + $0xa8] sm:$0xff]   ;;  %v8285_v24 = vld [vmem:[%s10177_s0 + $0xb0] sm:$0xff]   ;;  %v8286_v25 = vld [vmem:[%s10177_s0 + $0xb8] sm:$0xff]  }
  0x8c   :  { %8177 = vmatmul.mubr.msk.bf16.vlgmr.msra.gmra.mxu0 %vm466_vm0, %v8264_v3  ;;  %v8287_v26 = vld [vmem:[%s10177_s0 + $0xc0] sm:$0xff]   ;;  %v8288_v27 = vld [vmem:[%s10177_s0 + $0xc8] sm:$0xff]   ;;  %v8289_v28 = vld [vmem:[%s10177_s0 + $0xd0] sm:$0xff]  }
  0x8d   :  { %8180 = vmatprep.mubr.msk.bf16.mxu0 %vm466_vm0, %v8265_v4  ;;  %v8290_v29 = vld [vmem:[%s10177_s0 + $0xd8] sm:$0xff]   ;;  %v8291_v30 = vld [vmem:[%s10177_s0 + $0xe0] sm:$0xff]   ;;  %v8292_v31 = vld [vmem:[%s10177_s0 + $0xe8] sm:$0xff]  }
  0x8e   :  { %v8293_v32 = vld [vmem:[%s10177_s0 + $0xf0] sm:$0xff]   ;;  %v8294_v33 = vld [vmem:[%s10177_s0 + $0xf8] sm:$0xff]   ;;  %s9528_s0 = smov [#allocation3]  }
  0x8f   :  { %v9785_v37 = vld [vmem:[#allocation10] ss:$0 sm:$0xff]  ;;  %s191_s25 = sshll.u32 %s9528_s0, 4  ;;  %s192_s25 = int_to_ptr.vmem [resolvable:$true] %s191_s25 }
  0x90   :  { %s9422_s4 = scalar_lea.vmem %s192_s25, 16384  ;;  %p9427_p0 = scmp.lt.s32.totalorder %s192_s25, %s192_s25 }
  0x91   :  { %p9423_p13 = scmp.ne.s32.totalorder %s192_s25, %s9422_s4  ;;  %p9428_p1 = scmp.lt.s32.totalorder %s9422_s4, %s9422_s4 }
  0x93   :  { %p9429_p2 = por %p9428_p1, %p9427_p0 }
  0x94   :  { %8181 = vmatmul.mubr.msk.bf16.gmra.mxu0 %vm466_vm0, %v8266_v5 }
  0x95   :  { %8184 = vmatprep.mubr.msk.bf16.mxu0 %vm466_vm0, %v8267_v6  ;;  %p9430_p3 = pnand %p9429_p2, %p9423_p13 }
  0x9c   :  { %8185 = vmatmul.mubr.msk.bf16.gmra.mxu0 %vm466_vm0, %v8268_v7 }
  0x9d   :  { %8188 = vmatprep.mubr.msk.bf16.mxu0 %vm466_vm0, %v8269_v8 }
  0xa4   :  { %8189 = vmatmul.mubr.msk.bf16.gmra.mxu0 %vm466_vm0, %v8270_v9 }
  0xa5   :  { %8192 = vmatprep.mubr.msk.bf16.mxu0 %vm466_vm0, %v8271_v10 }
  0xac   :  { %8193 = vmatmul.mubr.msk.bf16.gmra.mxu0 %vm466_vm0, %v8272_v11 }
  0xad   :  { %8196 = vmatprep.mubr.msk.bf16.mxu0 %vm466_vm0, %v8273_v12 }
  0xb4   :  { %8197 = vmatmul.mubr.msk.bf16.gmra.mxu0 %vm466_vm0, %v8274_v13 }
  0xb5   :  { %8200 = vmatprep.mubr.msk.bf16.mxu0 %vm466_vm0, %v8275_v14 }
  0xbc   :  { %8201 = vmatmul.mubr.msk.bf16.gmra.mxu0 %vm466_vm0, %v8276_v15 }
  0xbd   :  { %8204 = vmatprep.mubr.msk.bf16.mxu0 %vm466_vm0, %v8277_v16 }
  0xc4   :  { %8205 = vmatmul.mubr.msk.bf16.gmra.mxu0 %vm466_vm0, %v8278_v17 }
  0xc5   :  { %8208 = vmatprep.mubr.msk.bf16.mxu0 %vm466_vm0, %v8279_v18 }
  0xcc   :  { %8209 = vmatmul.mubr.msk.bf16.gmra.mxu0 %vm466_vm0, %v8280_v19 }
  0xcd   :  { %8212 = vmatprep.mubr.msk.bf16.mxu0 %vm466_vm0, %v8281_v20 }
  0xd4   :  { %8213 = vmatmul.mubr.msk.bf16.gmra.mxu0 %vm466_vm0, %v8282_v21 }
  0xd5   :  { %8216 = vmatprep.mubr.msk.bf16.mxu0 %vm466_vm0, %v8283_v22 }
  0xdc   :  { %8217 = vmatmul.mubr.msk.bf16.gmra.mxu0 %vm466_vm0, %v8284_v23 }
  0xdd   :  { %8220 = vmatprep.mubr.msk.bf16.mxu0 %vm466_vm0, %v8285_v24 }
  0xe4   :  { %8221 = vmatmul.mubr.msk.bf16.gmra.mxu0 %vm466_vm0, %v8286_v25 }
  0xe5   :  { %8224 = vmatprep.mubr.msk.bf16.mxu0 %vm466_vm0, %v8287_v26 }
  0xec   :  { %8225 = vmatmul.mubr.msk.bf16.gmra.mxu0 %vm466_vm0, %v8288_v27 }
  0xed   :  { %8228 = vmatprep.mubr.msk.bf16.mxu0 %vm466_vm0, %v8289_v28 }
  0xf4   :  { %8229 = vmatmul.mubr.msk.bf16.gmra.mxu0 %vm466_vm0, %v8290_v29 }
  0xf5   :  { %8232 = vmatprep.mubr.msk.bf16.mxu0 %vm466_vm0, %v8291_v30 }
  0xfc   :  { %8233 = vmatmul.mubr.msk.bf16.gmra.mxu0 %vm466_vm0, %v8292_v31 }
  0xfd   :  { %8236 = vmatprep.mubr.msk.bf16.mxu0 %vm466_vm0, %v8293_v32 }
 0x104   :  { %8237 = vmatmul.mubr.msk.bf16.gmra.mxu0 %vm466_vm0, %v8294_v33 }
 0x14c   :  { %v8178_v34 = vpop.f32.mrf.mxu0 }
 0x14d   :  { %v606_v41 = vadd.f32 %v8178_v34, %v9785_v37 }
 0x14e   :  { %v597_v35 = vpop.f32.mrf.mxu0 }
 0x14f   :  { %v598_v39 = vadd.f32 %v9785_v37, %v597_v35  ;;  %v854_v48 = vmax.f32 %v606_v41, 0.0 }
 0x150   :  { %v8179_v38 = vpop.f32.mrf.mxu0 }
 0x151   :  { %v852_v44 = vmax.f32 %v598_v39, 0.0  ;;  %v609_v45 = vadd.f32 %v8179_v38, %v9785_v37 }
 0x152   :  { %v600_v40 = vpop.f32.mrf.mxu0 }
 0x153   :  { %v601_v42 = vadd.f32 %v9785_v37, %v600_v40  ;;  %v855_v52 = vmax.f32 %v609_v45, 0.0 }
 0x154   :  { %v8182_v43 = vpop.f32.mrf.mxu0 }
 0x155   :  { %v853_v46 = vmax.f32 %v601_v42, 0.0  ;;  %v622_v55 = vadd.f32 %v8182_v43, %v9785_v37 }
 0x156   :  { %v613_v47 = vpop.f32.mrf.mxu0 }
 0x157   :  { %v917_v49 = vadd.f32 %v853_v46, %v852_v44  ;;  %v614_v50 = vadd.f32 %v9785_v37, %v613_v47  ;;  %v858_v0 = vmax.f32 %v622_v55, 0.0 }
 0x158   :  { %v8183_v51 = vpop.f32.mrf.mxu0 }
 0x159   :  { %v918_v53 = vadd.f32 %v917_v49, %v854_v48  ;;  %v856_v56 = vmax.f32 %v614_v50, 0.0  ;;  %v625_v61 = vadd.f32 %v8183_v51, %v9785_v37 }
 0x15a   :  { %v616_v54 = vpop.f32.mrf.mxu0 }
 0x15b   :  { %v919_v57 = vadd.f32 %v918_v53, %v855_v52  ;;  %v617_v58 = vadd.f32 %v9785_v37, %v616_v54  ;;  %v859_v4 = vmax.f32 %v625_v61, 0.0 }
 0x15c   :  { %v8186_v59 = vpop.f32.mrf.mxu0 }
 0x15d   :  { %v920_v60 = vadd.f32 %v919_v57, %v856_v56  ;;  %v857_v62 = vmax.f32 %v617_v58, 0.0 }
 0x15e   :  { %v629_v63 = vpop.f32.mrf.mxu0 }
 0x15f   :  { %v921_v1 = vadd.f32 %v920_v60, %v857_v62  ;;  %v630_v2 = vadd.f32 %v9785_v37, %v629_v63 }
 0x160   :  { %v8187_v3 = vpop.f32.mrf.mxu0 }
 0x161   :  { %v922_v5 = vadd.f32 %v921_v1, %v858_v0 }
 0x162   :  { %v632_v6 = vpop.f32.mrf.mxu0 }
 0x163   :  { %9433 = shalt.err (!%p9430_p3)  }
 0x164   :  { %194 = dma.hbm_to_vmem [thread:$0]  %s10180_s3, 16384, %s192_s25, [#allocation6]  ;;  %v638_v7 = vadd.f32 %v8186_v59, %v9785_v37  ;;  %v860_v8 = vmax.f32 %v630_v2, 0.0  ;;  %v923_v9 = vadd.f32 %v922_v5, %v859_v4  ;;  %v633_v10 = vadd.f32 %v9785_v37, %v632_v6  ;;  %v8190_v11 = vpop.f32.mrf.mxu0 }
 0x165   :  { %s9442_s7 = scalar_lea.vmem %s204_s28, 32768  ;;  %p9447_p5 = scmp.lt.s32.totalorder %s204_s28, %s204_s28 }
 0x166   :  { %p9443_p4 = scmp.ne.s32.totalorder %s204_s28, %s9442_s7  ;;  %p9448_p6 = scmp.lt.s32.totalorder %s9442_s7, %s9442_s7 }
 0x168   :  { %p9449_p7 = por %p9448_p6, %p9447_p5 }
 0x16a   :  { %p9450_p8 = pnand %p9449_p7, %p9443_p4 }
 0x16c   :  { %9453 = shalt.err (!%p9450_p8)  }
 0x16d   :  { %206 = dma.hbm_to_vmem [thread:$0]  %s10182_s5, 32768, %s204_s28, [#allocation6 + $0x1]  ;;  %v924_v12 = vadd.f32 %v923_v9, %v860_v8  ;;  %v641_v13 = vadd.f32 %v8187_v3, %v9785_v37  ;;  %v861_v14 = vmax.f32 %v633_v10, 0.0  ;;  %v645_v15 = vpop.f32.mrf.mxu0  ;;  %v862_v16 = vmax.f32 %v638_v7, 0.0 }
 0x16e   :  { %s9530_s3 = smov [#allocation5]   ;;  %v646_v18 = vadd.f32 %v9785_v37, %v645_v15 }
 0x16f   :  { %s215_s17 = sshll.u32 %s9530_s3, 4  ;;  %v925_v17 = vadd.f32 %v924_v12, %v861_v14  ;;  %s216_s17 = int_to_ptr.vmem [resolvable:$true] %s215_s17 }
 0x170   :  { %s9462_s18 = scalar_lea.vmem %s216_s17, 36864  ;;  %p9467_p10 = scmp.lt.s32.totalorder %s216_s17, %s216_s17 }
 0x171   :  { %p9463_p9 = scmp.ne.s32.totalorder %s216_s17, %s9462_s18  ;;  %p9468_p11 = scmp.lt.s32.totalorder %s9462_s18, %s9462_s18 }
 0x173   :  { %p9469_p12 = por %p9468_p11, %p9467_p10 }
 0x175   :  { %p9470_p13 = pnand %p9469_p12, %p9463_p9 }
 0x177   :  { %9473 = shalt.err (!%p9470_p13)  }
 0x178   :  { %218 = dma.hbm_to_vmem [thread:$0]  %s10187_s10, 36864, %s216_s17, [#allocation6 + $0x2]  ;;  %v8191_v19 = vpop.f32.mrf.mxu0  ;;  %v863_v20 = vmax.f32 %v641_v13, 0.0  ;;  %v926_v21 = vadd.f32 %v925_v17, %v862_v16  ;;  %v654_v23 = vadd.f32 %v8190_v11, %v9785_v37  ;;  %v864_v24 = vmax.f32 %v646_v18, 0.0 }
 0x179   :  { %v657_v29 = vadd.f32 %v8191_v19, %v9785_v37  ;;  %vm993_vm1 = vcmask 1041409  }
 0x17a   :  { %v648_v22 = vpop.f32.mrf.mxu0  ;;  %v927_v25 = vadd.f32 %v926_v21, %v863_v20  ;;  %v866_v32 = vmax.f32 %v654_v23, 0.0 }
 0x17b   :  { %v649_v26 = vadd.f32 %v9785_v37, %v648_v22  ;;  %v867_v36 = vmax.f32 %v657_v29, 0.0 }
 0x17c   :  { %v8194_v27 = vpop.f32.mrf.mxu0  ;;  %v928_v28 = vadd.f32 %v927_v25, %v864_v24 }
 0x17d   :  { %v865_v30 = vmax.f32 %v649_v26, 0.0  ;;  %v670_v40 = vadd.f32 %v8194_v27, %v9785_v37 }
 0x17e   :  { %v661_v31 = vpop.f32.mrf.mxu0 }
 0x17f   :  { %v929_v33 = vadd.f32 %v928_v28, %v865_v30  ;;  %v662_v34 = vadd.f32 %v9785_v37, %v661_v31  ;;  %v870_v49 = vmax.f32 %v670_v40, 0.0 }
 0x180   :  { %v8195_v35 = vpop.f32.mrf.mxu0 }
 0x181   :  { %v930_v38 = vadd.f32 %v929_v33, %v866_v32  ;;  %v868_v41 = vmax.f32 %v662_v34, 0.0  ;;  %v673_v46 = vadd.f32 %v8195_v35, %v9785_v37 }
 0x182   :  { %v664_v39 = vpop.f32.mrf.mxu0 }
 0x183   :  { %v931_v42 = vadd.f32 %v930_v38, %v867_v36  ;;  %v665_v43 = vadd.f32 %v9785_v37, %v664_v39  ;;  %v871_v53 = vmax.f32 %v673_v46, 0.0 }
 0x184   :  { %v8198_v44 = vpop.f32.mrf.mxu0 }
 0x185   :  { %v932_v45 = vadd.f32 %v931_v42, %v868_v41  ;;  %v869_v47 = vmax.f32 %v665_v43, 0.0  ;;  %v686_v56 = vadd.f32 %v8198_v44, %v9785_v37 }
 0x186   :  { %v677_v48 = vpop.f32.mrf.mxu0 }
 0x187   :  { %v933_v50 = vadd.f32 %v932_v45, %v869_v47  ;;  %v678_v51 = vadd.f32 %v9785_v37, %v677_v48  ;;  %v874_v1 = vmax.f32 %v686_v56, 0.0 }
 0x188   :  { %v8199_v52 = vpop.f32.mrf.mxu0 }
 0x189   :  { %v934_v54 = vadd.f32 %v933_v50, %v870_v49  ;;  %v872_v57 = vmax.f32 %v678_v51, 0.0  ;;  %v689_v62 = vadd.f32 %v8199_v52, %v9785_v37 }
 0x18a   :  { %v680_v55 = vpop.f32.mrf.mxu0 }
 0x18b   :  { %v935_v58 = vadd.f32 %v934_v54, %v871_v53  ;;  %v681_v59 = vadd.f32 %v9785_v37, %v680_v55  ;;  %v875_v5 = vmax.f32 %v689_v62, 0.0 }
 0x18c   :  { %v8202_v60 = vpop.f32.mrf.mxu0 }
 0x18d   :  { %v936_v61 = vadd.f32 %v935_v58, %v872_v57  ;;  %v873_v63 = vmax.f32 %v681_v59, 0.0  ;;  %v702_v8 = vadd.f32 %v8202_v60, %v9785_v37 }
 0x18e   :  { %v693_v0 = vpop.f32.mrf.mxu0 }
 0x18f   :  { %v937_v2 = vadd.f32 %v936_v61, %v873_v63  ;;  %v694_v3 = vadd.f32 %v9785_v37, %v693_v0  ;;  %v878_v17 = vmax.f32 %v702_v8, 0.0 }
 0x190   :  { %v8203_v4 = vpop.f32.mrf.mxu0 }
 0x191   :  { %v938_v6 = vadd.f32 %v937_v2, %v874_v1  ;;  %v876_v9 = vmax.f32 %v694_v3, 0.0  ;;  %v705_v14 = vadd.f32 %v8203_v4, %v9785_v37 }
 0x192   :  { %v696_v7 = vpop.f32.mrf.mxu0 }
 0x193   :  { %v939_v10 = vadd.f32 %v938_v6, %v875_v5  ;;  %v697_v11 = vadd.f32 %v9785_v37, %v696_v7  ;;  %v879_v21 = vmax.f32 %v705_v14, 0.0 }
 0x194   :  { %v8206_v12 = vpop.f32.mrf.mxu0 }
 0x195   :  { %v940_v13 = vadd.f32 %v939_v10, %v876_v9  ;;  %v877_v15 = vmax.f32 %v697_v11, 0.0  ;;  %v718_v24 = vadd.f32 %v8206_v12, %v9785_v37 }
 0x196   :  { %v709_v16 = vpop.f32.mrf.mxu0 }
 0x197   :  { %v941_v18 = vadd.f32 %v940_v13, %v877_v15  ;;  %v710_v19 = vadd.f32 %v9785_v37, %v709_v16  ;;  %v882_v33 = vmax.f32 %v718_v24, 0.0 }
 0x198   :  { %v8207_v20 = vpop.f32.mrf.mxu0 }
 0x199   :  { %v942_v22 = vadd.f32 %v941_v18, %v878_v17  ;;  %v880_v25 = vmax.f32 %v710_v19, 0.0  ;;  %v721_v30 = vadd.f32 %v8207_v20, %v9785_v37 }
 0x19a   :  { %v712_v23 = vpop.f32.mrf.mxu0 }
 0x19b   :  { %v943_v26 = vadd.f32 %v942_v22, %v879_v21  ;;  %v713_v27 = vadd.f32 %v9785_v37, %v712_v23  ;;  %v883_v36 = vmax.f32 %v721_v30, 0.0 }
 0x19c   :  { %v8210_v28 = vpop.f32.mrf.mxu0 }
 0x19d   :  { %v944_v29 = vadd.f32 %v943_v26, %v880_v25  ;;  %v881_v31 = vmax.f32 %v713_v27, 0.0  ;;  %v734_v42 = vadd.f32 %v8210_v28, %v9785_v37 }
 0x19e   :  { %v725_v32 = vpop.f32.mrf.mxu0 }
 0x19f   :  { %v945_v34 = vadd.f32 %v944_v29, %v881_v31  ;;  %v726_v39 = vadd.f32 %v9785_v37, %v725_v32  ;;  %v886_v49 = vmax.f32 %v734_v42, 0.0 }
 0x1a0   :  { %v8211_v35 = vpop.f32.mrf.mxu0 }
 0x1a1   :  { %v946_v38 = vadd.f32 %v945_v34, %v882_v33  ;;  %v884_v45 = vmax.f32 %v726_v39, 0.0  ;;  %v737_v46 = vadd.f32 %v8211_v35, %v9785_v37 }
 0x1a2   :  { %v728_v40 = vpop.f32.mrf.mxu0 }
 0x1a3   :  { %v9829_v41 = vadd.f32 %v946_v38, %v883_v36  ;;  %v729_v43 = vadd.f32 %v9785_v37, %v728_v40  ;;  %v887_v53 = vmax.f32 %v737_v46, 0.0 }
 0x1a4   :  { %v8214_v44 = vpop.f32.mrf.mxu0 }
 0x1a5   :  { %v885_v47 = vmax.f32 %v729_v43, 0.0  ;;  %v750_v56 = vadd.f32 %v8214_v44, %v9785_v37 }
 0x1a6   :  { %v741_v48 = vpop.f32.mrf.mxu0 }
 0x1a7   :  { %v954_v50 = vadd.f32 %v885_v47, %v884_v45  ;;  %v742_v51 = vadd.f32 %v9785_v37, %v741_v48  ;;  %v890_v1 = vmax.f32 %v750_v56, 0.0 }
 0x1a8   :  { %v8215_v52 = vpop.f32.mrf.mxu0 }
 0x1a9   :  { %v955_v54 = vadd.f32 %v954_v50, %v886_v49  ;;  %v888_v57 = vmax.f32 %v742_v51, 0.0  ;;  %v753_v62 = vadd.f32 %v8215_v52, %v9785_v37 }
 0x1aa   :  { %v744_v55 = vpop.f32.mrf.mxu0 }
 0x1ab   :  { %v956_v58 = vadd.f32 %v955_v54, %v887_v53  ;;  %v745_v59 = vadd.f32 %v9785_v37, %v744_v55  ;;  %v891_v5 = vmax.f32 %v753_v62, 0.0 }
 0x1ac   :  { %v8218_v60 = vpop.f32.mrf.mxu0 }
 0x1ad   :  { %v957_v61 = vadd.f32 %v956_v58, %v888_v57  ;;  %v889_v63 = vmax.f32 %v745_v59, 0.0  ;;  %v766_v8 = vadd.f32 %v8218_v60, %v9785_v37 }
 0x1ae   :  { %v757_v0 = vpop.f32.mrf.mxu0 }
 0x1af   :  { %v958_v2 = vadd.f32 %v957_v61, %v889_v63  ;;  %v758_v3 = vadd.f32 %v9785_v37, %v757_v0  ;;  %v894_v17 = vmax.f32 %v766_v8, 0.0 }
 0x1b0   :  { %v8219_v4 = vpop.f32.mrf.mxu0 }
 0x1b1   :  { %v959_v6 = vadd.f32 %v958_v2, %v890_v1  ;;  %v892_v9 = vmax.f32 %v758_v3, 0.0  ;;  %v769_v14 = vadd.f32 %v8219_v4, %v9785_v37 }
 0x1b2   :  { %v760_v7 = vpop.f32.mrf.mxu0 }
 0x1b3   :  { %v960_v10 = vadd.f32 %v959_v6, %v891_v5  ;;  %v761_v11 = vadd.f32 %v9785_v37, %v760_v7  ;;  %v895_v21 = vmax.f32 %v769_v14, 0.0 }
 0x1b4   :  { %v8222_v12 = vpop.f32.mrf.mxu0 }
 0x1b5   :  { %v961_v13 = vadd.f32 %v960_v10, %v892_v9  ;;  %v893_v15 = vmax.f32 %v761_v11, 0.0  ;;  %v782_v24 = vadd.f32 %v8222_v12, %v9785_v37 }
 0x1b6   :  { %v773_v16 = vpop.f32.mrf.mxu0 }
 0x1b7   :  { %v962_v18 = vadd.f32 %v961_v13, %v893_v15  ;;  %v774_v19 = vadd.f32 %v9785_v37, %v773_v16  ;;  %v898_v33 = vmax.f32 %v782_v24, 0.0 }
 0x1b8   :  { %v8223_v20 = vpop.f32.mrf.mxu0 }
 0x1b9   :  { %v963_v22 = vadd.f32 %v962_v18, %v894_v17  ;;  %v896_v25 = vmax.f32 %v774_v19, 0.0  ;;  %v785_v30 = vadd.f32 %v8223_v20, %v9785_v37 }
 0x1ba   :  { %v776_v23 = vpop.f32.mrf.mxu0 }
 0x1bb   :  { %v964_v26 = vadd.f32 %v963_v22, %v895_v21  ;;  %v777_v27 = vadd.f32 %v9785_v37, %v776_v23  ;;  %v899_v38 = vmax.f32 %v785_v30, 0.0 }
 0x1bc   :  { %v8226_v28 = vpop.f32.mrf.mxu0 }
 0x1bd   :  { %v965_v29 = vadd.f32 %v964_v26, %v896_v25  ;;  %v897_v31 = vmax.f32 %v777_v27, 0.0  ;;  %v798_v42 = vadd.f32 %v8226_v28, %v9785_v37  ;;  %v948_v25 = vrot.slane %v9829_v41, 4 }
 0x1be   :  { %v789_v32 = vpop.f32.mrf.mxu0 }
 0x1bf   :  { %v966_v34 = vadd.f32 %v965_v29, %v897_v31  ;;  %v790_v35 = vadd.f32 %v9785_v37, %v789_v32  ;;  %v902_v51 = vmax.f32 %v798_v42, 0.0 }
 0x1c0   :  { %v8227_v36 = vpop.f32.mrf.mxu0 }
 0x1c1   :  { %v967_v39 = vadd.f32 %v966_v34, %v898_v33  ;;  %v900_v43 = vmax.f32 %v790_v35, 0.0  ;;  %v801_v48 = vadd.f32 %v8227_v36, %v9785_v37  ;;  %v949_v34 = vadd.f32 %v948_v25, %v9829_v41 }
 0x1c2   :  { %v792_v40 = vpop.f32.mrf.mxu0 }
 0x1c3   :  { %v968_v44 = vadd.f32 %v967_v39, %v899_v38  ;;  %v793_v45 = vadd.f32 %v9785_v37, %v792_v40  ;;  %v903_v55 = vmax.f32 %v801_v48, 0.0  ;;  %v950_v40 = vrot.slane %v949_v34, 2 }
 0x1c4   :  { %v8230_v46 = vpop.f32.mrf.mxu0 }
 0x1c5   :  { %v969_v47 = vadd.f32 %v968_v44, %v900_v43  ;;  %v901_v49 = vmax.f32 %v793_v45, 0.0  ;;  %v814_v58 = vadd.f32 %v8230_v46, %v9785_v37  ;;  %v951_v44 = vadd.f32 %v950_v40, %v949_v34 }
 0x1c6   :  { %v805_v50 = vpop.f32.mrf.mxu0 }
 0x1c7   :  { %v970_v52 = vadd.f32 %v969_v47, %v901_v49  ;;  %v806_v53 = vadd.f32 %v9785_v37, %v805_v50  ;;  %v906_v3 = vmax.f32 %v814_v58, 0.0  ;;  %v952_v47 = vrot.slane %v951_v44, 1 }
 0x1c8   :  { %v8231_v54 = vpop.f32.mrf.mxu0 }
 0x1c9   :  { %v971_v56 = vadd.f32 %v970_v52, %v902_v51  ;;  %v904_v59 = vmax.f32 %v806_v53, 0.0  ;;  %v817_v0 = vadd.f32 %v8231_v54, %v9785_v37  ;;  %v953_v50 = vadd.f32 %v952_v47, %v951_v44  ;;  %v916_v51 = vld [vmem:[#allocation2] sm:$0x3] }
 0x1ca   :  { %v808_v57 = vpop.f32.mrf.mxu0 }
 0x1cb   :  { %v972_v60 = vadd.f32 %v971_v56, %v903_v55  ;;  %v809_v61 = vadd.f32 %v9785_v37, %v808_v57  ;;  %v907_v7 = vmax.f32 %v817_v0, 0.0 }
 0x1cc   :  { %v8234_v62 = vpop.f32.mrf.mxu0 }
 0x1cd   :  { %v973_v63 = vadd.f32 %v972_v60, %v904_v59  ;;  %v905_v1 = vmax.f32 %v809_v61, 0.0  ;;  %v830_v10 = vadd.f32 %v8234_v62, %v9785_v37 }
 0x1ce   :  { %v821_v2 = vpop.f32.mrf.mxu0 }
 0x1cf   :  { %v974_v4 = vadd.f32 %v973_v63, %v905_v1  ;;  %v822_v5 = vadd.f32 %v9785_v37, %v821_v2  ;;  %v910_v19 = vmax.f32 %v830_v10, 0.0 }
 0x1d0   :  { %v8235_v6 = vpop.f32.mrf.mxu0 }
 0x1d1   :  { %v975_v8 = vadd.f32 %v974_v4, %v906_v3  ;;  %v908_v11 = vmax.f32 %v822_v5, 0.0  ;;  %v833_v16 = vadd.f32 %v8235_v6, %v9785_v37 }
 0x1d2   :  { %v824_v9 = vpop.f32.mrf.mxu0 }
 0x1d3   :  { %v976_v12 = vadd.f32 %v975_v8, %v907_v7  ;;  %v825_v13 = vadd.f32 %v9785_v37, %v824_v9  ;;  %v911_v23 = vmax.f32 %v833_v16, 0.0 }
 0x1d4   :  { %v8238_v14 = vpop.f32.mrf.mxu0 }
 0x1d5   :  { %v977_v15 = vadd.f32 %v976_v12, %v908_v11  ;;  %v909_v17 = vmax.f32 %v825_v13, 0.0  ;;  %v846_v27 = vadd.f32 %v8238_v14, %v9785_v37 }
 0x1d6   :  { %v837_v18 = vpop.f32.mrf.mxu0 }
 0x1d7   :  { %v978_v20 = vadd.f32 %v977_v15, %v909_v17  ;;  %v838_v21 = vadd.f32 %v9785_v37, %v837_v18  ;;  %v914_v35 = vmax.f32 %v846_v27, 0.0 }
 0x1d8   :  { %v8239_v22 = vpop.f32.mrf.mxu0 }
 0x1d9   :  { %v979_v24 = vadd.f32 %v978_v20, %v910_v19  ;;  %v912_v28 = vmax.f32 %v838_v21, 0.0  ;;  %v849_v32 = vadd.f32 %v8239_v22, %v9785_v37 }
 0x1da   :  { %v840_v26 = vpop.f32.mrf.mxu0 }
 0x1db   :  { %v980_v29 = vadd.f32 %v979_v24, %v911_v23  ;;  %v841_v30 = vadd.f32 %v9785_v37, %v840_v26  ;;  %v915_v38 = vmax.f32 %v849_v32, 0.0 }
 0x1dd   :  { %v981_v31 = vadd.f32 %v980_v29, %v912_v28  ;;  %v913_v33 = vmax.f32 %v841_v30, 0.0 }
 0x1df   :  { %v982_v36 = vadd.f32 %v981_v31, %v913_v33 }
 0x1e1   :  { %v983_v39 = vadd.f32 %v982_v36, %v914_v35 }
 0x1e3   :  { %v984_v42 = vadd.f32 %v983_v39, %v915_v38 }
 0x1e5   :  { %v985_v43 = vrot.slane %v984_v42, 4 }
 0x1e7   :  { %v986_v45 = vadd.f32 %v985_v43, %v984_v42 }
 0x1e9   :  { %v987_v46 = vrot.slane %v986_v45, 2 }
 0x1eb   :  { %v988_v48 = vadd.f32 %v987_v46, %v986_v45 }
 0x1ed   :  { %v989_v49 = vrot.slane %v988_v48, 1 }
 0x1ef   :  { %v990_v37 = vadd.f32 %v989_v49, %v988_v48 }
 0x1f1   :  { %v994_v52 = vsel %vm993_vm1, %v990_v37, %v953_v50 }
 0x1f2   :  { %v996_v53 = vadd.f32 %v994_v52, %v916_v51 }
 0x1f4   :  { %997 = vst [vmem:[#allocation2] sm:$0x3] %v996_v53 }
 0x1f5   :  { %9506 = dma.done.wait [#allocation6], 16384 }
 0x1f6   :  { %9507 = vsyncadd [#allocation6], 4294950912 }
 0x1f7   :  { %9508 = dma.done.wait [#allocation6 + $0x1], 32768 }
 0x1f8   :  { %9509 = vsyncadd [#allocation6 + $0x1], 4294934528 }
 0x1f9   :  { %9510 = dma.done.wait [#allocation6 + $0x2], 36864 }
 0x1fa   :  { %9511 = vsyncadd [#allocation6 + $0x2], 4294930432  ;;  %v1150_v41 = vlaneseq  ;;  %v9531_v54 = vmov 1983009808   ;;  %v9532_v56 = vmov 0   ;;  %v1130_v60 = vld [vmem:[#allocation3 + $0x380] sm:$0xff] }
 0x1fb   :  { %v4112_v55 = vunpack.c.l.s4 %v9531_v54  ;;  %1902 = vmatprep.mubr.bf16.mxu1 %v9532_v56  ;;  %2066 = vmatprep.mubr.bf16.mxu0 %v9532_v56  ;;  %v1138_v61 = vld [vmem:[#allocation3 + $0x3c0] sm:$0xff]  ;;  %vm4141_vm2 = vcmask 1041408   ;;  %v9193_v6 = vld.sshfl [vmem:[#allocation15 + $0x8] sm:$0x33 pattern:$0x76325410] }
 0x1fc   :  { %v9866_v57 = vshrl.u32 %v1150_v41, 7  ;;  %v1114_v62 = vld [vmem:[#allocation3 + $0x300] sm:$0xff]  ;;  %v7423_v63 = vcombine.high %v1130_v60, %v1138_v61  ;;  %v7422_v0 = vcombine.low %v1130_v60, %v1138_v61  ;;  %v4134_v22 = vcombine.high %v9193_v6, %v9193_v6  ;;  %s9534_s10 = smov [#allocation25]  }
 0x1fd   :  { %v4113_v58 = vunpack.c.0.s8 %v4112_v55  ;;  %v1122_v1 = vld [vmem:[#allocation3 + $0x340] sm:$0xff]  ;;  %v4149_v27 = vsel %vm4141_vm2, %v9193_v6, 0.0  ;;  %s7209_s2 = sshll.u32 %s9534_s10, 4  ;;  %s7210_s2 = int_to_ptr.vmem [resolvable:$true] %s7209_s2 }
 0x1fe   :  { %v1098_v2 = vld [vmem:[#allocation3 + $0x280] sm:$0xff]  ;;  %v7407_v4 = vcombine.high %v1114_v62, %v1122_v1  ;;  %1870 = vmatprep.subr.bf16.mxu1 %v7423_v63  ;;  %v7406_v9 = vcombine.low %v1114_v62, %v1122_v1  ;;  %v4151_v30 = vsel %vm4141_vm2, %v4134_v22, 0.0  ;;  %v1131_v63 = vld [vmem:[#allocation3 + $0x388] sm:$0xff]  ;;  %s9474_s19 = scalar_lea.vmem %s7210_s2, 32  ;;  %p9479_p1 = scmp.lt.s32.totalorder %s7210_s2, %s7210_s2 }
 0x1ff   :  { %v9869_v59 = vsub.s32 %v4113_v58, %v9866_v57  ;;  %v1106_v3 = vld [vmem:[#allocation3 + $0x2c0] sm:$0xff]  ;;  %1871 = vmatpush1.bf16.msra.mxu1 %v7422_v0  ;;  %v1015_v58 = vld [vmem:[#allocation2] sm:$0x3]  ;;  %v1139_v0 = vld [vmem:[#allocation3 + $0x3c8] sm:$0xff]  ;;  %p9475_p0 = scmp.ne.s32.totalorder %s7210_s2, %s9474_s19  ;;  %p9480_p2 = scmp.lt.s32.totalorder %s9474_s19, %s9474_s19 }
 0x200   :  { %v4106_v5 = vld [vmem:[#allocation15] sm:$0xff]  ;;  %v7391_v10 = vcombine.high %v1098_v2, %v1106_v3  ;;  %1872 = vmatprep.subr.bf16.mxu1 %v7407_v4  ;;  %v7390_v19 = vcombine.low %v1098_v2, %v1106_v3  ;;  %v1016_v2 = vmul.f32 0.00390625, %v1015_v58 }
 0x201   :  { %v4110_v7 = vcombine.high %v4106_v5, %v4106_v5  ;;  %v4117_v8 = vrot.slane %v4106_v5, %v9869_v59  ;;  %v1082_v14 = vld [vmem:[#allocation3 + $0x200] sm:$0xff]  ;;  %p9481_p3 = por %p9480_p2, %p9479_p1 }
 0x202   :  { %v1090_v15 = vld [vmem:[#allocation3 + $0x240] sm:$0xff] }
 0x203   :  { %v4124_v11 = vrot.slane %v4110_v7, %v9869_v59  ;;  %v4125_v12 = vcombine.high %v4117_v8, %v4117_v8  ;;  %v4142_v13 = vsel %vm4141_vm2, %v4117_v8, 0.0  ;;  %1873 = vmatpush1.bf16.msra.mxu1 %v7406_v9  ;;  %v7375_v21 = vcombine.high %v1082_v14, %v1090_v15  ;;  %v1066_v25 = vld [vmem:[#allocation3 + $0x180] sm:$0xff]  ;;  %v1115_v8 = vld [vmem:[#allocation3 + $0x308] sm:$0xff]  ;;  %p9482_p4 = pnand %p9481_p3, %p9475_p0 }
 0x204   :  { %1874 = vmatprep.subr.bf16.mxu1 %v7391_v10  ;;  %v1074_v26 = vld [vmem:[#allocation3 + $0x1c0] sm:$0xff]  ;;  %v7374_v29 = vcombine.low %v1082_v14, %v1090_v15  ;;  %v7425_v7 = vcombine.high %v1131_v63, %v1139_v0  ;;  %v1123_v9 = vld [vmem:[#allocation3 + $0x348] sm:$0xff] }
 0x205   :  { %v4126_v16 = vcombine.high %v4124_v11, %v4124_v11  ;;  %v4143_v17 = vsel %vm4141_vm2, %v4125_v12, 0.0  ;;  %v4145_v18 = vsel %vm4141_vm2, %v4124_v11, 0.0  ;;  %v7359_v31 = vcombine.high %v1066_v25, %v1074_v26  ;;  %v1050_v33 = vld [vmem:[#allocation3 + $0x100] sm:$0xff] }
 0x206   :  { %v4144_v20 = vadd.f32 %v4143_v17, %v4142_v13  ;;  %v1058_v34 = vld [vmem:[#allocation3 + $0x140] sm:$0xff]  ;;  %v7358_v36 = vcombine.low %v1066_v25, %v1074_v26  ;;  %v9879_v11 = vpack.c.bf16 %v1016_v2, %v1016_v2  ;;  %v7424_v13 = vcombine.low %v1131_v63, %v1139_v0  ;;  %v1099_v17 = vld [vmem:[#allocation3 + $0x288] sm:$0xff]  ;;  %v1096_v2 = vld [vmem:[#allocation3 + $0x270] sm:$0xff] }
 0x207   :  { %v4147_v23 = vsel %vm4141_vm2, %v4126_v16, 0.0  ;;  %1875 = vmatpush1.bf16.msra.mxu1 %v7390_v19  ;;  %v7343_v38 = vcombine.high %v1050_v33, %v1058_v34  ;;  %v1034_v39 = vld [vmem:[#allocation3 + $0x80] sm:$0xff]  ;;  %v7342_v46 = vcombine.low %v1050_v33, %v1058_v34  ;;  %v7409_v16 = vcombine.high %v1115_v8, %v1123_v9  ;;  %v1083_v25 = vld [vmem:[#allocation3 + $0x208] sm:$0xff] }
 0x208   :  { %v4146_v24 = vadd.f32 %v4145_v18, %v4144_v20  ;;  %1876 = vmatprep.subr.bf16.mxu1 %v7375_v21  ;;  %v1042_v40 = vld [vmem:[#allocation3 + $0xc0] sm:$0xff]  ;;  %v1107_v18 = vld [vmem:[#allocation3 + $0x2c8] sm:$0xff]  ;;  %v7408_v21 = vcombine.low %v1115_v8, %v1123_v9  ;;  %v1072_v9 = vld [vmem:[#allocation3 + $0x1b0] sm:$0xff] }
 0x209   :  { %v1134_v42 = vld [vmem:[#allocation3 + $0x3a0] sm:$0xff]  ;;  %v7327_v49 = vcombine.high %v1034_v39, %v1042_v40  ;;  %v7326_v55 = vcombine.low %v1034_v39, %v1042_v40  ;;  %v1091_v26 = vld [vmem:[#allocation3 + $0x248] sm:$0xff] }
 0x20a   :  { %v4148_v28 = vadd.f32 %v4147_v23, %v4146_v24  ;;  %v1142_v43 = vld [vmem:[#allocation3 + $0x3e0] sm:$0xff]  ;;  %v7393_v24 = vcombine.high %v1099_v17, %v1107_v18  ;;  %v7377_v33 = vcombine.high %v1083_v25, %v1091_v26  ;;  %v1075_v34 = vld [vmem:[#allocation3 + $0x1c8] sm:$0xff]  ;;  %v7376_v40 = vcombine.low %v1083_v25, %v1091_v26  ;;  %v1084_v26 = vld [vmem:[#allocation3 + $0x210] sm:$0xff] }
 0x20b   :  { %1877 = vmatpush1.bf16.msra.mxu1 %v7374_v29  ;;  %v7431_v44 = vcombine.high %v1134_v42, %v1142_v43  ;;  %v1118_v45 = vld [vmem:[#allocation3 + $0x320] sm:$0xff]  ;;  %v7430_v47 = vcombine.low %v1134_v42, %v1142_v43  ;;  %v7392_v29 = vcombine.low %v1099_v17, %v1107_v18  ;;  %v1051_v42 = vld [vmem:[#allocation3 + $0x108] sm:$0xff]  ;;  %v1100_v18 = vld [vmem:[#allocation3 + $0x290] sm:$0xff] }
 0x20c   :  { %v4150_v32 = vadd.f32 %v4149_v27, %v4148_v28  ;;  %1878 = vmatprep.subr.bf16.mxu1 %v7359_v31  ;;  %v1126_v48 = vld [vmem:[#allocation3 + $0x360] sm:$0xff]  ;;  %v1059_v43 = vld [vmem:[#allocation3 + $0x148] sm:$0xff] }
 0x20d   :  { %2034 = vmatprep.subr.bf16.mxu0 %v7431_v44  ;;  %v7415_v50 = vcombine.high %v1118_v45, %v1126_v48  ;;  %v1102_v51 = vld [vmem:[#allocation3 + $0x2a0] sm:$0xff]  ;;  %v7414_v41 = vcombine.low %v1118_v45, %v1126_v48 }
 0x20e   :  { %v4152_v35 = vadd.f32 %v4151_v30, %v4150_v32  ;;  %v1110_v37 = vld [vmem:[#allocation3 + $0x2e0] sm:$0xff]  ;;  %2035 = vmatpush1.bf16.msra.mxu0 %v7430_v47  ;;  %v1067_v30 = vld [vmem:[#allocation3 + $0x188] sm:$0xff]  ;;  %v1128_v47 = vld [vmem:[#allocation3 + $0x370] sm:$0xff] }
 0x20f   :  { %1879 = vmatpush1.bf16.msra.mxu1 %v7358_v36  ;;  %v1018_v52 = vld [vmem:[#allocation3] sm:$0xff]  ;;  %2036 = vmatprep.subr.bf16.mxu0 %v7415_v50  ;;  %v7399_v54 = vcombine.high %v1102_v51, %v1110_v37  ;;  %v7398_v1 = vcombine.low %v1102_v51, %v1110_v37  ;;  %v1136_v36 = vld [vmem:[#allocation3 + $0x3b0] sm:$0xff]  ;;  %v7361_v44 = vcombine.high %v1067_v30, %v1075_v34  ;;  %v1035_v50 = vld [vmem:[#allocation3 + $0x88] sm:$0xff] }
 0x210   :  { %4153 = vadd.xlane.f32.xlu0 %v4152_v35  ;;  %1880 = vmatprep.subr.bf16.mxu1 %v7343_v38  ;;  %v1026_v53 = vld [vmem:[#allocation3 + $0x40] sm:$0xff]  ;;  %v1144_v38 = vld [vmem:[#allocation3 + $0x3f0] sm:$0xff]  ;;  %v1043_v51 = vld [vmem:[#allocation3 + $0xc8] sm:$0xff]  ;;  %v7345_v37 = vcombine.high %v1051_v42, %v1059_v43 }
 0x211   :  { %v1086_v60 = vld [vmem:[#allocation3 + $0x220] sm:$0xff]  ;;  %v7311_v62 = vcombine.high %v1018_v52, %v1026_v53  ;;  %v7310_v4 = vcombine.low %v1018_v52, %v1026_v53  ;;  %v7435_v48 = vcombine.high %v1136_v36, %v1144_v38  ;;  %v7434_v52 = vcombine.low %v1136_v36, %v1144_v38  ;;  %v1032_v36 = vld [vmem:[#allocation3 + $0x70] sm:$0xff] }
 0x212   :  { %v1094_v61 = vld [vmem:[#allocation3 + $0x260] sm:$0xff]  ;;  %2037 = vmatpush1.bf16.msra.mxu0 %v7414_v41  ;;  %v7344_v41 = vcombine.low %v1051_v42, %v1059_v43  ;;  %v7329_v58 = vcombine.high %v1035_v50, %v1043_v51  ;;  %v7328_v0 = vcombine.low %v1035_v50, %v1043_v51  ;;  %v1036_v50 = vld [vmem:[#allocation3 + $0x90] sm:$0xff] }
 0x213   :  { %1881 = vmatpush1.bf16.msra.mxu1 %v7342_v46  ;;  %2038 = vmatprep.subr.bf16.mxu0 %v7399_v54  ;;  %v7383_v3 = vcombine.high %v1086_v60, %v1094_v61  ;;  %v1070_v5 = vld [vmem:[#allocation3 + $0x1a0] sm:$0xff]  ;;  %v7382_v10 = vcombine.low %v1086_v60, %v1094_v61  ;;  %v1120_v46 = vld [vmem:[#allocation3 + $0x330] sm:$0xff]  ;;  %v1019_v60 = vld [vmem:[#allocation3 + $0x8] sm:$0xff] }
 0x214   :  { %1882 = vmatprep.subr.bf16.mxu1 %v7327_v49  ;;  %v1078_v6 = vld [vmem:[#allocation3 + $0x1e0] sm:$0xff]  ;;  %v7360_v49 = vcombine.low %v1067_v30, %v1075_v34  ;;  %v7419_v53 = vcombine.high %v1120_v46, %v1128_v47  ;;  %v1104_v54 = vld [vmem:[#allocation3 + $0x2b0] sm:$0xff]  ;;  %v1027_v61 = vld [vmem:[#allocation3 + $0x48] sm:$0xff] }
 0x215   :  { %v7367_v12 = vcombine.high %v1070_v5, %v1078_v6  ;;  %v1054_v14 = vld [vmem:[#allocation3 + $0x120] sm:$0xff]  ;;  %v7366_v19 = vcombine.low %v1070_v5, %v1078_v6  ;;  %v1140_v5 = vld [vmem:[#allocation3 + $0x3d0] sm:$0xff]  ;;  %v7312_v8 = vcombine.low %v1019_v60, %v1027_v61 }
 0x216   :  { %2039 = vmatpush1.bf16.msra.mxu0 %v7398_v1  ;;  %v1062_v15 = vld [vmem:[#allocation3 + $0x160] sm:$0xff]  ;;  %v1088_v1 = vld [vmem:[#allocation3 + $0x230] sm:$0xff] }
 0x217   :  { %1883 = vmatpush1.bf16.msra.mxu1 %v7326_v55  ;;  %2040 = vmatprep.subr.bf16.mxu0 %v7383_v3  ;;  %v7351_v20 = vcombine.high %v1054_v14, %v1062_v15  ;;  %v1038_v22 = vld [vmem:[#allocation3 + $0xa0] sm:$0xff]  ;;  %v7350_v27 = vcombine.low %v1054_v14, %v1062_v15  ;;  %v1112_v55 = vld [vmem:[#allocation3 + $0x2f0] sm:$0xff]  ;;  %v7313_v3 = vcombine.high %v1019_v60, %v1027_v61 }
 0x218   :  { %1884 = vmatprep.subr.bf16.mxu1 %v7311_v62  ;;  %v1046_v23 = vld [vmem:[#allocation3 + $0xe0] sm:$0xff]  ;;  %v7418_v62 = vcombine.low %v1120_v46, %v1128_v47  ;;  %v7403_v63 = vcombine.high %v1104_v54, %v1112_v55  ;;  %v7402_v6 = vcombine.low %v1104_v54, %v1112_v55  ;;  %v1124_v14 = vld [vmem:[#allocation3 + $0x350] sm:$0xff]  ;;  %v7386_v15 = vcombine.low %v1088_v1, %v1096_v2 }
 0x219   :  { %v7335_v28 = vcombine.high %v1038_v22, %v1046_v23  ;;  %v1022_v31 = vld [vmem:[#allocation3 + $0x20] sm:$0xff]  ;;  %v7334_v35 = vcombine.low %v1038_v22, %v1046_v23  ;;  %v1108_v22 = vld [vmem:[#allocation3 + $0x2d0] sm:$0xff] }
 0x21a   :  { %2041 = vmatpush1.bf16.msra.mxu0 %v7382_v10  ;;  %v1030_v32 = vld [vmem:[#allocation3 + $0x60] sm:$0xff]  ;;  %v1080_v10 = vld [vmem:[#allocation3 + $0x1f0] sm:$0xff] }
 0x21b   :  { %1885 = vmatpush1.bf16.msra.mxu1 %v7310_v4  ;;  %2042 = vmatprep.subr.bf16.mxu0 %v7367_v12  ;;  %v7319_v39 = vcombine.high %v1022_v31, %v1030_v32  ;;  %v7318_v45 = vcombine.low %v1022_v31, %v1030_v32  ;;  %v1132_v4 = vld [vmem:[#allocation3 + $0x390] sm:$0xff]  ;;  %v7370_v23 = vcombine.low %v1072_v9, %v1080_v10 }
 0x21c   :  { %1911 = vmatprep.subr.bf16.mxu1 %v7425_v7  ;;  %v7387_v7 = vcombine.high %v1088_v1, %v1096_v2  ;;  %v7427_v12 = vcombine.high %v1132_v4, %v1140_v5  ;;  %v7426_v17 = vcombine.low %v1132_v4, %v1140_v5  ;;  %v1092_v30 = vld [vmem:[#allocation3 + $0x250] sm:$0xff]  ;;  %v1117_v5 = vld [vmem:[#allocation3 + $0x318] sm:$0xff] }
 0x21d   :  { %v1068_v34 = vld [vmem:[#allocation3 + $0x190] sm:$0xff]  ;;  %v7379_v38 = vcombine.high %v1084_v26, %v1092_v30  ;;  %v7378_v43 = vcombine.low %v1084_v26, %v1092_v30 }
 0x21e   :  { %1903 = vmatmul.mubr.bf16.vlgmr.msra.gmra.mxu1 %v9879_v11  ;;  %2043 = vmatpush1.bf16.msra.mxu0 %v7366_v19  ;;  %v1056_v19 = vld [vmem:[#allocation3 + $0x130] sm:$0xff] }
 0x21f   :  { %1912 = vmatpush1.bf16.msra.mxu1 %v7424_v13  ;;  %1943 = vmatprep.mubr.bf16.mxu1 %v9532_v56  ;;  %v1116_v13 = vld [vmem:[#allocation3 + $0x310] sm:$0xff] }
 0x220   :  { %1913 = vmatprep.subr.bf16.mxu1 %v7409_v16  ;;  %2044 = vmatprep.subr.bf16.mxu0 %v7351_v20  ;;  %v7371_v16 = vcombine.high %v1072_v9, %v1080_v10  ;;  %v1064_v20 = vld [vmem:[#allocation3 + $0x170] sm:$0xff]  ;;  %v7410_v25 = vcombine.low %v1116_v13, %v1124_v14 }
 0x221   :  { %v7354_v31 = vcombine.low %v1056_v19, %v1064_v20  ;;  %v8298_v47 = vld [vmem:[#allocation4 + $0x74] ss:$8 sps:$4 sm:$0xff]   ;;  %v8302_v1 = vld [vmem:[#allocation4 + $0x50] ss:$8 sps:$4 sm:$0xff]  }
 0x222   :  { %2045 = vmatpush1.bf16.msra.mxu0 %v7350_v27  ;;  %v1040_v27 = vld [vmem:[#allocation3 + $0xb0] sm:$0xff] }
 0x223   :  { %1914 = vmatpush1.bf16.msra.mxu1 %v7408_v21  ;;  %2046 = vmatprep.subr.bf16.mxu0 %v7335_v28  ;;  %v7411_v21 = vcombine.high %v1116_v13, %v1124_v14  ;;  %v1048_v28 = vld [vmem:[#allocation3 + $0xf0] sm:$0xff]  ;;  %v1109_v13 = vld [vmem:[#allocation3 + $0x2d8] sm:$0xff] }
 0x224   :  { %1915 = vmatprep.subr.bf16.mxu1 %v7393_v24  ;;  %v7355_v24 = vcombine.high %v1056_v19, %v1064_v20  ;;  %v7339_v32 = vcombine.high %v1040_v27, %v1048_v28  ;;  %v1044_v51 = vld [vmem:[#allocation3 + $0xd0] sm:$0xff]  ;;  %v1093_v19 = vld [vmem:[#allocation3 + $0x258] sm:$0xff] }
 0x225   :  { %v1020_v54 = vld [vmem:[#allocation3 + $0x10] sm:$0xff]  ;;  %v7331_v60 = vcombine.high %v1036_v50, %v1044_v51 }
 0x226   :  { %2047 = vmatpush1.bf16.msra.mxu0 %v7334_v35  ;;  %v1024_v35 = vld [vmem:[#allocation3 + $0x30] sm:$0xff] }
 0x227   :  { %1916 = vmatpush1.bf16.msra.mxu1 %v7392_v29  ;;  %2048 = vmatprep.subr.bf16.mxu0 %v7319_v39  ;;  %v7395_v29 = vcombine.high %v1100_v18, %v1108_v22  ;;  %v1076_v39 = vld [vmem:[#allocation3 + $0x1d0] sm:$0xff]  ;;  %v7323_v42 = vcombine.high %v1024_v35, %v1032_v36 }
 0x228   :  { %1917 = vmatprep.subr.bf16.mxu1 %v7377_v33  ;;  %v7394_v33 = vcombine.low %v1100_v18, %v1108_v22  ;;  %v7363_v46 = vcombine.high %v1068_v34, %v1076_v39  ;;  %v1028_v55 = vld [vmem:[#allocation3 + $0x50] sm:$0xff]  ;;  %v1085_v18 = vld [vmem:[#allocation3 + $0x218] sm:$0xff] }
 0x229   :  { %v8304_v61 = vld [vmem:[#allocation4 + $0x54] ss:$8 sps:$4 sm:$0xff]   ;;  %v7315_v2 = vcombine.high %v1020_v54, %v1028_v55  ;;  %v7314_v4 = vcombine.low %v1020_v54, %v1028_v55  ;;  %v8308_v14 = vld [vmem:[#allocation4 + $0x30] ss:$8 sps:$4 sm:$0xff]   ;;  %v7381_v26 = vcombine.high %v1085_v18, %v1093_v19  ;;  %v1119_v55 = vld [vmem:[#allocation3 + $0x328] sm:$0xff] }
 0x22a   :  { %2049 = vmatpush1.bf16.msra.mxu0 %v7318_v45  ;;  %v1060_v45 = vld [vmem:[#allocation3 + $0x150] sm:$0xff] }
 0x22b   :  { %1918 = vmatpush1.bf16.msra.mxu1 %v7376_v40  ;;  %2116 = vmatprep.subr.bf16.mxu0 %v7435_v48  ;;  %v7338_v40 = vcombine.low %v1040_v27, %v1048_v28  ;;  %v7322_v48 = vcombine.low %v1024_v35, %v1032_v36  ;;  %v8310_v9 = vld [vmem:[#allocation4 + $0x34] ss:$8 sps:$4 sm:$0xff]   ;;  %v8314_v27 = vld [vmem:[#allocation4 + $0x10] ss:$8 sps:$4 sm:$0xff]   ;;  %v8319_v28 = vld [vmem:[#allocation4 + $0x4] ss:$8 sps:$4 sm:$0xff]  }
 0x22c   :  { %1919 = vmatprep.subr.bf16.mxu1 %v7361_v44  ;;  %v1052_v44 = vld [vmem:[#allocation3 + $0x110] sm:$0xff] }
 0x22d   :  { %2067 = vmatmul.mubr.bf16.vlgmr.msra.gmra.mxu0 %v9879_v11  ;;  %v8316_v22 = vld [vmem:[#allocation4 + $0x14] ss:$8 sps:$4 sm:$0xff]  }
 0x22e   :  { %2117 = vmatpush1.bf16.msra.mxu0 %v7434_v52  ;;  %2148 = vmatprep.mubr.bf16.mxu0 %v9532_v56  ;;  %v7347_v52 = vcombine.high %v1052_v44, %v1060_v45 }
 0x22f   :  { %1920 = vmatpush1.bf16.msra.mxu1 %v7360_v49  ;;  %2118 = vmatprep.subr.bf16.mxu0 %v7419_v53  ;;  %v7362_v49 = vcombine.low %v1068_v34, %v1076_v39  ;;  %v8301_v53 = vld [vmem:[#allocation4 + $0x64] ss:$8 sps:$4 sm:$0xff]   ;;  %v8322_v34 = vld [vmem:[#allocation4 + $0xf4] ss:$8 sps:$4 sm:$0xff]  }
 0x230   :  { %1921 = vmatprep.subr.bf16.mxu1 %v7345_v37  ;;  %v8296_v37 = vld [vmem:[#allocation4 + $0x70] ss:$8 sps:$4 sm:$0xff]  }
 0x231   :  { %v1045_v39 = vld [vmem:[#allocation3 + $0xd8] sm:$0xff] }
 0x232   :  { %2119 = vmatpush1.bf16.msra.mxu0 %v7418_v62  ;;  %v7330_v62 = vcombine.low %v1036_v50, %v1044_v51  ;;  %v1135_v51 = vld [vmem:[#allocation3 + $0x3a8] sm:$0xff] }
 0x233   :  { %1922 = vmatpush1.bf16.msra.mxu1 %v7344_v41  ;;  %2120 = vmatprep.subr.bf16.mxu0 %v7403_v63  ;;  %v7346_v41 = vcombine.low %v1052_v44, %v1060_v45  ;;  %v1133_v63 = vld [vmem:[#allocation3 + $0x398] sm:$0xff] }
 0x234   :  { %1923 = vmatprep.subr.bf16.mxu1 %v7329_v58  ;;  %v8299_v58 = vld [vmem:[#allocation4 + $0x60] ss:$8 sps:$4 sm:$0xff]   ;;  %v1021_v45 = vld [vmem:[#allocation3 + $0x18] sm:$0xff] }
 0x236   :  { %2121 = vmatpush1.bf16.msra.mxu0 %v7402_v6  ;;  %v1125_v6 = vld [vmem:[#allocation3 + $0x358] sm:$0xff] }
 0x237   :  { %1924 = vmatpush1.bf16.msra.mxu1 %v7328_v0  ;;  %2122 = vmatprep.subr.bf16.mxu0 %v7387_v7  ;;  %v1141_v0 = vld [vmem:[#allocation3 + $0x3d8] sm:$0xff]  ;;  %v8305_v7 = vld [vmem:[#allocation4 + $0x40] ss:$8 sps:$4 sm:$0xff]  }
 0x238   :  { %1925 = vmatprep.subr.bf16.mxu1 %v7313_v3  ;;  %v8307_v3 = vld [vmem:[#allocation4 + $0x44] ss:$8 sps:$4 sm:$0xff]   ;;  %v7428_v10 = vcombine.low %v1133_v63, %v1141_v0 }
 0x23a   :  { %2123 = vmatpush1.bf16.msra.mxu0 %v7386_v15  ;;  %v7413_v15 = vcombine.high %v1117_v5, %v1125_v6 }
 0x23b   :  { %1926 = vmatpush1.bf16.msra.mxu1 %v7312_v8  ;;  %2124 = vmatprep.subr.bf16.mxu0 %v7371_v16  ;;  %v7429_v8 = vcombine.high %v1133_v63, %v1141_v0  ;;  %v8313_v16 = vld [vmem:[#allocation4 + $0x24] ss:$8 sps:$4 sm:$0xff]  }
 0x23c   :  { %1952 = vmatprep.subr.bf16.mxu1 %v7427_v12  ;;  %v1101_v12 = vld [vmem:[#allocation3 + $0x298] sm:$0xff]  ;;  %v1103_v63 = vld [vmem:[#allocation3 + $0x2a8] sm:$0xff] }
 0x23d   :  { %v7397_v20 = vcombine.high %v1101_v12, %v1109_v13  ;;  %v1111_v0 = vld [vmem:[#allocation3 + $0x2e8] sm:$0xff] }
 0x23e   :  { %1944 = vmatmul.mubr.bf16.vlgmr.msra.gmra.mxu1 %v9879_v11  ;;  %2125 = vmatpush1.bf16.msra.mxu0 %v7370_v23  ;;  %v7396_v23 = vcombine.low %v1101_v12, %v1109_v13  ;;  %v1071_v12 = vld [vmem:[#allocation3 + $0x1a8] sm:$0xff] }
 0x23f   :  { %1953 = vmatpush1.bf16.msra.mxu1 %v7426_v17  ;;  %1984 = vmatprep.mubr.bf16.mxu1 %v9532_v56  ;;  %v7412_v17 = vcombine.low %v1117_v5, %v1125_v6  ;;  %v1087_v5 = vld [vmem:[#allocation3 + $0x228] sm:$0xff] }
 0x240   :  { %1954 = vmatprep.subr.bf16.mxu1 %v7411_v21  ;;  %2126 = vmatprep.subr.bf16.mxu0 %v7355_v24  ;;  %v8311_v21 = vld [vmem:[#allocation4 + $0x20] ss:$8 sps:$4 sm:$0xff]   ;;  %v1069_v24 = vld [vmem:[#allocation3 + $0x198] sm:$0xff] }
 0x241   :  { %v1095_v6 = vld [vmem:[#allocation3 + $0x268] sm:$0xff] }
 0x242   :  { %2127 = vmatpush1.bf16.msra.mxu0 %v7354_v31  ;;  %v1053_v31 = vld [vmem:[#allocation3 + $0x118] sm:$0xff]  ;;  %v1079_v13 = vld [vmem:[#allocation3 + $0x1e8] sm:$0xff] }
 0x243   :  { %1955 = vmatpush1.bf16.msra.mxu1 %v7410_v25  ;;  %2128 = vmatprep.subr.bf16.mxu0 %v7339_v32  ;;  %v1077_v25 = vld [vmem:[#allocation3 + $0x1d8] sm:$0xff] }
 0x244   :  { %1956 = vmatprep.subr.bf16.mxu1 %v7395_v29  ;;  %v7380_v29 = vcombine.low %v1085_v18, %v1093_v19  ;;  %v7365_v30 = vcombine.high %v1069_v24, %v1077_v25  ;;  %v1061_v32 = vld [vmem:[#allocation3 + $0x158] sm:$0xff]  ;;  %v7364_v35 = vcombine.low %v1069_v24, %v1077_v25  ;;  %v7369_v18 = vcombine.high %v1071_v12, %v1079_v13  ;;  %v1055_v19 = vld [vmem:[#allocation3 + $0x128] sm:$0xff] }
 0x245   :  { %v7349_v36 = vcombine.high %v1053_v31, %v1061_v32  ;;  %v9533_v25 = vmov 269488144  }
 0x246   :  { %2129 = vmatpush1.bf16.msra.mxu0 %v7338_v40  ;;  %v8320_v40 = vld [vmem:[#allocation4 + $0xf0] ss:$8 sps:$4 sm:$0xff]  }
 0x247   :  { %1957 = vmatpush1.bf16.msra.mxu1 %v7394_v33  ;;  %2130 = vmatprep.subr.bf16.mxu0 %v7323_v42  ;;  %v8317_v33 = vld [vmem:[#allocation4] ss:$8 sps:$4 sm:$0xff]   ;;  %v8328_v42 = vld [vmem:[#allocation4 + $0xe4] ss:$8 sps:$4 sm:$0xff]  }
 0x248   :  { %1958 = vmatprep.subr.bf16.mxu1 %v7379_v38  ;;  %v1037_v38 = vld [vmem:[#allocation3 + $0x98] sm:$0xff] }
 0x249   :  { %v7333_v44 = vcombine.high %v1037_v38, %v1045_v39 }
 0x24a   :  { %2131 = vmatpush1.bf16.msra.mxu0 %v7322_v48  ;;  %v8334_v48 = vld [vmem:[#allocation4 + $0xd4] ss:$8 sps:$4 sm:$0xff]  }
 0x24b   :  { %1959 = vmatpush1.bf16.msra.mxu1 %v7378_v43  ;;  %3778 = vmatprep.subr.bf16.mxu0 %v8298_v47  ;;  %v7348_v43 = vcombine.low %v1053_v31, %v1061_v32  ;;  %v8326_v47 = vld [vmem:[#allocation4 + $0xe0] ss:$8 sps:$4 sm:$0xff]  }
 0x24c   :  { %1960 = vmatprep.subr.bf16.mxu1 %v7363_v46  ;;  %v1029_v46 = vld [vmem:[#allocation3 + $0x58] sm:$0xff]  ;;  %v1023_v32 = vld [vmem:[#allocation3 + $0x28] sm:$0xff] }
 0x24d   :  { %2149 = vmatmul.mubr.bf16.vlgmr.msra.gmra.mxu0 %v9879_v11  ;;  %v7317_v50 = vcombine.high %v1021_v45, %v1029_v46 }
 0x24e   :  { %3779 = vmatpush1.bf16.msra.mxu0 %v8296_v37  ;;  %v1143_v37 = vld [vmem:[#allocation3 + $0x3e8] sm:$0xff] }
 0x24f   :  { %1961 = vmatpush1.bf16.msra.mxu1 %v7362_v49  ;;  %3780 = vmatprep.subr.bf16.mxu0 %v8301_v53  ;;  %v7332_v49 = vcombine.low %v1037_v38, %v1045_v39  ;;  %v8340_v53 = vld [vmem:[#allocation4 + $0xc4] ss:$8 sps:$4 sm:$0xff]   ;;  %v7433_v54 = vcombine.high %v1135_v51, %v1143_v37  ;;  %v1137_v38 = vld [vmem:[#allocation3 + $0x3b8] sm:$0xff] }
 0x250   :  { %1962 = vmatprep.subr.bf16.mxu1 %v7347_v52  ;;  %v8332_v52 = vld [vmem:[#allocation4 + $0xd0] ss:$8 sps:$4 sm:$0xff]  }
 0x251   :  { %v1145_v39 = vld [vmem:[#allocation3 + $0x3f8] sm:$0xff] }
 0x252   :  { %3781 = vmatpush1.bf16.msra.mxu0 %v8299_v58  ;;  %v1127_v58 = vld [vmem:[#allocation3 + $0x368] sm:$0xff] }
 0x253   :  { %1963 = vmatpush1.bf16.msra.mxu1 %v7346_v41  ;;  %3782 = vmatprep.subr.bf16.mxu0 %v8304_v61  ;;  %v7316_v41 = vcombine.low %v1021_v45, %v1029_v46  ;;  %v8346_v61 = vld [vmem:[#allocation4 + $0xb4] ss:$8 sps:$4 sm:$0xff]  }
 0x254   :  { %1964 = vmatprep.subr.bf16.mxu1 %v7331_v60  ;;  %v8338_v60 = vld [vmem:[#allocation4 + $0xc0] ss:$8 sps:$4 sm:$0xff]   ;;  %v1121_v46 = vld [vmem:[#allocation3 + $0x338] sm:$0xff] }
 0x256   :  { %3783 = vmatpush1.bf16.msra.mxu0 %v8302_v1  ;;  %v8344_v1 = vld [vmem:[#allocation4 + $0xb0] ss:$8 sps:$4 sm:$0xff]  }
 0x257   :  { %1965 = vmatpush1.bf16.msra.mxu1 %v7330_v62  ;;  %3784 = vmatprep.subr.bf16.mxu0 %v8307_v3  ;;  %v7432_v62 = vcombine.low %v1135_v51, %v1143_v37  ;;  %v8352_v3 = vld [vmem:[#allocation4 + $0xa4] ss:$8 sps:$4 sm:$0xff]   ;;  %v7436_v37 = vcombine.low %v1137_v38, %v1145_v39 }
 0x258   :  { %1966 = vmatprep.subr.bf16.mxu1 %v7315_v2  ;;  %v7417_v2 = vcombine.high %v1119_v55, %v1127_v58 }
 0x25a   :  { %3785 = vmatpush1.bf16.msra.mxu0 %v8305_v7  ;;  %v7401_v7 = vcombine.high %v1103_v63, %v1111_v0 }
 0x25b   :  { %1967 = vmatpush1.bf16.msra.mxu1 %v7314_v4  ;;  %3786 = vmatprep.subr.bf16.mxu0 %v8310_v9  ;;  %v7416_v4 = vcombine.low %v1119_v55, %v1127_v58  ;;  %v8358_v9 = vld [vmem:[#allocation4 + $0x94] ss:$8 sps:$4 sm:$0xff]  }
 0x25c   :  { %1993 = vmatprep.subr.bf16.mxu1 %v7429_v8  ;;  %v8350_v8 = vld [vmem:[#allocation4 + $0xa0] ss:$8 sps:$4 sm:$0xff]  }
 0x25e   :  { %1985 = vmatmul.mubr.bf16.vlgmr.msra.gmra.mxu1 %v9879_v11  ;;  %3787 = vmatpush1.bf16.msra.mxu0 %v8308_v14  ;;  %v7385_v14 = vcombine.high %v1087_v5, %v1095_v6 }
 0x25f   :  { %1994 = vmatpush1.bf16.msra.mxu1 %v7428_v10  ;;  %2025 = vmatprep.mubr.bf16.mxu1 %v9532_v56  ;;  %v7400_v10 = vcombine.low %v1103_v63, %v1111_v0  ;;  %v1089_v63 = vld [vmem:[#allocation3 + $0x238] sm:$0xff] }
 0x260   :  { %1995 = vmatprep.subr.bf16.mxu1 %v7413_v15  ;;  %3788 = vmatprep.subr.bf16.mxu0 %v8313_v16  ;;  %v8356_v15 = vld [vmem:[#allocation4 + $0x90] ss:$8 sps:$4 sm:$0xff]   ;;  %v8364_v16 = vld [vmem:[#allocation4 + $0x84] ss:$8 sps:$4 sm:$0xff]  }
 0x261   :  { %v1097_v0 = vld [vmem:[#allocation3 + $0x278] sm:$0xff] }
 0x262   :  { %3789 = vmatpush1.bf16.msra.mxu0 %v8311_v21  ;;  %v8362_v21 = vld [vmem:[#allocation4 + $0x80] ss:$8 sps:$4 sm:$0xff]  }
 0x263   :  { %1996 = vmatpush1.bf16.msra.mxu1 %v7412_v17  ;;  %3790 = vmatprep.subr.bf16.mxu0 %v8316_v22  ;;  %v7384_v17 = vcombine.low %v1087_v5, %v1095_v6  ;;  %v8373_v22 = vld [vmem:[#allocation4 + $0x274] ss:$8 sps:$4 sm:$0xff]  }
 0x264   :  { %1997 = vmatprep.subr.bf16.mxu1 %v7397_v20  ;;  %v1063_v20 = vld [vmem:[#allocation3 + $0x168] sm:$0xff] }
 0x265   :  { %v7353_v24 = vcombine.high %v1055_v19, %v1063_v20 }
 0x266   :  { %3791 = vmatpush1.bf16.msra.mxu0 %v8314_v27  ;;  %v1039_v27 = vld [vmem:[#allocation3 + $0xa8] sm:$0xff] }
 0x267   :  { %1998 = vmatpush1.bf16.msra.mxu1 %v7396_v23  ;;  %3792 = vmatprep.subr.bf16.mxu0 %v8319_v28  ;;  %v7368_v23 = vcombine.low %v1071_v12, %v1079_v13  ;;  %v1047_v28 = vld [vmem:[#allocation3 + $0xe8] sm:$0xff]  ;;  %v1081_v12 = vld [vmem:[#allocation3 + $0x1f8] sm:$0xff] }
 0x268   :  { %1999 = vmatprep.subr.bf16.mxu1 %v7381_v26  ;;  %v4159_v26 = vunpack.c.l.s4 %v9533_v25 }
 0x26a   :  { %3793 = vmatpush1.bf16.msra.mxu0 %v8317_v33  ;;  %v4160_v31 = vunpack.c.0.s8 %v4159_v26  ;;  %v1031_v33 = vld [vmem:[#allocation3 + $0x68] sm:$0xff] }
 0x26b   :  { %2000 = vmatpush1.bf16.msra.mxu1 %v7380_v29  ;;  %3794 = vmatprep.subr.bf16.mxu0 %v8322_v34  ;;  %v7352_v29 = vcombine.low %v1055_v19, %v1063_v20  ;;  %v7336_v34 = vcombine.low %v1039_v27, %v1047_v28 }
 0x26c   :  { %2001 = vmatprep.subr.bf16.mxu1 %v7365_v30  ;;  %v7337_v30 = vcombine.high %v1039_v27, %v1047_v28  ;;  %v1041_v27 = vld [vmem:[#allocation3 + $0xb8] sm:$0xff] }
 0x26d   :  { %v1049_v28 = vld [vmem:[#allocation3 + $0xf8] sm:$0xff] }
 0x26e   :  { %3795 = vmatpush2.bf16.msra.mxu0 %v8320_v40 }
 0x26f   :  { %2002 = vmatpush1.bf16.msra.mxu1 %v7364_v35  ;;  %3796 = vmatprep.subr.bf16.mxu0 %v8328_v42  ;;  %v7321_v35 = vcombine.high %v1023_v32, %v1031_v33 }
 0x270   :  { %2003 = vmatprep.subr.bf16.mxu1 %v7349_v36  ;;  %v9893_v36 = vsub.s32 %v4160_v31, %v9866_v57  ;;  %v1025_v31 = vld [vmem:[#allocation3 + $0x38] sm:$0xff] }
 0x272   :  { %3797 = vmatpush2.bf16.msra.mxu0 %v8326_v47  ;;  %v1129_v47 = vld [vmem:[#allocation3 + $0x378] sm:$0xff] }
 0x273   :  { %2004 = vmatpush1.bf16.msra.mxu1 %v7348_v43  ;;  %3798 = vmatprep.subr.bf16.mxu0 %v8334_v48  ;;  %v7320_v43 = vcombine.low %v1023_v32, %v1031_v33  ;;  %v9190_v48 = vld [vmem:[#allocation15] sm:$0xff]  ;;  %v1033_v32 = vld [vmem:[#allocation3 + $0x78] sm:$0xff]  ;;  %v7340_v33 = vcombine.low %v1041_v27, %v1049_v28 }
 0x274   :  { %2005 = vmatprep.subr.bf16.mxu1 %v7333_v44  ;;  %v7437_v44 = vcombine.high %v1137_v38, %v1145_v39  ;;  %v8325_v38 = vld [vmem:[#allocation4 + $0x174] ss:$8 sps:$4 sm:$0xff]   ;;  %v8323_v39 = vld [vmem:[#allocation4 + $0x170] ss:$8 sps:$4 sm:$0xff]  }
 0x276   :  { %3799 = vmatpush2.bf16.msra.mxu0 %v8332_v52  ;;  %v1105_v52 = vld [vmem:[#allocation3 + $0x2b8] sm:$0xff] }
 0x277   :  { %2006 = vmatpush1.bf16.msra.mxu1 %v7332_v49  ;;  %3800 = vmatprep.subr.bf16.mxu0 %v8340_v53  ;;  %v1113_v53 = vld [vmem:[#allocation3 + $0x2f8] sm:$0xff] }
 0x278   :  { %2007 = vmatprep.subr.bf16.mxu1 %v7317_v50  ;;  %v9191_v50 = vld [vmem:[#allocation15 + $0x8] sm:$0xf] }
 0x27a   :  { %3801 = vmatpush2.bf16.msra.mxu0 %v8338_v60 }
 0x27b   :  { %2008 = vmatpush1.bf16.msra.mxu1 %v7316_v41  ;;  %3802 = vmatprep.subr.bf16.mxu0 %v8346_v61  ;;  %v7421_v41 = vcombine.high %v1121_v46, %v1129_v47  ;;  %v7420_v61 = vcombine.low %v1121_v46, %v1129_v47  ;;  %v8341_v46 = vld [vmem:[#allocation4 + $0x140] ss:$8 sps:$4 sm:$0xff]   ;;  %v8349_v47 = vld [vmem:[#allocation4 + $0x134] ss:$8 sps:$4 sm:$0xff]  }
 0x27c   :  { %2075 = vmatprep.subr.bf16.mxu1 %v7433_v54 }
 0x27e   :  { %2026 = vmatmul.mubr.bf16.vlgmr.msra.gmra.mxu1 %v9879_v11  ;;  %3803 = vmatpush2.bf16.msra.mxu0 %v8344_v1 }
 0x27f   :  { %2076 = vmatpush1.bf16.msra.mxu1 %v7432_v62  ;;  %2107 = vmatprep.mubr.bf16.mxu1 %v9532_v56  ;;  %v7405_v62 = vcombine.high %v1105_v52, %v1113_v53 }
 0x280   :  { %2077 = vmatprep.subr.bf16.mxu1 %v7417_v2  ;;  %3804 = vmatprep.subr.bf16.mxu0 %v8352_v3 }
 0x282   :  { %3805 = vmatpush2.bf16.msra.mxu0 %v8350_v8  ;;  %v7404_v8 = vcombine.low %v1105_v52, %v1113_v53  ;;  %v8361_v52 = vld [vmem:[#allocation4 + $0x114] ss:$8 sps:$4 sm:$0xff]   ;;  %v8367_v53 = vld [vmem:[#allocation4 + $0x104] ss:$8 sps:$4 sm:$0xff]  }
 0x283   :  { %2078 = vmatpush1.bf16.msra.mxu1 %v7416_v4  ;;  %3806 = vmatprep.subr.bf16.mxu0 %v8358_v9 }
 0x284   :  { %2079 = vmatprep.subr.bf16.mxu1 %v7401_v7 }
 0x286   :  { %3807 = vmatpush2.bf16.msra.mxu0 %v8356_v15 }
 0x287   :  { %2080 = vmatpush1.bf16.msra.mxu1 %v7400_v10  ;;  %3808 = vmatprep.subr.bf16.mxu0 %v8364_v16  ;;  %v1073_v10 = vld [vmem:[#allocation3 + $0x1b8] sm:$0xff] }
 0x288   :  { %2081 = vmatprep.subr.bf16.mxu1 %v7385_v14  ;;  %v7373_v19 = vcombine.high %v1073_v10, %v1081_v12 }
 0x28a   :  { %3809 = vmatpush2.bf16.msra.mxu0 %v8362_v21  ;;  %v1057_v21 = vld [vmem:[#allocation3 + $0x138] sm:$0xff] }
 0x28b   :  { %2082 = vmatpush1.bf16.msra.mxu1 %v7384_v17  ;;  %3860 = vmatprep.subr.bf16.mxu0 %v8373_v22  ;;  %v7388_v17 = vcombine.low %v1089_v63, %v1097_v0  ;;  %v1065_v22 = vld [vmem:[#allocation3 + $0x178] sm:$0xff] }
 0x28c   :  { %2083 = vmatprep.subr.bf16.mxu1 %v7369_v18  ;;  %v7357_v26 = vcombine.high %v1057_v21, %v1065_v22 }
 0x28f   :  { %2084 = vmatpush1.bf16.msra.mxu1 %v7368_v23 }
 0x290   :  { %2085 = vmatprep.subr.bf16.mxu1 %v7353_v24  ;;  %v7372_v24 = vcombine.low %v1073_v10, %v1081_v12  ;;  %v8371_v12 = vld [vmem:[#allocation4 + $0x270] ss:$8 sps:$4 sm:$0xff]  }
 0x293   :  { %2086 = vmatpush1.bf16.msra.mxu1 %v7352_v29  ;;  %v7356_v29 = vcombine.low %v1057_v21, %v1065_v22  ;;  %v8392_v21 = vld [vmem:[#allocation4 + $0x1b0] ss:$8 sps:$4 sm:$0xff]   ;;  %v8400_v22 = vld [vmem:[#allocation4 + $0x1a4] ss:$8 sps:$4 sm:$0xff]  }
 0x294   :  { %2087 = vmatprep.subr.bf16.mxu1 %v7337_v30  ;;  %v7341_v30 = vcombine.high %v1041_v27, %v1049_v28  ;;  %v8389_v28 = vld [vmem:[#allocation4 + $0x240] ss:$8 sps:$4 sm:$0xff]  }
 0x297   :  { %2088 = vmatpush1.bf16.msra.mxu1 %v7336_v34  ;;  %v7325_v34 = vcombine.high %v1025_v31, %v1033_v32 }
 0x298   :  { %2089 = vmatprep.subr.bf16.mxu1 %v7321_v35  ;;  %v7324_v35 = vcombine.low %v1025_v31, %v1033_v32  ;;  %v8412_v31 = vld [vmem:[#allocation4 + $0x184] ss:$8 sps:$4 sm:$0xff]  }
 0x299   :  { %v4154_v40 = vpop.xlane.xlu0 %4153 }
 0x29a   :  { %v4156_v42 = vmul.f32 0.0013020834, %v4154_v40  ;;  %v8331_v40 = vld [vmem:[#allocation4 + $0x164] ss:$8 sps:$4 sm:$0xff]  }
 0x29b   :  { %2090 = vmatpush1.bf16.msra.mxu1 %v7320_v43  ;;  %v8337_v43 = vld [vmem:[#allocation4 + $0x154] ss:$8 sps:$4 sm:$0xff]  }
 0x29c   :  { %v4164_v45 = vrot.slane %v4156_v42, %v9893_v36  ;;  %2157 = vmatprep.subr.bf16.mxu1 %v7437_v44  ;;  %v8329_v42 = vld [vmem:[#allocation4 + $0x160] ss:$8 sps:$4 sm:$0xff]   ;;  %v8335_v44 = vld [vmem:[#allocation4 + $0x150] ss:$8 sps:$4 sm:$0xff]  }
 0x29e   :  { %v9896_v49 = vsub.f32 %v9190_v48, %v4164_v45  ;;  %v9898_v51 = vsub.f32 %v9191_v50, %v4164_v45  ;;  %2108 = vmatmul.mubr.bf16.vlgmr.msra.gmra.mxu1 %v9879_v11  ;;  %v8343_v45 = vld [vmem:[#allocation4 + $0x144] ss:$8 sps:$4 sm:$0xff]   ;;  %v8347_v48 = vld [vmem:[#allocation4 + $0x130] ss:$8 sps:$4 sm:$0xff]  }
 0x29f   :  { %2158 = vmatpush1.bf16.msra.mxu1 %v7436_v37  ;;  %2189 = vmatprep.mubr.bf16.mxu1 %v9532_v56  ;;  %v7389_v56 = vcombine.high %v1089_v63, %v1097_v0  ;;  %v8355_v50 = vld [vmem:[#allocation4 + $0x124] ss:$8 sps:$4 sm:$0xff]   ;;  %v8353_v37 = vld [vmem:[#allocation4 + $0x120] ss:$8 sps:$4 sm:$0xff]  }
 0x2a0   :  { %v4168_v54 = vmul.f32 %v9896_v49, %v9896_v49  ;;  %v4169_v55 = vmul.f32 %v9898_v51, %v9898_v51  ;;  %2159 = vmatprep.subr.bf16.mxu1 %v7421_v41  ;;  %v9916_v41 = vld [vmem:[#allocation12] sm:$0xff] }
 0x2a2   :  { %v4172_v58 = vcombine.high %v4168_v54, %v4168_v54  ;;  %v4179_v60 = vrot.slane %v4168_v54, %v9869_v59  ;;  %v4195_v3 = vrot.slane %v4169_v55, %v9869_v59  ;;  %v8365_v54 = vld [vmem:[#allocation4 + $0x100] ss:$8 sps:$4 sm:$0xff]   ;;  %v8370_v55 = vld [vmem:[#allocation4 + $0x1f4] ss:$8 sps:$4 sm:$0xff]  }
 0x2a3   :  { %2160 = vmatpush1.bf16.msra.mxu1 %v7420_v61  ;;  %v8368_v61 = vld [vmem:[#allocation4 + $0x1f0] ss:$8 sps:$4 sm:$0xff]  }
 0x2a4   :  { %v4187_v1 = vcombine.high %v4179_v60, %v4179_v60  ;;  %v4186_v2 = vrot.slane %v4172_v58, %v9869_v59  ;;  %v4203_v4 = vsel %vm4141_vm2, %v4179_v60, 0.0  ;;  %2161 = vmatprep.subr.bf16.mxu1 %v7405_v62  ;;  %v4196_v13 = vcombine.high %v4195_v3, %v4195_v3  ;;  %v8376_v62 = vld [vmem:[#allocation4 + $0x1e4] ss:$8 sps:$4 sm:$0xff]  }
 0x2a5   :  { %v4210_v16 = vsel %vm4141_vm2, %v4195_v3, 0.0  ;;  %v9919_v58 = vsub.s32 0, %v9866_v57  ;;  %v9922_v60 = vsub.s32 1, %v9866_v57  ;;  %v8382_v3 = vld [vmem:[#allocation4 + $0x1d4] ss:$8 sps:$4 sm:$0xff]  }
 0x2a6   :  { %v4188_v5 = vcombine.high %v4186_v2, %v4186_v2  ;;  %v4204_v6 = vsel %vm4141_vm2, %v4187_v1, 0.0  ;;  %v4206_v7 = vsel %vm4141_vm2, %v4186_v2, 0.0  ;;  %v4212_v20 = vsel %vm4141_vm2, %v4196_v13, 0.0  ;;  %v8374_v2 = vld [vmem:[#allocation4 + $0x1e0] ss:$8 sps:$4 sm:$0xff]  }
 0x2a7   :  { %v4205_v9 = vadd.f32 %v4204_v6, %v4203_v4  ;;  %2162 = vmatpush1.bf16.msra.mxu1 %v7404_v8  ;;  %v1153_v63 = vrot.slane %v9916_v41, %v9919_v58  ;;  %v1157_v0 = vrot.slane %v9916_v41, %v9922_v60 }
 0x2a8   :  { %v4208_v14 = vsel %vm4141_vm2, %v4188_v5, 0.0  ;;  %2163 = vmatprep.subr.bf16.mxu1 %v7389_v56  ;;  %v8388_v56 = vld [vmem:[#allocation4 + $0x1c4] ss:$8 sps:$4 sm:$0xff]  }
 0x2a9   :  { %v4207_v15 = vadd.f32 %v4206_v7, %v4205_v9  ;;  %v8380_v9 = vld [vmem:[#allocation4 + $0x1d0] ss:$8 sps:$4 sm:$0xff]  }
 0x2ab   :  { %v4209_v18 = vadd.f32 %v4208_v14, %v4207_v15  ;;  %2164 = vmatpush1.bf16.msra.mxu1 %v7388_v17  ;;  %v8379_v14 = vld [vmem:[#allocation4 + $0x264] ss:$8 sps:$4 sm:$0xff]   ;;  %v8386_v17 = vld [vmem:[#allocation4 + $0x1c0] ss:$8 sps:$4 sm:$0xff]  }
 0x2ac   :  { %2165 = vmatprep.subr.bf16.mxu1 %v7373_v19  ;;  %v8377_v19 = vld [vmem:[#allocation4 + $0x260] ss:$8 sps:$4 sm:$0xff]  }
 0x2ad   :  { %v4211_v23 = vadd.f32 %v4210_v16, %v4209_v18  ;;  %v8394_v18 = vld [vmem:[#allocation4 + $0x1b4] ss:$8 sps:$4 sm:$0xff]  }
 0x2af   :  { %v4213_v25 = vadd.f32 %v4212_v20, %v4211_v23  ;;  %2166 = vmatpush1.bf16.msra.mxu1 %v7372_v24  ;;  %v8385_v20 = vld [vmem:[#allocation4 + $0x254] ss:$8 sps:$4 sm:$0xff]   ;;  %v8383_v23 = vld [vmem:[#allocation4 + $0x250] ss:$8 sps:$4 sm:$0xff]   ;;  %v8391_v24 = vld [vmem:[#allocation4 + $0x244] ss:$8 sps:$4 sm:$0xff]  }
 0x2b0   :  { %2167 = vmatprep.subr.bf16.mxu1 %v7357_v26  ;;  %v8406_v26 = vld [vmem:[#allocation4 + $0x194] ss:$8 sps:$4 sm:$0xff]  }
 0x2b1   :  { %4214 = vadd.xlane.f32.xlu0 %v4213_v25  ;;  %v8398_v25 = vld [vmem:[#allocation4 + $0x1a0] ss:$8 sps:$4 sm:$0xff]  }
 0x2b3   :  { %2168 = vmatpush1.bf16.msra.mxu1 %v7356_v29  ;;  %v8397_v29 = vld [vmem:[#allocation4 + $0x234] ss:$8 sps:$4 sm:$0xff]  }
 0x2b4   :  { %2169 = vmatprep.subr.bf16.mxu1 %v7341_v30  ;;  %v8404_v30 = vld [vmem:[#allocation4 + $0x190] ss:$8 sps:$4 sm:$0xff]  }
 0x2b7   :  { %2170 = vmatpush1.bf16.msra.mxu1 %v7340_v33 }
 0x2b8   :  { %2171 = vmatprep.subr.bf16.mxu1 %v7325_v34  ;;  %v8395_v34 = vld [vmem:[#allocation4 + $0x230] ss:$8 sps:$4 sm:$0xff]  }
 0x2bb   :  { %2172 = vmatpush1.bf16.msra.mxu1 %v7324_v35  ;;  %v8403_v35 = vld [vmem:[#allocation4 + $0x224] ss:$8 sps:$4 sm:$0xff]  }
 0x2bc   :  { %3819 = vmatprep.subr.bf16.mxu1 %v8325_v38  ;;  %v8410_v38 = vld [vmem:[#allocation4 + $0x180] ss:$8 sps:$4 sm:$0xff]  }
 0x2be   :  { %2190 = vmatmul.mubr.bf16.vlgmr.msra.gmra.mxu1 %v9879_v11  ;;  %v8359_v11 = vld [vmem:[#allocation4 + $0x110] ss:$8 sps:$4 sm:$0xff]  }
 0x2bf   :  { %3820 = vmatpush1.bf16.msra.mxu1 %v8323_v39  ;;  %v8421_v39 = vld [vmem:[#allocation4 + $0x374] ss:$8 sps:$4 sm:$0xff]  }
 0x2c0   :  { %3821 = vmatprep.subr.bf16.mxu1 %v8331_v40 }
 0x2c3   :  { %3822 = vmatpush1.bf16.msra.mxu1 %v8329_v42  ;;  %v9933_v42 = vsub.s32 2, %v9866_v57 }
 0x2c4   :  { %3823 = vmatprep.subr.bf16.mxu1 %v8337_v43  ;;  %v8401_v43 = vld [vmem:[#allocation4 + $0x220] ss:$8 sps:$4 sm:$0xff]  }
 0x2c7   :  { %3824 = vmatpush1.bf16.msra.mxu1 %v8335_v44  ;;  %v9936_v44 = vsub.s32 3, %v9866_v57 }
 0x2c8   :  { %3825 = vmatprep.subr.bf16.mxu1 %v8343_v45  ;;  %v8409_v45 = vld [vmem:[#allocation4 + $0x214] ss:$8 sps:$4 sm:$0xff]  }
 0x2cb   :  { %3826 = vmatpush1.bf16.msra.mxu1 %v8341_v46  ;;  %v1161_v46 = vrot.slane %v9916_v41, %v9933_v42 }
 0x2cc   :  { %3827 = vmatprep.subr.bf16.mxu1 %v8349_v47  ;;  %v8407_v47 = vld [vmem:[#allocation4 + $0x210] ss:$8 sps:$4 sm:$0xff]  }
 0x2cf   :  { %3828 = vmatpush1.bf16.msra.mxu1 %v8347_v48  ;;  %v1165_v48 = vrot.slane %v9916_v41, %v9936_v44 }
 0x2d0   :  { %3829 = vmatprep.subr.bf16.mxu1 %v8355_v50 }
 0x2d3   :  { %3830 = vmatpush1.bf16.msra.mxu1 %v8353_v37  ;;  %v8415_v37 = vld [vmem:[#allocation4 + $0x204] ss:$8 sps:$4 sm:$0xff]  }
 0x2d4   :  { %3831 = vmatprep.subr.bf16.mxu1 %v8361_v52 }
 0x2d7   :  { %3832 = vmatpush1.bf16.msra.mxu1 %v8359_v11 }
 0x2d8   :  { %3833 = vmatprep.subr.bf16.mxu1 %v8367_v53 }
 0x2db   :  { %3834 = vmatpush1.bf16.msra.mxu1 %v8365_v54  ;;  %v8413_v54 = vld [vmem:[#allocation4 + $0x200] ss:$8 sps:$4 sm:$0xff]  }
 0x2dc   :  { %3835 = vmatprep.subr.bf16.mxu1 %v8370_v55 }
 0x2de   :  { %v1904_v1 = vpop.f32.mrf.mxu1 }
 0x2df   :  { %v1905_v4 = vadd.f32 %v1904_v1, %v1153_v63  ;;  %3836 = vmatpush2.bf16.msra.mxu1 %v8368_v61  ;;  %v8419_v1 = vld [vmem:[#allocation4 + $0x370] ss:$8 sps:$4 sm:$0xff]  }
 0x2e0   :  { %v1906_v5 = vpop.f32.mrf.mxu1  ;;  %3837 = vmatprep.subr.bf16.mxu1 %v8376_v62  ;;  %v8418_v62 = vld [vmem:[#allocation4 + $0x2f4] ss:$8 sps:$4 sm:$0xff]  }
 0x2e1   :  { %v1907_v6 = vadd.f32 %v1906_v5, %v1157_v0  ;;  %v2198_v7 = vmax.f32 %v1905_v4, 0.0  ;;  %v8416_v0 = vld [vmem:[#allocation4 + $0x2f0] ss:$8 sps:$4 sm:$0xff]   ;;  %v8427_v4 = vld [vmem:[#allocation4 + $0x364] ss:$8 sps:$4 sm:$0xff]  }
 0x2e2   :  { %v1908_v8 = vpop.f32.mrf.mxu1 }
 0x2e3   :  { %v2199_v10 = vmax.f32 %v1907_v6, 0.0  ;;  %3838 = vmatpush2.bf16.msra.mxu1 %v8374_v2  ;;  %v2214_v16 = vpack.c.bf16 %v2198_v7, %v2198_v7  ;;  %v8422_v7 = vld [vmem:[#allocation4 + $0x2e0] ss:$8 sps:$4 sm:$0xff]  }
 0x2e4   :  { %v1909_v13 = vpop.f32.mrf.mxu1  ;;  %3839 = vmatprep.subr.bf16.mxu1 %v8382_v3  ;;  %v8424_v3 = vld [vmem:[#allocation4 + $0x2e4] ss:$8 sps:$4 sm:$0xff]   ;;  %v8425_v8 = vld [vmem:[#allocation4 + $0x360] ss:$8 sps:$4 sm:$0xff]  }
 0x2e5   :  { %v2215_v15 = vpack.c.bf16 %v2199_v10, %v2199_v10  ;;  %v8428_v10 = vld [vmem:[#allocation4 + $0x2d0] ss:$8 sps:$4 sm:$0xff]   ;;  %v8436_v13 = vld [vmem:[#allocation4 + $0x2c4] ss:$8 sps:$4 sm:$0xff]  }
 0x2e7   :  { %3810 = vmatprep.mubr.bf16.mxu0 %v2215_v15  ;;  %3840 = vmatpush2.bf16.msra.mxu1 %v8380_v9  ;;  %v8430_v9 = vld [vmem:[#allocation4 + $0x2d4] ss:$8 sps:$4 sm:$0xff]  }
 0x2e8   :  { %3811 = vmatmul.mubr.bf16.vlgmr.msra.gmra.mxu0 %v2214_v16  ;;  %3841 = vmatprep.subr.bf16.mxu1 %v8388_v56  ;;  %v8433_v56 = vld [vmem:[#allocation4 + $0x354] ss:$8 sps:$4 sm:$0xff]   ;;  %v8434_v16 = vld [vmem:[#allocation4 + $0x2c0] ss:$8 sps:$4 sm:$0xff]  }
 0x2e9   :  { %3861 = vmatpush1.bf16.msra.mxu0 %v8371_v12  ;;  %v8431_v12 = vld [vmem:[#allocation4 + $0x350] ss:$8 sps:$4 sm:$0xff]  }
 0x2ea   :  { %3862 = vmatprep.subr.bf16.mxu0 %v8379_v14  ;;  %v8439_v14 = vld [vmem:[#allocation4 + $0x344] ss:$8 sps:$4 sm:$0xff]  }
 0x2eb   :  { %3842 = vmatpush2.bf16.msra.mxu1 %v8386_v17  ;;  %v8437_v17 = vld [vmem:[#allocation4 + $0x340] ss:$8 sps:$4 sm:$0xff]  }
 0x2ec   :  { %3843 = vmatprep.subr.bf16.mxu1 %v8394_v18  ;;  %v8442_v18 = vld [vmem:[#allocation4 + $0x2b4] ss:$8 sps:$4 sm:$0xff]  }
 0x2ed   :  { %3863 = vmatpush1.bf16.msra.mxu0 %v8377_v19  ;;  %v9928_v27 = vpop.f32.mrf.mxu0  ;;  %v8445_v19 = vld [vmem:[#allocation4 + $0x334] ss:$8 sps:$4 sm:$0xff]  }
 0x2ee   :  { %3864 = vmatprep.subr.bf16.mxu0 %v8385_v20 }
 0x2ef   :  { %3844 = vmatpush2.bf16.msra.mxu1 %v8392_v21  ;;  %v9930_v32 = vpop.f32.mrf.mxu0  ;;  %v8440_v21 = vld [vmem:[#allocation4 + $0x2b0] ss:$8 sps:$4 sm:$0xff]  }
 0x2f0   :  { %3845 = vmatprep.subr.bf16.mxu1 %v8400_v22 }
 0x2f1   :  { %3865 = vmatpush1.bf16.msra.mxu0 %v8383_v23  ;;  %v2072_v33 = vpop.f32.mrf.mxu0  ;;  %v8443_v23 = vld [vmem:[#allocation4 + $0x330] ss:$8 sps:$4 sm:$0xff]  }
 0x2f2   :  { %3866 = vmatprep.subr.bf16.mxu0 %v8391_v24  ;;  %v8448_v24 = vld [vmem:[#allocation4 + $0x2a4] ss:$8 sps:$4 sm:$0xff]   ;;  %v9952_v33 = vsub.s32 5, %v9866_v57 }
 0x2f3   :  { %3846 = vmatpush2.bf16.msra.mxu1 %v8398_v25  ;;  %v2073_v40 = vpop.f32.mrf.mxu0  ;;  %v8451_v25 = vld [vmem:[#allocation4 + $0x324] ss:$8 sps:$4 sm:$0xff]  }
 0x2f4   :  { %3847 = vmatprep.subr.bf16.mxu1 %v8406_v26  ;;  %v9946_v26 = vld [vmem:[#allocation12 + $0x8] sm:$0xff] }
 0x2f5   :  { %3867 = vmatpush1.bf16.msra.mxu0 %v8389_v28  ;;  %v8452_v40 = vld [vmem:[#allocation4 + $0x290] ss:$8 sps:$4 sm:$0xff]  }
 0x2f6   :  { %3868 = vmatprep.subr.bf16.mxu0 %v8397_v29  ;;  %v9949_v29 = vsub.s32 4, %v9866_v57 }
 0x2f7   :  { %3848 = vmatpush2.bf16.msra.mxu1 %v8404_v30  ;;  %v8446_v30 = vld [vmem:[#allocation4 + $0x2a0] ss:$8 sps:$4 sm:$0xff]  }
 0x2f8   :  { %3849 = vmatprep.subr.bf16.mxu1 %v8412_v31  ;;  %v8449_v31 = vld [vmem:[#allocation4 + $0x320] ss:$8 sps:$4 sm:$0xff]  }
 0x2f9   :  { %3869 = vmatpush1.bf16.msra.mxu0 %v8395_v34  ;;  %v8454_v34 = vld [vmem:[#allocation4 + $0x294] ss:$8 sps:$4 sm:$0xff]  }
 0x2fa   :  { %3870 = vmatprep.subr.bf16.mxu0 %v8403_v35  ;;  %v8457_v35 = vld [vmem:[#allocation4 + $0x314] ss:$8 sps:$4 sm:$0xff]  }
 0x2fb   :  { %3850 = vmatpush2.bf16.msra.mxu1 %v8410_v38  ;;  %v1169_v38 = vrot.slane %v9916_v41, %v9949_v29 }
 0x2fc   :  { %3901 = vmatprep.subr.bf16.mxu1 %v8421_v39  ;;  %v1189_v39 = vrot.slane %v9946_v26, %v9922_v60 }
 0x2fd   :  { %3871 = vmatpush1.bf16.msra.mxu0 %v8401_v43  ;;  %v8455_v43 = vld [vmem:[#allocation4 + $0x310] ss:$8 sps:$4 sm:$0xff]  }
 0x2fe   :  { %v1945_v50 = vpop.f32.mrf.mxu1  ;;  %3872 = vmatprep.subr.bf16.mxu0 %v8409_v45  ;;  %v1173_v45 = vrot.slane %v9916_v41, %v9952_v33 }
 0x2ff   :  { %v1946_v52 = vadd.f32 %v1945_v50, %v1161_v46 }
 0x300   :  { %v1947_v11 = vpop.f32.mrf.mxu1 }
 0x301   :  { %v1948_v53 = vadd.f32 %v1947_v11, %v1165_v48  ;;  %3873 = vmatpush1.bf16.msra.mxu0 %v8407_v47  ;;  %v2200_v55 = vmax.f32 %v1946_v52, 0.0  ;;  %v8460_v47 = vld [vmem:[#allocation4 + $0x284] ss:$8 sps:$4 sm:$0xff]  }
 0x302   :  { %v1949_v61 = vpop.f32.mrf.mxu1  ;;  %3874 = vmatprep.subr.bf16.mxu0 %v8415_v37  ;;  %v8463_v48 = vld [vmem:[#allocation4 + $0x304] ss:$8 sps:$4 sm:$0xff]   ;;  %v2071_v37 = vadd.f32 %v9930_v32, %v1189_v39  ;;  %v1180_v39 = vsub.s32 7, %v9866_v57 }
 0x303   :  { %v2201_v63 = vmax.f32 %v1948_v53, 0.0  ;;  %v2216_v6 = vpack.c.bf16 %v2200_v55, %v2200_v55  ;;  %v8458_v53 = vld [vmem:[#allocation4 + $0x280] ss:$8 sps:$4 sm:$0xff]  }
 0x304   :  { %v1950_v2 = vpop.f32.mrf.mxu1 }
 0x305   :  { %v2217_v5 = vpack.c.bf16 %v2201_v63, %v2201_v63  ;;  %3875 = vmatpush1.bf16.msra.mxu0 %v8413_v54  ;;  %v8461_v54 = vld [vmem:[#allocation4 + $0x300] ss:$8 sps:$4 sm:$0xff]   ;;  %v8469_v63 = vld [vmem:[#allocation4 + $0x474] ss:$8 sps:$4 sm:$0xff]   ;;  %v8467_v2 = vld [vmem:[#allocation4 + $0x470] ss:$8 sps:$4 sm:$0xff]  }
 0x306   :  { %3876 = vmatprep.subr.bf16.mxu0 %v8418_v62  ;;  %v8466_v62 = vld [vmem:[#allocation4 + $0x3f4] ss:$8 sps:$4 sm:$0xff]  }
 0x307   :  { %3851 = vmatprep.mubr.bf16.mxu1 %v2217_v5  ;;  %v8472_v5 = vld [vmem:[#allocation4 + $0x3e4] ss:$8 sps:$4 sm:$0xff]  }
 0x308   :  { %3852 = vmatmul.mubr.bf16.vlgmr.msra.gmra.mxu1 %v2216_v6  ;;  %v8475_v6 = vld [vmem:[#allocation4 + $0x464] ss:$8 sps:$4 sm:$0xff]  }
 0x309   :  { %3877 = vmatpush2.bf16.msra.mxu0 %v8416_v0  ;;  %3902 = vmatpush1.bf16.msra.mxu1 %v8419_v1  ;;  %v8464_v1 = vld [vmem:[#allocation4 + $0x3f0] ss:$8 sps:$4 sm:$0xff]  }
 0x30a   :  { %3878 = vmatprep.subr.bf16.mxu0 %v8424_v3  ;;  %3903 = vmatprep.subr.bf16.mxu1 %v8427_v4  ;;  %v2207_v3 = vmax.f32 %v2071_v37, 0.0 }
 0x30d   :  { %3879 = vmatpush2.bf16.msra.mxu0 %v8422_v7  ;;  %3904 = vmatpush1.bf16.msra.mxu1 %v8425_v8  ;;  %v9942_v15 = vpop.f32.mrf.mxu0  ;;  %v8470_v8 = vld [vmem:[#allocation4 + $0x3e0] ss:$8 sps:$4 sm:$0xff]  }
 0x30e   :  { %3880 = vmatprep.subr.bf16.mxu0 %v8430_v9  ;;  %3905 = vmatprep.subr.bf16.mxu1 %v8433_v56  ;;  %v2223_v9 = vpack.c.bf16 %v2207_v3, %v2207_v3  ;;  %v8473_v56 = vld [vmem:[#allocation4 + $0x460] ss:$8 sps:$4 sm:$0xff]   ;;  %v9971_v3 = vld [vmem:[#allocation18] sm:$0x3f] }
 0x30f   :  { %v9944_v20 = vpop.f32.mrf.mxu0 }
 0x311   :  { %3881 = vmatpush2.bf16.msra.mxu0 %v8428_v10  ;;  %3906 = vmatpush1.bf16.msra.mxu1 %v8431_v12  ;;  %v2154_v22 = vpop.f32.mrf.mxu0  ;;  %v8478_v10 = vld [vmem:[#allocation4 + $0x3d4] ss:$8 sps:$4 sm:$0xff]  }
 0x312   :  { %3882 = vmatprep.subr.bf16.mxu0 %v8436_v13  ;;  %3907 = vmatprep.subr.bf16.mxu1 %v8439_v14  ;;  %v8481_v12 = vld [vmem:[#allocation4 + $0x454] ss:$8 sps:$4 sm:$0xff]   ;;  %v8476_v13 = vld [vmem:[#allocation4 + $0x3d0] ss:$8 sps:$4 sm:$0xff]  }
 0x313   :  { %v2155_v28 = vpop.f32.mrf.mxu0  ;;  %v8479_v14 = vld [vmem:[#allocation4 + $0x450] ss:$8 sps:$4 sm:$0xff]   ;;  %v8493_v22 = vld [vmem:[#allocation4 + $0x434] ss:$8 sps:$4 sm:$0xff]  }
 0x314   :  { %v8499_v28 = vld [vmem:[#allocation4 + $0x424] ss:$8 sps:$4 sm:$0xff]  }
 0x315   :  { %3883 = vmatpush2.bf16.msra.mxu0 %v8434_v16  ;;  %3908 = vmatpush1.bf16.msra.mxu1 %v8437_v17  ;;  %v8484_v16 = vld [vmem:[#allocation4 + $0x3c4] ss:$8 sps:$4 sm:$0xff]  }
 0x316   :  { %3884 = vmatprep.subr.bf16.mxu0 %v8442_v18  ;;  %3909 = vmatprep.subr.bf16.mxu1 %v8445_v19  ;;  %v8487_v17 = vld [vmem:[#allocation4 + $0x444] ss:$8 sps:$4 sm:$0xff]   ;;  %v8482_v18 = vld [vmem:[#allocation4 + $0x3c0] ss:$8 sps:$4 sm:$0xff]  }
 0x317   :  { %v8485_v19 = vld [vmem:[#allocation4 + $0x440] ss:$8 sps:$4 sm:$0xff]  }
 0x319   :  { %3885 = vmatpush2.bf16.msra.mxu0 %v8440_v21  ;;  %3910 = vmatpush1.bf16.msra.mxu1 %v8443_v23  ;;  %v8490_v21 = vld [vmem:[#allocation4 + $0x3b4] ss:$8 sps:$4 sm:$0xff]   ;;  %v8488_v23 = vld [vmem:[#allocation4 + $0x3b0] ss:$8 sps:$4 sm:$0xff]  }
 0x31a   :  { %3886 = vmatprep.subr.bf16.mxu0 %v8448_v24  ;;  %3911 = vmatprep.subr.bf16.mxu1 %v8451_v25  ;;  %v8491_v24 = vld [vmem:[#allocation4 + $0x430] ss:$8 sps:$4 sm:$0xff]   ;;  %v8496_v25 = vld [vmem:[#allocation4 + $0x3a4] ss:$8 sps:$4 sm:$0xff]  }
 0x31d   :  { %3887 = vmatpush2.bf16.msra.mxu0 %v8446_v30  ;;  %3912 = vmatpush1.bf16.msra.mxu1 %v8449_v31  ;;  %v8494_v31 = vld [vmem:[#allocation4 + $0x3a0] ss:$8 sps:$4 sm:$0xff]  }
 0x31e   :  { %v1986_v46 = vpop.f32.mrf.mxu1  ;;  %3888 = vmatprep.subr.bf16.mxu0 %v8454_v34  ;;  %3913 = vmatprep.subr.bf16.mxu1 %v8457_v35  ;;  %v1176_v34 = vsub.s32 6, %v9866_v57  ;;  %v2486_v57 = vld [vmem:[#allocation13] sm:$0x3] }
 0x31f   :  { %v1987_v50 = vadd.f32 %v1986_v46, %v1169_v38  ;;  %v8497_v38 = vld [vmem:[#allocation4 + $0x420] ss:$8 sps:$4 sm:$0xff]  }
 0x320   :  { %v1988_v52 = vpop.f32.mrf.mxu1  ;;  %v1177_v46 = vrot.slane %v9916_v41, %v1176_v34 }
 0x321   :  { %v1989_v11 = vadd.f32 %v1988_v52, %v1173_v45  ;;  %3889 = vmatpush2.bf16.msra.mxu0 %v8452_v40  ;;  %3914 = vmatpush1.bf16.msra.mxu1 %v8455_v43  ;;  %v2202_v55 = vmax.f32 %v1987_v50, 0.0  ;;  %v8502_v43 = vld [vmem:[#allocation4 + $0x394] ss:$8 sps:$4 sm:$0xff]   ;;  %v1181_v50 = vrot.slane %v9916_v41, %v1180_v39  ;;  %v8508_v52 = vld [vmem:[#allocation4 + $0x384] ss:$8 sps:$4 sm:$0xff]  }
 0x322   :  { %v1990_v61 = vpop.f32.mrf.mxu1  ;;  %3890 = vmatprep.subr.bf16.mxu0 %v8460_v47  ;;  %3915 = vmatprep.subr.bf16.mxu1 %v8463_v48  ;;  %v8505_v45 = vld [vmem:[#allocation4 + $0x414] ss:$8 sps:$4 sm:$0xff]   ;;  %v8500_v47 = vld [vmem:[#allocation4 + $0x390] ss:$8 sps:$4 sm:$0xff]  }
 0x323   :  { %v2203_v0 = vmax.f32 %v1989_v11, 0.0  ;;  %v2218_v7 = vpack.c.bf16 %v2202_v55, %v2202_v55  ;;  %v8503_v48 = vld [vmem:[#allocation4 + $0x410] ss:$8 sps:$4 sm:$0xff]   ;;  %v8511_v11 = vld [vmem:[#allocation4 + $0x404] ss:$8 sps:$4 sm:$0xff]  }
 0x324   :  { %v1991_v4 = vpop.f32.mrf.mxu1  ;;  %v8509_v55 = vld [vmem:[#allocation4 + $0x400] ss:$8 sps:$4 sm:$0xff]  }
 0x325   :  { %v2219_v32 = vpack.c.bf16 %v2203_v0, %v2203_v0  ;;  %3891 = vmatpush2.bf16.msra.mxu0 %v8458_v53  ;;  %3916 = vmatpush1.bf16.msra.mxu1 %v8461_v54  ;;  %v8506_v54 = vld [vmem:[#allocation4 + $0x380] ss:$8 sps:$4 sm:$0xff]   ;;  %v8514_v0 = vld [vmem:[#allocation4 + $0x4f4] ss:$8 sps:$4 sm:$0xff]  }
 0x326   :  { %3917 = vmatprep.subr.bf16.mxu1 %v8466_v62  ;;  %3942 = vmatprep.subr.bf16.mxu0 %v8469_v63 }
 0x327   :  { %3892 = vmatprep.mubr.bf16.mxu0 %v2219_v32  ;;  %v8512_v32 = vld [vmem:[#allocation4 + $0x4f0] ss:$8 sps:$4 sm:$0xff]  }
 0x328   :  { %3893 = vmatmul.mubr.bf16.vlgmr.msra.gmra.mxu0 %v2218_v7  ;;  %v8515_v7 = vld [vmem:[#allocation4 + $0x570] ss:$8 sps:$4 sm:$0xff]  }
 0x329   :  { %3918 = vmatpush2.bf16.msra.mxu1 %v8464_v1  ;;  %3943 = vmatpush1.bf16.msra.mxu0 %v8467_v2  ;;  %v9969_v1 = vld [vmem:[#allocation16] sm:$0x3f] }
 0x32a   :  { %3919 = vmatprep.subr.bf16.mxu1 %v8472_v5  ;;  %3944 = vmatprep.subr.bf16.mxu0 %v8475_v6  ;;  %v8517_v2 = vld [vmem:[#allocation4 + $0x574] ss:$8 sps:$4 sm:$0xff]   ;;  %v4251_v4 = vrot.slane %v9969_v1, %v9949_v29  ;;  %v4255_v5 = vrot.slane %v9969_v1, %v9952_v33 }
 0x32b   :  { %3974 = vmatprep.mubr.bf16.mxu0 %v2223_v9  ;;  %v8520_v9 = vld [vmem:[#allocation4 + $0x4e4] ss:$8 sps:$4 sm:$0xff]  }
 0x32d   :  { %3920 = vmatpush2.bf16.msra.mxu1 %v8470_v8  ;;  %3945 = vmatpush1.bf16.msra.mxu0 %v8473_v56  ;;  %v8523_v56 = vld [vmem:[#allocation4 + $0x564] ss:$8 sps:$4 sm:$0xff]  }
 0x32e   :  { %3921 = vmatprep.subr.bf16.mxu1 %v8478_v10  ;;  %3946 = vmatprep.subr.bf16.mxu0 %v8481_v12  ;;  %v4306_v12 = vrot.slane %v9971_v3, %v9949_v29 }
 0x331   :  { %3922 = vmatpush2.bf16.msra.mxu1 %v8476_v13  ;;  %3947 = vmatpush1.bf16.msra.mxu0 %v8479_v14  ;;  %v4310_v13 = vrot.slane %v9971_v3, %v9952_v33 }
 0x332   :  { %3923 = vmatprep.subr.bf16.mxu1 %v8484_v16  ;;  %3948 = vmatprep.subr.bf16.mxu0 %v8487_v17  ;;  %v4273_v16 = vcombine.low %v4251_v4, %v4255_v5  ;;  %v8518_v17 = vld [vmem:[#allocation4 + $0x4e0] ss:$8 sps:$4 sm:$0xff]   ;;  %v8556_v4 = vld [vmem:[#allocation4 + $0x484] ss:$8 sps:$4 sm:$0xff]  }
 0x333   :  { %v8559_v5 = vld [vmem:[#allocation4 + $0x504] ss:$8 sps:$4 sm:$0xff]  }
 0x335   :  { %3924 = vmatpush2.bf16.msra.mxu1 %v8482_v18  ;;  %3949 = vmatpush1.bf16.msra.mxu0 %v8485_v19  ;;  %v8521_v18 = vld [vmem:[#allocation4 + $0x560] ss:$8 sps:$4 sm:$0xff]   ;;  %v8526_v19 = vld [vmem:[#allocation4 + $0x4d4] ss:$8 sps:$4 sm:$0xff]  }
 0x336   :  { %3925 = vmatprep.subr.bf16.mxu1 %v8490_v21  ;;  %3950 = vmatprep.subr.bf16.mxu0 %v8493_v22  ;;  %v8529_v21 = vld [vmem:[#allocation4 + $0x554] ss:$8 sps:$4 sm:$0xff]   ;;  %v4328_v22 = vcombine.low %v4306_v12, %v4310_v13 }
 0x337   :  { %v8565_v13 = vld [vmem:[#allocation4 + $0x674] ss:$8 sps:$4 sm:$0xff]  }
 0x339   :  { %3926 = vmatpush2.bf16.msra.mxu1 %v8488_v23  ;;  %3951 = vmatpush1.bf16.msra.mxu0 %v8491_v24 }
 0x33a   :  { %v4215_v30 = vpop.xlane.xlu0 %4214  ;;  %3927 = vmatprep.subr.bf16.mxu1 %v8496_v25  ;;  %3952 = vmatprep.subr.bf16.mxu0 %v8499_v28  ;;  %v4280_v25 = vrot.slane %v4273_v16, %v9869_v59  ;;  %v8524_v28 = vld [vmem:[#allocation4 + $0x4d0] ss:$8 sps:$4 sm:$0xff]  }
 0x33b   :  { %v4216_v35 = vmul.f32 0.0013020834, %v4215_v30  ;;  %v8527_v30 = vld [vmem:[#allocation4 + $0x550] ss:$8 sps:$4 sm:$0xff]  }
 0x33c   :  { %v8560_v16 = vld [vmem:[#allocation4 + $0x5f0] ss:$8 sps:$4 sm:$0xff]  }
 0x33d   :  { %v4217_v40 = vadd.f32 1e-12, %v4216_v35  ;;  %3928 = vmatpush2.bf16.msra.mxu1 %v8494_v31  ;;  %3953 = vmatpush1.bf16.msra.mxu0 %v8497_v38  ;;  %v4335_v35 = vrot.slane %v4328_v22, %v9869_v59  ;;  %v8532_v38 = vld [vmem:[#allocation4 + $0x4c4] ss:$8 sps:$4 sm:$0xff]  }
 0x33e   :  { %v2027_v37 = vpop.f32.mrf.mxu1  ;;  %3929 = vmatprep.subr.bf16.mxu1 %v8502_v43  ;;  %3954 = vmatprep.subr.bf16.mxu0 %v8505_v45 }
 0x33f   :  { %9176 = vrsqrt.f32 %v4217_v40  ;;  %v2028_v53 = vadd.f32 %v2027_v37, %v1177_v46  ;;  %v8535_v40 = vld [vmem:[#allocation4 + $0x544] ss:$8 sps:$4 sm:$0xff]   ;;  %v8533_v46 = vld [vmem:[#allocation4 + $0x540] ss:$8 sps:$4 sm:$0xff]  }
 0x340   :  { %v2029_v61 = vpop.f32.mrf.mxu1  ;;  %v8544_v37 = vld [vmem:[#allocation4 + $0x4a4] ss:$8 sps:$4 sm:$0xff]  }
 0x341   :  { %v2204_v62 = vmax.f32 %v2028_v53, 0.0  ;;  %v2030_v63 = vadd.f32 %v2029_v61, %v1181_v50  ;;  %3930 = vmatpush2.bf16.msra.mxu1 %v8500_v47  ;;  %3955 = vmatpush1.bf16.msra.mxu0 %v8503_v48  ;;  %v8538_v47 = vld [vmem:[#allocation4 + $0x4b4] ss:$8 sps:$4 sm:$0xff]   ;;  %v8539_v50 = vld [vmem:[#allocation4 + $0x530] ss:$8 sps:$4 sm:$0xff]  }
 0x342   :  { %3931 = vmatprep.subr.bf16.mxu1 %v8508_v52  ;;  %3956 = vmatprep.subr.bf16.mxu0 %v8511_v11  ;;  %v2031_v41 = vpop.f32.mrf.mxu1  ;;  %v8541_v48 = vld [vmem:[#allocation4 + $0x534] ss:$8 sps:$4 sm:$0xff]   ;;  %v8547_v52 = vld [vmem:[#allocation4 + $0x524] ss:$8 sps:$4 sm:$0xff]   ;;  %v8542_v11 = vld [vmem:[#allocation4 + $0x4a0] ss:$8 sps:$4 sm:$0xff]  }
 0x343   :  { %v2205_v6 = vmax.f32 %v2030_v63, 0.0  ;;  %v2220_v8 = vpack.c.bf16 %v2204_v62, %v2204_v62  ;;  %v8545_v53 = vld [vmem:[#allocation4 + $0x520] ss:$8 sps:$4 sm:$0xff]   ;;  %v8553_v61 = vld [vmem:[#allocation4 + $0x514] ss:$8 sps:$4 sm:$0xff]   ;;  %v1205_v62 = vrot.slane %v9946_v26, %v9952_v33 }
 0x344   :  { %v2032_v10 = vpop.f32.mrf.mxu1  ;;  %v8548_v63 = vld [vmem:[#allocation4 + $0x490] ss:$8 sps:$4 sm:$0xff]  }
 0x345   :  { %v2221_v14 = vpack.c.bf16 %v2205_v6, %v2205_v6  ;;  %3932 = vmatpush2.bf16.msra.mxu1 %v8506_v54  ;;  %3957 = vmatpush1.bf16.msra.mxu0 %v8509_v55  ;;  %v1185_v54 = vrot.slane %v9946_v26, %v9919_v58  ;;  %v8550_v55 = vld [vmem:[#allocation4 + $0x494] ss:$8 sps:$4 sm:$0xff]  }
 0x346   :  { %3958 = vmatprep.subr.bf16.mxu0 %v8514_v0  ;;  %3983 = vmatprep.subr.bf16.mxu1 %v8517_v2  ;;  %v8551_v0 = vld [vmem:[#allocation4 + $0x510] ss:$8 sps:$4 sm:$0xff]   ;;  %v1197_v2 = vrot.slane %v9946_v26, %v9936_v44 }
 0x347   :  { %3933 = vmatprep.mubr.bf16.mxu1 %v2221_v14  ;;  %v2069_v41 = vadd.f32 %v9928_v27, %v1185_v54  ;;  %v8590_v54 = vld [vmem:[#allocation4 + $0x5a0] ss:$8 sps:$4 sm:$0xff]  }
 0x348   :  { %3934 = vmatmul.mubr.bf16.vlgmr.msra.gmra.mxu1 %v2220_v8  ;;  %v8554_v8 = vld [vmem:[#allocation4 + $0x480] ss:$8 sps:$4 sm:$0xff]  }
 0x349   :  { %3959 = vmatpush2.bf16.msra.mxu0 %v8512_v32  ;;  %3984 = vmatpush1.bf16.msra.mxu1 %v8515_v7  ;;  %v2153_v32 = vadd.f32 %v9944_v20, %v1205_v62  ;;  %v2206_v12 = vmax.f32 %v2069_v41, 0.0  ;;  %v8601_v62 = vld [vmem:[#allocation4 + $0x614] ss:$8 sps:$4 sm:$0xff]   ;;  %v1213_v41 = vrot.slane %v9946_v26, %v1180_v39 }
 0x34a   :  { %3960 = vmatprep.subr.bf16.mxu0 %v8520_v9  ;;  %3985 = vmatprep.subr.bf16.mxu1 %v8523_v56  ;;  %v8557_v9 = vld [vmem:[#allocation4 + $0x500] ss:$8 sps:$4 sm:$0xff]   ;;  %v8562_v56 = vld [vmem:[#allocation4 + $0x5f4] ss:$8 sps:$4 sm:$0xff]  }
 0x34b   :  { %v2211_v14 = vmax.f32 %v2153_v32, 0.0 }
 0x34c   :  { %v9177_v23 = vpop.eup %9176 }
 0x34d   :  { %v9982_v24 = vrot.slane %v9177_v23, %v9893_v36  ;;  %3961 = vmatpush2.bf16.msra.mxu0 %v8518_v17  ;;  %3986 = vmatpush1.bf16.msra.mxu1 %v8521_v18  ;;  %v8530_v36 = vld [vmem:[#allocation4 + $0x4c0] ss:$8 sps:$4 sm:$0xff]   ;;  %v8563_v17 = vld [vmem:[#allocation4 + $0x670] ss:$8 sps:$4 sm:$0xff]   ;;  %v2222_v23 = vpack.c.bf16 %v2206_v12, %v2206_v12  ;;  %v8613_v12 = vld [vmem:[#allocation4 + $0x774] ss:$8 sps:$4 sm:$0xff]  }
 0x34e   :  { %3962 = vmatprep.subr.bf16.mxu0 %v8526_v19  ;;  %3987 = vmatprep.subr.bf16.mxu1 %v8529_v21  ;;  %v8568_v19 = vld [vmem:[#allocation4 + $0x5e4] ss:$8 sps:$4 sm:$0xff]  }
 0x34f   :  { %v4229_v31 = vmul.f32 %v9982_v24, %v9898_v51  ;;  %v8536_v51 = vld [vmem:[#allocation4 + $0x4b0] ss:$8 sps:$4 sm:$0xff]   ;;  %v8571_v21 = vld [vmem:[#allocation4 + $0x664] ss:$8 sps:$4 sm:$0xff]  }
 0x351   :  { %v4284_v43 = vmul.f32 %v4280_v25, %v4229_v31  ;;  %3963 = vmatpush2.bf16.msra.mxu0 %v8524_v28  ;;  %3988 = vmatpush1.bf16.msra.mxu1 %v8527_v30  ;;  %v2227_v25 = vpack.c.bf16 %v2211_v14, %v2211_v14  ;;  %v8566_v28 = vld [vmem:[#allocation4 + $0x5e0] ss:$8 sps:$4 sm:$0xff]   ;;  %v8574_v31 = vld [vmem:[#allocation4 + $0x5d4] ss:$8 sps:$4 sm:$0xff]   ;;  %v8608_v14 = vld [vmem:[#allocation4 + $0x6f0] ss:$8 sps:$4 sm:$0xff]  }
 0x352   :  { %3964 = vmatprep.subr.bf16.mxu0 %v8532_v38  ;;  %3989 = vmatprep.subr.bf16.mxu1 %v8535_v40  ;;  %v8569_v30 = vld [vmem:[#allocation4 + $0x660] ss:$8 sps:$4 sm:$0xff]   ;;  %v8572_v38 = vld [vmem:[#allocation4 + $0x5d0] ss:$8 sps:$4 sm:$0xff]  }
 0x353   :  { %v9988_v45 = vadd.f32 %v4335_v35, %v4284_v43  ;;  %v8577_v35 = vld [vmem:[#allocation4 + $0x654] ss:$8 sps:$4 sm:$0xff]   ;;  %v8575_v40 = vld [vmem:[#allocation4 + $0x650] ss:$8 sps:$4 sm:$0xff]   ;;  %v8580_v43 = vld [vmem:[#allocation4 + $0x5c4] ss:$8 sps:$4 sm:$0xff]  }
 0x355   :  { %3965 = vmatpush2.bf16.msra.mxu0 %v8530_v36  ;;  %3990 = vmatpush1.bf16.msra.mxu1 %v8533_v46  ;;  %v8583_v36 = vld [vmem:[#allocation4 + $0x644] ss:$8 sps:$4 sm:$0xff]   ;;  %v8578_v46 = vld [vmem:[#allocation4 + $0x5c0] ss:$8 sps:$4 sm:$0xff]  }
 0x356   :  { %3966 = vmatprep.subr.bf16.mxu0 %v8538_v47  ;;  %3991 = vmatprep.subr.bf16.mxu1 %v8541_v48  ;;  %v8581_v47 = vld [vmem:[#allocation4 + $0x640] ss:$8 sps:$4 sm:$0xff]   ;;  %v8586_v48 = vld [vmem:[#allocation4 + $0x5b4] ss:$8 sps:$4 sm:$0xff]  }
 0x359   :  { %3967 = vmatpush2.bf16.msra.mxu0 %v8536_v51  ;;  %3992 = vmatpush1.bf16.msra.mxu1 %v8539_v50  ;;  %v8589_v51 = vld [vmem:[#allocation4 + $0x634] ss:$8 sps:$4 sm:$0xff]   ;;  %v8584_v50 = vld [vmem:[#allocation4 + $0x5b0] ss:$8 sps:$4 sm:$0xff]  }
 0x35a   :  { %3968 = vmatprep.subr.bf16.mxu0 %v8544_v37  ;;  %3993 = vmatprep.subr.bf16.mxu1 %v8547_v52  ;;  %v8587_v37 = vld [vmem:[#allocation4 + $0x630] ss:$8 sps:$4 sm:$0xff]   ;;  %v8592_v52 = vld [vmem:[#allocation4 + $0x5a4] ss:$8 sps:$4 sm:$0xff]  }
 0x35d   :  { %3969 = vmatpush2.bf16.msra.mxu0 %v8542_v11  ;;  %3994 = vmatpush1.bf16.msra.mxu1 %v8545_v53  ;;  %v8595_v11 = vld [vmem:[#allocation4 + $0x624] ss:$8 sps:$4 sm:$0xff]   ;;  %v1193_v53 = vrot.slane %v9946_v26, %v9933_v42 }
 0x35e   :  { %3970 = vmatprep.subr.bf16.mxu0 %v8550_v55  ;;  %3995 = vmatprep.subr.bf16.mxu1 %v8553_v61  ;;  %v9997_v6 = vpop.f32.mrf.mxu1  ;;  %v8593_v55 = vld [vmem:[#allocation4 + $0x620] ss:$8 sps:$4 sm:$0xff]   ;;  %v8598_v61 = vld [vmem:[#allocation4 + $0x594] ss:$8 sps:$4 sm:$0xff]  }
 0x360   :  { %v2111_v7 = vpop.f32.mrf.mxu1 }
 0x361   :  { %3971 = vmatpush2.bf16.msra.mxu0 %v8548_v63  ;;  %3996 = vmatpush1.bf16.msra.mxu1 %v8551_v0  ;;  %v2112_v10 = vadd.f32 %v2111_v7, %v1197_v2  ;;  %v2110_v63 = vadd.f32 %v9997_v6, %v1193_v53  ;;  %v8596_v0 = vld [vmem:[#allocation4 + $0x590] ss:$8 sps:$4 sm:$0xff]   ;;  %v8605_v6 = vld [vmem:[#allocation4 + $0x600] ss:$8 sps:$4 sm:$0xff]  }
 0x362   :  { %3972 = vmatprep.subr.bf16.mxu0 %v8556_v4  ;;  %3997 = vmatprep.subr.bf16.mxu1 %v8559_v5  ;;  %v2113_v27 = vpop.f32.mrf.mxu1  ;;  %v8599_v2 = vld [vmem:[#allocation4 + $0x610] ss:$8 sps:$4 sm:$0xff]   ;;  %v8604_v4 = vld [vmem:[#allocation4 + $0x584] ss:$8 sps:$4 sm:$0xff]   ;;  %v8626_v53 = vld [vmem:[#allocation4 + $0x6c0] ss:$8 sps:$4 sm:$0xff]  }
 0x363   :  { %v2209_v18 = vmax.f32 %v2112_v10, 0.0  ;;  %v8607_v5 = vld [vmem:[#allocation4 + $0x604] ss:$8 sps:$4 sm:$0xff]   ;;  %v2208_v7 = vmax.f32 %v2110_v63, 0.0  ;;  %v8610_v10 = vld [vmem:[#allocation4 + $0x6f4] ss:$8 sps:$4 sm:$0xff]  }
 0x364   :  { %v2114_v22 = vpop.f32.mrf.mxu1 }
 0x365   :  { %3973 = vmatpush2.bf16.msra.mxu0 %v8554_v8  ;;  %3998 = vmatpush1.bf16.msra.mxu1 %v8557_v9  ;;  %v2225_v20 = vpack.c.bf16 %v2209_v18, %v2209_v18  ;;  %v8602_v9 = vld [vmem:[#allocation4 + $0x580] ss:$8 sps:$4 sm:$0xff]   ;;  %v2224_v26 = vpack.c.bf16 %v2208_v7, %v2208_v7  ;;  %v8619_v18 = vld [vmem:[#allocation4 + $0x764] ss:$8 sps:$4 sm:$0xff]   ;;  %v4239_v22 = vrot.slane %v9969_v1, %v9922_v60 }
 0x366   :  { %3999 = vmatprep.subr.bf16.mxu1 %v8562_v56  ;;  %4024 = vmatprep.subr.bf16.mxu0 %v8565_v13 }
 0x367   :  { %4015 = vmatprep.mubr.bf16.mxu1 %v2225_v20  ;;  %v4243_v20 = vrot.slane %v9969_v1, %v9933_v42 }
 0x368   :  { %3975 = vmatmul.mubr.bf16.vlgmr.msra.gmra.mxu0 %v2222_v23  ;;  %v4247_v23 = vrot.slane %v9969_v1, %v9936_v44 }
 0x369   :  { %4000 = vmatpush2.bf16.msra.mxu1 %v8560_v16  ;;  %4025 = vmatpush1.bf16.msra.mxu0 %v8563_v17  ;;  %v8611_v16 = vld [vmem:[#allocation4 + $0x770] ss:$8 sps:$4 sm:$0xff]   ;;  %v8616_v17 = vld [vmem:[#allocation4 + $0x6e4] ss:$8 sps:$4 sm:$0xff]  }
 0x36a   :  { %4001 = vmatprep.subr.bf16.mxu1 %v8568_v19  ;;  %4026 = vmatprep.subr.bf16.mxu0 %v8571_v21  ;;  %v4235_v19 = vrot.slane %v9969_v1, %v9919_v58  ;;  %v4298_v1 = vrot.slane %v9971_v3, %v9933_v42 }
 0x36b   :  { %4056 = vmatprep.mubr.bf16.mxu0 %v2227_v25  ;;  %v8614_v25 = vld [vmem:[#allocation4 + $0x6e0] ss:$8 sps:$4 sm:$0xff]  }
 0x36d   :  { %4002 = vmatpush2.bf16.msra.mxu1 %v8566_v28  ;;  %4027 = vmatpush1.bf16.msra.mxu0 %v8569_v30  ;;  %v8617_v28 = vld [vmem:[#allocation4 + $0x760] ss:$8 sps:$4 sm:$0xff]   ;;  %v8622_v30 = vld [vmem:[#allocation4 + $0x6d4] ss:$8 sps:$4 sm:$0xff]  }
 0x36e   :  { %4003 = vmatprep.subr.bf16.mxu1 %v8574_v31  ;;  %4028 = vmatprep.subr.bf16.mxu0 %v8577_v35  ;;  %v8625_v31 = vld [vmem:[#allocation4 + $0x754] ss:$8 sps:$4 sm:$0xff]   ;;  %v4256_v35 = vcombine.low %v4235_v19, %v4239_v22 }
 0x36f   :  { %v8661_v22 = vld [vmem:[#allocation5 + $0x154] ss:$24 sps:$4 sm:$0xff]  }
 0x371   :  { %4004 = vmatpush2.bf16.msra.mxu1 %v8572_v38  ;;  %4029 = vmatpush1.bf16.msra.mxu0 %v8575_v40  ;;  %v4257_v38 = vcombine.low %v4243_v20, %v4247_v23  ;;  %v4290_v40 = vrot.slane %v9971_v3, %v9919_v58  ;;  %v8656_v20 = vld [vmem:[#allocation4 + $0x7f0] ss:$8 sps:$4 sm:$0xff]  }
 0x372   :  { %4005 = vmatprep.subr.bf16.mxu1 %v8580_v43  ;;  %4030 = vmatprep.subr.bf16.mxu0 %v8583_v36  ;;  %v4294_v43 = vrot.slane %v9971_v3, %v9922_v60  ;;  %v4302_v36 = vrot.slane %v9971_v3, %v9936_v44  ;;  %v8634_v3 = vld [vmem:[#allocation4 + $0x6b4] ss:$8 sps:$4 sm:$0xff]   ;;  %v8659_v23 = vld [vmem:[#allocation5 + $0x150] ss:$24 sps:$4 sm:$0xff]  }
 0x375   :  { %4006 = vmatpush2.bf16.msra.mxu1 %v8578_v46  ;;  %4031 = vmatpush1.bf16.msra.mxu0 %v8581_v47  ;;  %v8620_v46 = vld [vmem:[#allocation4 + $0x6d0] ss:$8 sps:$4 sm:$0xff]  }
 0x376   :  { %4007 = vmatprep.subr.bf16.mxu1 %v8586_v48  ;;  %4032 = vmatprep.subr.bf16.mxu0 %v8589_v51  ;;  %v8623_v47 = vld [vmem:[#allocation4 + $0x750] ss:$8 sps:$4 sm:$0xff]   ;;  %v8628_v48 = vld [vmem:[#allocation4 + $0x6c4] ss:$8 sps:$4 sm:$0xff]  }
 0x377   :  { %v8631_v51 = vld [vmem:[#allocation4 + $0x744] ss:$8 sps:$4 sm:$0xff]  }
 0x379   :  { %4008 = vmatpush2.bf16.msra.mxu1 %v8584_v50  ;;  %4033 = vmatpush1.bf16.msra.mxu0 %v8587_v37  ;;  %v4264_v50 = vrot.slane %v4256_v35, %v9869_v59  ;;  %v4271_v37 = vrot.slane %v4257_v38, %v9869_v59  ;;  %v8662_v38 = vld [vmem:[#allocation4 + $0x7e0] ss:$8 sps:$4 sm:$0xff]  }
 0x37a   :  { %4009 = vmatprep.subr.bf16.mxu1 %v8592_v52  ;;  %4034 = vmatprep.subr.bf16.mxu0 %v8595_v11  ;;  %v4311_v52 = vcombine.low %v4290_v40, %v4294_v43  ;;  %v4312_v11 = vcombine.low %v4298_v1, %v4302_v36  ;;  %v8665_v40 = vld [vmem:[#allocation5 + $0x120] ss:$24 sps:$4 sm:$0xff]   ;;  %v8670_v1 = vld [vmem:[#allocation4 + $0x7d4] ss:$8 sps:$4 sm:$0xff]  }
 0x37b   :  { %v8673_v36 = vld [vmem:[#allocation5 + $0xf4] ss:$24 sps:$4 sm:$0xff]  }
 0x37c   :  { %v4319_v63 = vrot.slane %v4311_v52, %v9869_v59  ;;  %v8674_v52 = vld [vmem:[#allocation4 + $0x7c0] ss:$8 sps:$4 sm:$0xff]  }
 0x37d   :  { %4010 = vmatpush2.bf16.msra.mxu1 %v8590_v54  ;;  %4035 = vmatpush1.bf16.msra.mxu0 %v8593_v55  ;;  %v8629_v54 = vld [vmem:[#allocation4 + $0x740] ss:$8 sps:$4 sm:$0xff]   ;;  %v8637_v55 = vld [vmem:[#allocation4 + $0x734] ss:$8 sps:$4 sm:$0xff]  }
 0x37e   :  { %4011 = vmatprep.subr.bf16.mxu1 %v8598_v61  ;;  %4036 = vmatprep.subr.bf16.mxu0 %v8601_v62  ;;  %v10006_v32 = vpop.f32.mrf.mxu1  ;;  %v4228_v61 = vmul.f32 %v9982_v24, %v9896_v49  ;;  %v4272_v62 = vcombine.low %v4264_v50, %v4271_v37  ;;  %v10030_v49 = vld [vmem:[#allocation12 + $0x8] sm:$0xff]  ;;  %v8676_v50 = vld [vmem:[#allocation4 + $0x7c4] ss:$8 sps:$4 sm:$0xff]  }
 0x37f   :  { %v1201_v24 = vrot.slane %v10030_v49, %v9949_v29  ;;  %v8679_v37 = vld [vmem:[#allocation5 + $0xc4] ss:$24 sps:$4 sm:$0xff]  }
 0x380   :  { %v2193_v8 = vpop.f32.mrf.mxu1  ;;  %v4283_v7 = vmul.f32 %v4272_v62, %v4228_v61  ;;  %v8688_v61 = vld [vmem:[#allocation4 + $0x7a4] ss:$8 sps:$4 sm:$0xff]  }
 0x381   :  { %4012 = vmatpush2.bf16.msra.mxu1 %v8596_v0  ;;  %4037 = vmatpush1.bf16.msra.mxu0 %v8599_v2  ;;  %v2194_v56 = vadd.f32 %v2193_v8, %v1213_v41  ;;  %v4326_v0 = vrot.slane %v4312_v11, %v9869_v59  ;;  %v8632_v2 = vld [vmem:[#allocation4 + $0x6b0] ss:$8 sps:$4 sm:$0xff]   ;;  %v8691_v62 = vld [vmem:[#allocation5 + $0x64] ss:$24 sps:$4 sm:$0xff]  }
 0x382   :  { %4013 = vmatprep.subr.bf16.mxu1 %v8604_v4  ;;  %4038 = vmatprep.subr.bf16.mxu0 %v8607_v5  ;;  %v2195_v13 = vpop.f32.mrf.mxu1  ;;  %v8635_v41 = vld [vmem:[#allocation4 + $0x730] ss:$8 sps:$4 sm:$0xff]   ;;  %v8640_v4 = vld [vmem:[#allocation4 + $0x6a4] ss:$8 sps:$4 sm:$0xff]  }
 0x383   :  { %v2213_v27 = vmax.f32 %v2194_v56, 0.0  ;;  %v8643_v5 = vld [vmem:[#allocation4 + $0x724] ss:$8 sps:$4 sm:$0xff]   ;;  %v4327_v8 = vcombine.low %v4319_v63, %v4326_v0  ;;  %v8646_v56 = vld [vmem:[#allocation4 + $0x694] ss:$8 sps:$4 sm:$0xff]  }
 0x384   :  { %v2196_v39 = vpop.f32.mrf.mxu1  ;;  %v8644_v13 = vld [vmem:[#allocation4 + $0x690] ss:$8 sps:$4 sm:$0xff]   ;;  %v8686_v63 = vld [vmem:[#allocation4 + $0x7a0] ss:$8 sps:$4 sm:$0xff]  }
 0x385   :  { %4014 = vmatpush2.bf16.msra.mxu1 %v8602_v9  ;;  %4039 = vmatpush1.bf16.msra.mxu0 %v8605_v6  ;;  %v2229_v21 = vpack.c.bf16 %v2213_v27, %v2213_v27  ;;  %v8638_v9 = vld [vmem:[#allocation4 + $0x6a0] ss:$8 sps:$4 sm:$0xff]   ;;  %v8647_v27 = vld [vmem:[#allocation4 + $0x710] ss:$8 sps:$4 sm:$0xff]   ;;  %v8652_v39 = vld [vmem:[#allocation4 + $0x684] ss:$8 sps:$4 sm:$0xff]  }
 0x386   :  { %4040 = vmatprep.subr.bf16.mxu0 %v8610_v10  ;;  %4065 = vmatprep.subr.bf16.mxu1 %v8613_v12  ;;  %v8641_v6 = vld [vmem:[#allocation4 + $0x720] ss:$8 sps:$4 sm:$0xff]   ;;  %v8649_v10 = vld [vmem:[#allocation4 + $0x714] ss:$8 sps:$4 sm:$0xff]   ;;  %v10034_v12 = vadd.f32 %v4327_v8, %v4283_v7  ;;  %v8692_v7 = vld [vmem:[#allocation4 + $0x790] ss:$8 sps:$4 sm:$0xff]  }
 0x387   :  { %v8677_v11 = vld [vmem:[#allocation5 + $0xc0] ss:$24 sps:$4 sm:$0xff]   ;;  %v8695_v8 = vld [vmem:[#allocation5 + $0x30] ss:$24 sps:$4 sm:$0xff]  }
 0x388   :  { %4016 = vmatmul.mubr.bf16.vlgmr.msra.gmra.mxu1 %v2224_v26  ;;  %v2151_v26 = vadd.f32 %v9942_v15, %v1201_v24  ;;  %v8689_v0 = vld [vmem:[#allocation5 + $0x60] ss:$24 sps:$4 sm:$0xff]   ;;  %v8703_v24 = vld [vmem:[#allocation5 + $0x4] ss:$24 sps:$4 sm:$0xff]  }
 0x389   :  { %4041 = vmatpush2.bf16.msra.mxu0 %v8608_v14  ;;  %4066 = vmatpush1.bf16.msra.mxu1 %v8611_v16  ;;  %v8655_v14 = vld [vmem:[#allocation4 + $0x704] ss:$8 sps:$4 sm:$0xff]   ;;  %v10039_v16 = vrot.slane %v10034_v12, %v9869_v59 }
 0x38a   :  { %4042 = vmatprep.subr.bf16.mxu0 %v8616_v17  ;;  %4067 = vmatprep.subr.bf16.mxu1 %v8619_v18  ;;  %v8650_v17 = vld [vmem:[#allocation4 + $0x680] ss:$8 sps:$4 sm:$0xff]   ;;  %v2210_v19 = vmax.f32 %v2151_v26, 0.0  ;;  %v2495_v26 = vrot.slane %v2486_v57, %v9922_v60 }
 0x38b   :  { %4097 = vmatprep.mubr.bf16.mxu1 %v2229_v21  ;;  %v8653_v18 = vld [vmem:[#allocation4 + $0x700] ss:$8 sps:$4 sm:$0xff]   ;;  %v8658_v21 = vld [vmem:[#allocation4 + $0x7f4] ss:$8 sps:$4 sm:$0xff]   ;;  %v4357_v15 = vcombine.high %v10039_v16, %v10039_v16 }
 0x38d   :  { %4043 = vmatpush2.bf16.msra.mxu0 %v8614_v25  ;;  %4068 = vmatpush1.bf16.msra.mxu1 %v8617_v28  ;;  %v2226_v25 = vpack.c.bf16 %v2210_v19, %v2210_v19  ;;  %v8664_v28 = vld [vmem:[#allocation4 + $0x7e4] ss:$8 sps:$4 sm:$0xff]   ;;  %v10045_v35 = vpack.c.bf16 %v4357_v15, %v4357_v15 }
 0x38e   :  { %4044 = vmatprep.subr.bf16.mxu0 %v8622_v30  ;;  %4069 = vmatprep.subr.bf16.mxu1 %v8625_v31  ;;  %v8667_v30 = vld [vmem:[#allocation5 + $0x124] ss:$24 sps:$4 sm:$0xff]  }
 0x391   :  { %4045 = vmatpush2.bf16.msra.mxu0 %v8620_v46  ;;  %4070 = vmatpush1.bf16.msra.mxu1 %v8623_v47  ;;  %v8668_v47 = vld [vmem:[#allocation4 + $0x7d0] ss:$8 sps:$4 sm:$0xff]  }
 0x392   :  { %4046 = vmatprep.subr.bf16.mxu0 %v8628_v48  ;;  %4071 = vmatprep.subr.bf16.mxu1 %v8631_v51  ;;  %v8671_v48 = vld [vmem:[#allocation5 + $0xf0] ss:$24 sps:$4 sm:$0xff]  }
 0x395   :  { %4047 = vmatpush2.bf16.msra.mxu0 %v8626_v53  ;;  %4072 = vmatpush1.bf16.msra.mxu1 %v8629_v54  ;;  %v8682_v53 = vld [vmem:[#allocation4 + $0x7b4] ss:$8 sps:$4 sm:$0xff]  }
 0x396   :  { %4048 = vmatprep.subr.bf16.mxu0 %v8634_v3  ;;  %4073 = vmatprep.subr.bf16.mxu1 %v8637_v55  ;;  %v8685_v54 = vld [vmem:[#allocation5 + $0x94] ss:$24 sps:$4 sm:$0xff]   ;;  %v8680_v3 = vld [vmem:[#allocation4 + $0x7b0] ss:$8 sps:$4 sm:$0xff]  }
 0x397   :  { %v8683_v55 = vld [vmem:[#allocation5 + $0x90] ss:$24 sps:$4 sm:$0xff]  }
 0x399   :  { %4049 = vmatpush2.bf16.msra.mxu0 %v8632_v2  ;;  %4074 = vmatpush1.bf16.msra.mxu1 %v8635_v41  ;;  %v1209_v2 = vrot.slane %v10030_v49, %v1176_v34  ;;  %v8694_v41 = vld [vmem:[#allocation4 + $0x794] ss:$8 sps:$4 sm:$0xff]   ;;  %v8698_v49 = vld [vmem:[#allocation4 + $0x780] ss:$8 sps:$4 sm:$0xff]  }
 0x39a   :  { %4050 = vmatprep.subr.bf16.mxu0 %v8640_v4  ;;  %4075 = vmatprep.subr.bf16.mxu1 %v8643_v5  ;;  %v8697_v4 = vld [vmem:[#allocation5 + $0x34] ss:$24 sps:$4 sm:$0xff]   ;;  %v4342_v5 = vcombine.high %v10034_v12, %v10034_v12 }
 0x39b   :  { %v8706_v12 = vld [vmem:[#allocation5 + $0x2d4] ss:$24 sps:$4 sm:$0xff]  }
 0x39c   :  { %v10057_v34 = vrot.slane %v4342_v5, %v9869_v59  ;;  %v10074_v5 = vrot.slane %v9988_v45, %v9869_v59  ;;  %v8760_v59 = vld [vmem:[#allocation5 + $0x5a4] ss:$24 sps:$4 sm:$0xff]  }
 0x39d   :  { %4051 = vmatpush2.bf16.msra.mxu0 %v8638_v9  ;;  %4076 = vmatpush1.bf16.msra.mxu1 %v8641_v6  ;;  %v2192_v9 = vadd.f32 %v10006_v32, %v1209_v2  ;;  %v8700_v6 = vld [vmem:[#allocation4 + $0x784] ss:$8 sps:$4 sm:$0xff]   ;;  %v8743_v2 = vld [vmem:[#allocation5 + $0x330] ss:$24 sps:$4 sm:$0xff]  }
 0x39e   :  { %4052 = vmatprep.subr.bf16.mxu0 %v8646_v56  ;;  %4077 = vmatprep.subr.bf16.mxu1 %v8649_v10  ;;  %v8701_v56 = vld [vmem:[#allocation5] ss:$24 sps:$4 sm:$0xff]   ;;  %v4358_v32 = vcombine.high %v10057_v34, %v10057_v34  ;;  %v8763_v45 = vld [vmem:[#allocation5 + $0x724] ss:$24 sps:$4 sm:$0xff]  }
 0x39f   :  { %v2212_v10 = vmax.f32 %v2192_v9, 0.0  ;;  %v8754_v9 = vld [vmem:[#allocation5 + $0x5d4] ss:$24 sps:$4 sm:$0xff]  }
 0x3a0   :  { %v10064_v15 = vpack.c.bf16 %v4358_v32, %v4358_v32  ;;  %v8761_v32 = vld [vmem:[#allocation5 + $0x720] ss:$24 sps:$4 sm:$0xff]  }
 0x3a1   :  { %4053 = vmatpush2.bf16.msra.mxu0 %v8644_v13  ;;  %4078 = vmatpush1.bf16.msra.mxu1 %v8647_v27  ;;  %v8709_v13 = vld [vmem:[#allocation5 + $0x454] ss:$24 sps:$4 sm:$0xff]   ;;  %v2491_v27 = vrot.slane %v2486_v57, %v9919_v58  ;;  %v8752_v57 = vld [vmem:[#allocation5 + $0x5d0] ss:$24 sps:$4 sm:$0xff]  }
 0x3a2   :  { %4054 = vmatprep.subr.bf16.mxu0 %v8652_v39  ;;  %4079 = vmatprep.subr.bf16.mxu1 %v8655_v14  ;;  %v8704_v39 = vld [vmem:[#allocation5 + $0x2d0] ss:$24 sps:$4 sm:$0xff]  }
 0x3a3   :  { %v8707_v14 = vld [vmem:[#allocation5 + $0x450] ss:$24 sps:$4 sm:$0xff]  }
 0x3a5   :  { %4055 = vmatpush2.bf16.msra.mxu0 %v8650_v17  ;;  %4080 = vmatpush1.bf16.msra.mxu1 %v8653_v18  ;;  %v2228_v17 = vpack.c.bf16 %v2212_v10, %v2212_v10  ;;  %v8712_v18 = vld [vmem:[#allocation5 + $0x2a4] ss:$24 sps:$4 sm:$0xff]  }
 0x3a6   :  { %4081 = vmatprep.subr.bf16.mxu1 %v8658_v21  ;;  %6139 = vmatprep.subr.bf16.mxu0 %v8661_v22  ;;  %v8715_v21 = vld [vmem:[#allocation5 + $0x424] ss:$24 sps:$4 sm:$0xff]  }
 0x3a8   :  { %4057 = vmatmul.mubr.bf16.vlgmr.msra.gmra.mxu0 %v2226_v25  ;;  %v10043_v31 = vpop.f32.mrf.mxu0  ;;  %v8710_v25 = vld [vmem:[#allocation5 + $0x2a0] ss:$24 sps:$4 sm:$0xff]  }
 0x3a9   :  { %4082 = vmatpush2.bf16.msra.mxu1 %v8656_v20  ;;  %6140 = vmatpush1.bf16.msra.mxu0 %v8659_v23  ;;  %v3813_v19 = vadd.f32 %v10043_v31, %v2491_v27  ;;  %v8758_v27 = vld [vmem:[#allocation5 + $0x5a0] ss:$24 sps:$4 sm:$0xff]  }
 0x3aa   :  { %6171 = vmatprep.mubr.bf16.mxu0 %v10045_v35  ;;  %v10048_v43 = vpop.f32.mrf.mxu0  ;;  %4083 = vmatprep.subr.bf16.mxu1 %v8664_v28  ;;  %v8713_v28 = vld [vmem:[#allocation5 + $0x420] ss:$24 sps:$4 sm:$0xff]  }
 0x3ab   :  { %6141 = vmatprep.subr.bf16.mxu0 %v8667_v30  ;;  %v3815_v20 = vadd.f32 %v10048_v43, %v2495_v26  ;;  %v8719_v43 = vld [vmem:[#allocation5 + $0x3f0] ss:$24 sps:$4 sm:$0xff]   ;;  %v8766_v26 = vld [vmem:[#allocation5 + $0x574] ss:$24 sps:$4 sm:$0xff]  }
 0x3ac   :  { %v3816_v46 = vpop.f32.mrf.mxu0 }
 0x3ad   :  { %4084 = vmatpush2.bf16.msra.mxu1 %v8662_v38  ;;  %6142 = vmatpush1.bf16.msra.mxu0 %v8665_v40  ;;  %v8718_v38 = vld [vmem:[#allocation5 + $0x274] ss:$24 sps:$4 sm:$0xff]  }
 0x3ae   :  { %v3817_v51 = vpop.f32.mrf.mxu0  ;;  %4085 = vmatprep.subr.bf16.mxu1 %v8670_v1  ;;  %6143 = vmatprep.subr.bf16.mxu0 %v8673_v36  ;;  %v8721_v40 = vld [vmem:[#allocation5 + $0x3f4] ss:$24 sps:$4 sm:$0xff]   ;;  %v8716_v36 = vld [vmem:[#allocation5 + $0x270] ss:$24 sps:$4 sm:$0xff]  }
 0x3af   :  { %v8722_v51 = vld [vmem:[#allocation5 + $0x240] ss:$24 sps:$4 sm:$0xff]  }
 0x3b1   :  { %4086 = vmatpush2.bf16.msra.mxu1 %v8668_v47  ;;  %6144 = vmatpush1.bf16.msra.mxu0 %v8671_v48  ;;  %v8724_v47 = vld [vmem:[#allocation5 + $0x244] ss:$24 sps:$4 sm:$0xff]  }
 0x3b2   :  { %4087 = vmatprep.subr.bf16.mxu1 %v8676_v50  ;;  %6145 = vmatprep.subr.bf16.mxu0 %v8679_v37  ;;  %v8727_v48 = vld [vmem:[#allocation5 + $0x3c4] ss:$24 sps:$4 sm:$0xff]   ;;  %v8725_v50 = vld [vmem:[#allocation5 + $0x3c0] ss:$24 sps:$4 sm:$0xff]   ;;  %v8730_v37 = vld [vmem:[#allocation5 + $0x214] ss:$24 sps:$4 sm:$0xff]  }
 0x3b5   :  { %4088 = vmatpush2.bf16.msra.mxu1 %v8674_v52  ;;  %6146 = vmatpush1.bf16.msra.mxu0 %v8677_v11  ;;  %v8733_v52 = vld [vmem:[#allocation5 + $0x394] ss:$24 sps:$4 sm:$0xff]   ;;  %v8728_v11 = vld [vmem:[#allocation5 + $0x210] ss:$24 sps:$4 sm:$0xff]  }
 0x3b6   :  { %4089 = vmatprep.subr.bf16.mxu1 %v8682_v53  ;;  %6147 = vmatprep.subr.bf16.mxu0 %v8685_v54  ;;  %v8731_v53 = vld [vmem:[#allocation5 + $0x390] ss:$24 sps:$4 sm:$0xff]   ;;  %v8736_v54 = vld [vmem:[#allocation5 + $0x1e4] ss:$24 sps:$4 sm:$0xff]  }
 0x3b9   :  { %4090 = vmatpush2.bf16.msra.mxu1 %v8680_v3  ;;  %6148 = vmatpush1.bf16.msra.mxu0 %v8683_v55  ;;  %v8739_v3 = vld [vmem:[#allocation5 + $0x364] ss:$24 sps:$4 sm:$0xff]   ;;  %v8734_v55 = vld [vmem:[#allocation5 + $0x1e0] ss:$24 sps:$4 sm:$0xff]  }
 0x3ba   :  { %4091 = vmatprep.subr.bf16.mxu1 %v8688_v61  ;;  %6149 = vmatprep.subr.bf16.mxu0 %v8691_v62  ;;  %v8737_v61 = vld [vmem:[#allocation5 + $0x360] ss:$24 sps:$4 sm:$0xff]   ;;  %v8742_v62 = vld [vmem:[#allocation5 + $0x1b4] ss:$24 sps:$4 sm:$0xff]  }
 0x3bd   :  { %4092 = vmatpush2.bf16.msra.mxu1 %v8686_v63  ;;  %6150 = vmatpush1.bf16.msra.mxu0 %v8689_v0  ;;  %v8745_v63 = vld [vmem:[#allocation5 + $0x334] ss:$24 sps:$4 sm:$0xff]   ;;  %v8740_v0 = vld [vmem:[#allocation5 + $0x1b0] ss:$24 sps:$4 sm:$0xff]  }
 0x3be   :  { %4093 = vmatprep.subr.bf16.mxu1 %v8694_v41  ;;  %6151 = vmatprep.subr.bf16.mxu0 %v8697_v4  ;;  %v8748_v41 = vld [vmem:[#allocation5 + $0x184] ss:$24 sps:$4 sm:$0xff]  }
 0x3bf   :  { %v8751_v4 = vld [vmem:[#allocation5 + $0x304] ss:$24 sps:$4 sm:$0xff]  }
 0x3c1   :  { %4094 = vmatpush2.bf16.msra.mxu1 %v8692_v7  ;;  %6152 = vmatpush1.bf16.msra.mxu0 %v8695_v8  ;;  %v8746_v7 = vld [vmem:[#allocation5 + $0x180] ss:$24 sps:$4 sm:$0xff]  }
 0x3c2   :  { %4095 = vmatprep.subr.bf16.mxu1 %v8700_v6  ;;  %6153 = vmatprep.subr.bf16.mxu0 %v8703_v24  ;;  %v8749_v8 = vld [vmem:[#allocation5 + $0x300] ss:$24 sps:$4 sm:$0xff]   ;;  %v8757_v6 = vld [vmem:[#allocation5 + $0x754] ss:$24 sps:$4 sm:$0xff]   ;;  %v4366_v24 = vcombine.high %v10074_v5, %v10074_v5 }
 0x3c5   :  { %4096 = vmatpush2.bf16.msra.mxu1 %v8698_v49  ;;  %6154 = vmatpush1.bf16.msra.mxu0 %v8701_v56  ;;  %v8755_v49 = vld [vmem:[#allocation5 + $0x750] ss:$24 sps:$4 sm:$0xff]   ;;  %v10080_v56 = vpack.c.bf16 %v10039_v16, %v10039_v16 }
 0x3c6   :  { %6155 = vmatprep.subr.bf16.mxu0 %v8706_v12  ;;  %6180 = vmatprep.subr.bf16.mxu1 %v8709_v13  ;;  %v10083_v12 = vpack.c.bf16 %v4366_v24, %v4366_v24  ;;  %v8812_v24 = vld [vmem:[#allocation5 + $0x870] ss:$24 sps:$4 sm:$0xff]  }
 0x3c8   :  { %4098 = vmatmul.mubr.bf16.vlgmr.msra.gmra.mxu1 %v2228_v17  ;;  %v3853_v22 = vpop.f32.mrf.mxu1 }
 0x3c9   :  { %v10067_v23 = vadd.f32 %v3853_v22, %v3813_v19  ;;  %6156 = vmatpush2.bf16.msra.mxu0 %v8704_v39  ;;  %6181 = vmatpush1.bf16.msra.mxu1 %v8707_v14  ;;  %v8769_v39 = vld [vmem:[#allocation5 + $0x6f4] ss:$24 sps:$4 sm:$0xff]   ;;  %v8767_v19 = vld [vmem:[#allocation5 + $0x6f0] ss:$24 sps:$4 sm:$0xff]   ;;  %v8772_v22 = vld [vmem:[#allocation5 + $0x544] ss:$24 sps:$4 sm:$0xff]  }
 0x3ca   :  { %6212 = vmatprep.mubr.bf16.mxu1 %v10064_v15  ;;  %v3855_v30 = vpop.f32.mrf.mxu1  ;;  %6157 = vmatprep.subr.bf16.mxu0 %v8712_v18  ;;  %v8764_v18 = vld [vmem:[#allocation5 + $0x570] ss:$24 sps:$4 sm:$0xff]  }
 0x3cb   :  { %v10070_v31 = vadd.f32 %v3855_v30, %v3815_v20  ;;  %6182 = vmatprep.subr.bf16.mxu1 %v8715_v21  ;;  %v8775_v20 = vld [vmem:[#allocation5 + $0x6c4] ss:$24 sps:$4 sm:$0xff]   ;;  %v8781_v30 = vld [vmem:[#allocation5 + $0x694] ss:$24 sps:$4 sm:$0xff]  }
 0x3cc   :  { %v3857_v1 = vpop.f32.mrf.mxu1 }
 0x3cd   :  { %6158 = vmatpush2.bf16.msra.mxu0 %v8710_v25  ;;  %6183 = vmatpush1.bf16.msra.mxu1 %v8713_v28  ;;  %v8773_v25 = vld [vmem:[#allocation5 + $0x6c0] ss:$24 sps:$4 sm:$0xff]   ;;  %v8778_v28 = vld [vmem:[#allocation5 + $0x514] ss:$24 sps:$4 sm:$0xff]   ;;  %v8787_v1 = vld [vmem:[#allocation5 + $0x664] ss:$24 sps:$4 sm:$0xff]  }
 0x3ce   :  { %v3858_v46 = vpop.f32.mrf.mxu1  ;;  %6159 = vmatprep.subr.bf16.mxu0 %v8718_v38  ;;  %6184 = vmatprep.subr.bf16.mxu1 %v8721_v40  ;;  %v8776_v38 = vld [vmem:[#allocation5 + $0x510] ss:$24 sps:$4 sm:$0xff]  }
 0x3cf   :  { %v8779_v40 = vld [vmem:[#allocation5 + $0x690] ss:$24 sps:$4 sm:$0xff]   ;;  %v8790_v46 = vld [vmem:[#allocation5 + $0x4b4] ss:$24 sps:$4 sm:$0xff]  }
 0x3d1   :  { %6160 = vmatpush2.bf16.msra.mxu0 %v8716_v36  ;;  %6185 = vmatpush1.bf16.msra.mxu1 %v8719_v43  ;;  %v8782_v36 = vld [vmem:[#allocation5 + $0x4e0] ss:$24 sps:$4 sm:$0xff]  }
 0x3d2   :  { %6161 = vmatprep.subr.bf16.mxu0 %v8724_v47  ;;  %6186 = vmatprep.subr.bf16.mxu1 %v8727_v48  ;;  %v8785_v43 = vld [vmem:[#allocation5 + $0x660] ss:$24 sps:$4 sm:$0xff]   ;;  %v8793_v47 = vld [vmem:[#allocation5 + $0x634] ss:$24 sps:$4 sm:$0xff]   ;;  %v8788_v48 = vld [vmem:[#allocation5 + $0x4b0] ss:$24 sps:$4 sm:$0xff]  }
 0x3d5   :  { %6162 = vmatpush2.bf16.msra.mxu0 %v8722_v51  ;;  %6187 = vmatpush1.bf16.msra.mxu1 %v8725_v50  ;;  %v8791_v51 = vld [vmem:[#allocation5 + $0x630] ss:$24 sps:$4 sm:$0xff]   ;;  %v8796_v50 = vld [vmem:[#allocation5 + $0x484] ss:$24 sps:$4 sm:$0xff]  }
 0x3d6   :  { %6163 = vmatprep.subr.bf16.mxu0 %v8730_v37  ;;  %6188 = vmatprep.subr.bf16.mxu1 %v8733_v52  ;;  %v8799_v37 = vld [vmem:[#allocation5 + $0x604] ss:$24 sps:$4 sm:$0xff]   ;;  %v8794_v52 = vld [vmem:[#allocation5 + $0x480] ss:$24 sps:$4 sm:$0xff]  }
 0x3d9   :  { %6164 = vmatpush2.bf16.msra.mxu0 %v8728_v11  ;;  %6189 = vmatpush1.bf16.msra.mxu1 %v8731_v53  ;;  %v8797_v11 = vld [vmem:[#allocation5 + $0x600] ss:$24 sps:$4 sm:$0xff]   ;;  %v8802_v53 = vld [vmem:[#allocation5 + $0x8d4] ss:$24 sps:$4 sm:$0xff]  }
 0x3da   :  { %6165 = vmatprep.subr.bf16.mxu0 %v8736_v54  ;;  %6190 = vmatprep.subr.bf16.mxu1 %v8739_v3  ;;  %v8805_v54 = vld [vmem:[#allocation5 + $0x15c] ss:$24 sps:$4 sm:$0xff]   ;;  %v8800_v3 = vld [vmem:[#allocation5 + $0x8d0] ss:$24 sps:$4 sm:$0xff]  }
 0x3dd   :  { %6166 = vmatpush2.bf16.msra.mxu0 %v8734_v55  ;;  %6191 = vmatpush1.bf16.msra.mxu1 %v8737_v61  ;;  %v8803_v55 = vld [vmem:[#allocation5 + $0x158] ss:$24 sps:$4 sm:$0xff]   ;;  %v10094_v61 = vpack.c.bf16 %v10057_v34, %v10057_v34  ;;  %v8814_v34 = vld [vmem:[#allocation5 + $0x874] ss:$24 sps:$4 sm:$0xff]  }
 0x3de   :  { %6167 = vmatprep.subr.bf16.mxu0 %v8742_v62  ;;  %6192 = vmatprep.subr.bf16.mxu1 %v8745_v63  ;;  %v8808_v62 = vld [vmem:[#allocation5 + $0x8a4] ss:$24 sps:$4 sm:$0xff]  }
 0x3df   :  { %v8811_v63 = vld [vmem:[#allocation5 + $0x12c] ss:$24 sps:$4 sm:$0xff]  }
 0x3e1   :  { %6168 = vmatpush2.bf16.msra.mxu0 %v8740_v0  ;;  %6193 = vmatpush1.bf16.msra.mxu1 %v8743_v2 }
 0x3e2   :  { %6169 = vmatprep.subr.bf16.mxu0 %v8748_v41  ;;  %6194 = vmatprep.subr.bf16.mxu1 %v8751_v4  ;;  %v8806_v41 = vld [vmem:[#allocation5 + $0x8a0] ss:$24 sps:$4 sm:$0xff]  }
 0x3e3   :  { %v8809_v4 = vld [vmem:[#allocation5 + $0x128] ss:$24 sps:$4 sm:$0xff]  }
 0x3e5   :  { %6170 = vmatpush2.bf16.msra.mxu0 %v8746_v7  ;;  %6195 = vmatpush1.bf16.msra.mxu1 %v8749_v8  ;;  %v8817_v8 = vld [vmem:[#allocation5 + $0xfc] ss:$24 sps:$4 sm:$0xff]  }
 0x3e6   :  { %6196 = vmatprep.subr.bf16.mxu1 %v8754_v9  ;;  %6221 = vmatprep.subr.bf16.mxu0 %v8757_v6 }
 0x3e8   :  { %6172 = vmatmul.mubr.bf16.vlgmr.msra.gmra.mxu0 %v10080_v56  ;;  %v3894_v10 = vpop.f32.mrf.mxu0 }
 0x3e9   :  { %v10086_v13 = vadd.f32 %v3894_v10, %v10067_v23  ;;  %6197 = vmatpush2.bf16.msra.mxu1 %v8752_v57  ;;  %6222 = vmatpush1.bf16.msra.mxu0 %v8755_v49  ;;  %v8770_v23 = vld [vmem:[#allocation5 + $0x540] ss:$24 sps:$4 sm:$0xff]   ;;  %v8820_v49 = vld [vmem:[#allocation5 + $0x844] ss:$24 sps:$4 sm:$0xff]  }
 0x3ea   :  { %6253 = vmatprep.mubr.bf16.mxu0 %v10083_v12  ;;  %v3896_v16 = vpop.f32.mrf.mxu0  ;;  %6198 = vmatprep.subr.bf16.mxu1 %v8760_v59  ;;  %v8815_v57 = vld [vmem:[#allocation5 + $0xf8] ss:$24 sps:$4 sm:$0xff]   ;;  %v8823_v59 = vld [vmem:[#allocation5 + $0xcc] ss:$24 sps:$4 sm:$0xff]  }
 0x3eb   :  { %v10090_v14 = vadd.f32 %v3896_v16, %v10070_v31  ;;  %6223 = vmatprep.subr.bf16.mxu0 %v8763_v45  ;;  %v8784_v31 = vld [vmem:[#allocation5 + $0x4e4] ss:$24 sps:$4 sm:$0xff]   ;;  %v8818_v10 = vld [vmem:[#allocation5 + $0x840] ss:$24 sps:$4 sm:$0xff]   ;;  %v8824_v16 = vld [vmem:[#allocation5 + $0x810] ss:$24 sps:$4 sm:$0xff]  }
 0x3ec   :  { %v3898_v17 = vpop.f32.mrf.mxu0 }
 0x3ed   :  { %6199 = vmatpush2.bf16.msra.mxu1 %v8758_v27  ;;  %6224 = vmatpush1.bf16.msra.mxu0 %v8761_v32  ;;  %v8826_v27 = vld [vmem:[#allocation5 + $0x814] ss:$24 sps:$4 sm:$0xff]   ;;  %v8830_v17 = vld [vmem:[#allocation5 + $0x7e0] ss:$24 sps:$4 sm:$0xff]  }
 0x3ee   :  { %v3899_v21 = vpop.f32.mrf.mxu0  ;;  %6200 = vmatprep.subr.bf16.mxu1 %v8766_v26  ;;  %6225 = vmatprep.subr.bf16.mxu0 %v8769_v39  ;;  %v8829_v32 = vld [vmem:[#allocation5 + $0x9c] ss:$24 sps:$4 sm:$0xff]   ;;  %v8827_v26 = vld [vmem:[#allocation5 + $0x98] ss:$24 sps:$4 sm:$0xff]  }
 0x3ef   :  { %v8832_v39 = vld [vmem:[#allocation5 + $0x7e4] ss:$24 sps:$4 sm:$0xff]  }
 0x3f0   :  { %v8841_v21 = vld [vmem:[#allocation5 + $0x3c] ss:$24 sps:$4 sm:$0xff]  }
 0x3f1   :  { %6201 = vmatpush2.bf16.msra.mxu1 %v8764_v18  ;;  %6226 = vmatpush1.bf16.msra.mxu0 %v8767_v19  ;;  %v8833_v18 = vld [vmem:[#allocation5 + $0x68] ss:$24 sps:$4 sm:$0xff]   ;;  %v8838_v19 = vld [vmem:[#allocation5 + $0x7b4] ss:$24 sps:$4 sm:$0xff]  }
 0x3f2   :  { %6202 = vmatprep.subr.bf16.mxu1 %v8772_v22  ;;  %6227 = vmatprep.subr.bf16.mxu0 %v8775_v20  ;;  %v8836_v22 = vld [vmem:[#allocation5 + $0x7b0] ss:$24 sps:$4 sm:$0xff]  }
 0x3f3   :  { %v8839_v20 = vld [vmem:[#allocation5 + $0x38] ss:$24 sps:$4 sm:$0xff]  }
 0x3f5   :  { %6203 = vmatpush2.bf16.msra.mxu1 %v8770_v23  ;;  %6228 = vmatpush1.bf16.msra.mxu0 %v8773_v25  ;;  %v8844_v23 = vld [vmem:[#allocation5 + $0x784] ss:$24 sps:$4 sm:$0xff]  }
 0x3f6   :  { %6204 = vmatprep.subr.bf16.mxu1 %v8778_v28  ;;  %6229 = vmatprep.subr.bf16.mxu0 %v8781_v30  ;;  %v8847_v25 = vld [vmem:[#allocation5 + $0xc] ss:$24 sps:$4 sm:$0xff]   ;;  %v8842_v28 = vld [vmem:[#allocation5 + $0x780] ss:$24 sps:$4 sm:$0xff]  }
 0x3f7   :  { %v8845_v30 = vld [vmem:[#allocation5 + $0x8] ss:$24 sps:$4 sm:$0xff]  }
 0x3f9   :  { %6205 = vmatpush2.bf16.msra.mxu1 %v8776_v38  ;;  %6230 = vmatpush1.bf16.msra.mxu0 %v8779_v40  ;;  %v8850_v38 = vld [vmem:[#allocation5 + $0x2dc] ss:$24 sps:$4 sm:$0xff]  }
 0x3fa   :  { %6206 = vmatprep.subr.bf16.mxu1 %v8784_v31  ;;  %6231 = vmatprep.subr.bf16.mxu0 %v8787_v1  ;;  %v8853_v40 = vld [vmem:[#allocation5 + $0x45c] ss:$24 sps:$4 sm:$0xff]   ;;  %v8848_v31 = vld [vmem:[#allocation5 + $0x2d8] ss:$24 sps:$4 sm:$0xff]  }
 0x3fb   :  { %v8851_v1 = vld [vmem:[#allocation5 + $0x458] ss:$24 sps:$4 sm:$0xff]  }
 0x3fd   :  { %6207 = vmatpush2.bf16.msra.mxu1 %v8782_v36  ;;  %6232 = vmatpush1.bf16.msra.mxu0 %v8785_v43  ;;  %v10106_v36 = vpack.c.bf16 %v10074_v5, %v10074_v5  ;;  %v8856_v43 = vld [vmem:[#allocation5 + $0x2ac] ss:$24 sps:$4 sm:$0xff]   ;;  %v8862_v5 = vld [vmem:[#allocation5 + $0x27c] ss:$24 sps:$4 sm:$0xff]  }
 0x3fe   :  { %6208 = vmatprep.subr.bf16.mxu1 %v8790_v46  ;;  %6233 = vmatprep.subr.bf16.mxu0 %v8793_v47  ;;  %v8859_v46 = vld [vmem:[#allocation5 + $0x42c] ss:$24 sps:$4 sm:$0xff]  }
 0x401   :  { %6209 = vmatpush2.bf16.msra.mxu1 %v8788_v48  ;;  %6234 = vmatpush1.bf16.msra.mxu0 %v8791_v51  ;;  %v8854_v51 = vld [vmem:[#allocation5 + $0x2a8] ss:$24 sps:$4 sm:$0xff]  }
 0x402   :  { %6210 = vmatprep.subr.bf16.mxu1 %v8796_v50  ;;  %6235 = vmatprep.subr.bf16.mxu0 %v8799_v37  ;;  %v8857_v50 = vld [vmem:[#allocation5 + $0x428] ss:$24 sps:$4 sm:$0xff]  }
 0x405   :  { %6211 = vmatpush2.bf16.msra.mxu1 %v8794_v52  ;;  %6236 = vmatpush1.bf16.msra.mxu0 %v8797_v11  ;;  %v8865_v52 = vld [vmem:[#allocation5 + $0x3fc] ss:$24 sps:$4 sm:$0xff]  }
 0x406   :  { %6237 = vmatprep.subr.bf16.mxu0 %v8802_v53  ;;  %6262 = vmatprep.subr.bf16.mxu1 %v8805_v54  ;;  %v8860_v54 = vld [vmem:[#allocation5 + $0x278] ss:$24 sps:$4 sm:$0xff]  }
 0x408   :  { %6213 = vmatmul.mubr.bf16.vlgmr.msra.gmra.mxu1 %v10094_v61  ;;  %v3935_v0 = vpop.f32.mrf.mxu1 }
 0x409   :  { %v10098_v2 = vadd.f32 %v3935_v0, %v10086_v13  ;;  %6238 = vmatpush2.bf16.msra.mxu0 %v8800_v3  ;;  %6263 = vmatpush1.bf16.msra.mxu1 %v8803_v55  ;;  %v8821_v13 = vld [vmem:[#allocation5 + $0xc8] ss:$24 sps:$4 sm:$0xff]   ;;  %v8863_v3 = vld [vmem:[#allocation5 + $0x3f8] ss:$24 sps:$4 sm:$0xff]  }
 0x40a   :  { %6294 = vmatprep.mubr.bf16.mxu1 %v10045_v35  ;;  %v3937_v7 = vpop.f32.mrf.mxu1  ;;  %6239 = vmatprep.subr.bf16.mxu0 %v8808_v62  ;;  %v8868_v62 = vld [vmem:[#allocation5 + $0x24c] ss:$24 sps:$4 sm:$0xff]   ;;  %v8866_v0 = vld [vmem:[#allocation5 + $0x248] ss:$24 sps:$4 sm:$0xff]  }
 0x40b   :  { %v10102_v9 = vadd.f32 %v3937_v7, %v10090_v14  ;;  %6264 = vmatprep.subr.bf16.mxu1 %v8811_v63  ;;  %v8835_v14 = vld [vmem:[#allocation5 + $0x6c] ss:$24 sps:$4 sm:$0xff]   ;;  %v8872_v7 = vld [vmem:[#allocation5 + $0x218] ss:$24 sps:$4 sm:$0xff]  }
 0x40c   :  { %v3939_v6 = vpop.f32.mrf.mxu1  ;;  %v8871_v63 = vld [vmem:[#allocation5 + $0x3cc] ss:$24 sps:$4 sm:$0xff]  }
 0x40d   :  { %6240 = vmatpush2.bf16.msra.mxu0 %v8806_v41  ;;  %6265 = vmatpush1.bf16.msra.mxu1 %v8809_v4  ;;  %v8874_v41 = vld [vmem:[#allocation5 + $0x21c] ss:$24 sps:$4 sm:$0xff]   ;;  %v8878_v6 = vld [vmem:[#allocation5 + $0x1e8] ss:$24 sps:$4 sm:$0xff]  }
 0x40e   :  { %6241 = vmatprep.subr.bf16.mxu0 %v8814_v34  ;;  %6266 = vmatprep.subr.bf16.mxu1 %v8817_v8  ;;  %v3940_v45 = vpop.f32.mrf.mxu1  ;;  %v8877_v4 = vld [vmem:[#allocation5 + $0x39c] ss:$24 sps:$4 sm:$0xff]   ;;  %v8875_v34 = vld [vmem:[#allocation5 + $0x398] ss:$24 sps:$4 sm:$0xff]   ;;  %v8880_v8 = vld [vmem:[#allocation5 + $0x1ec] ss:$24 sps:$4 sm:$0xff]  }
 0x40f   :  { %v8887_v45 = vld [vmem:[#allocation5 + $0x338] ss:$24 sps:$4 sm:$0xff]  }
 0x411   :  { %6242 = vmatpush2.bf16.msra.mxu0 %v8812_v24  ;;  %6267 = vmatpush1.bf16.msra.mxu1 %v8815_v57  ;;  %v8881_v24 = vld [vmem:[#allocation5 + $0x368] ss:$24 sps:$4 sm:$0xff]   ;;  %v8886_v57 = vld [vmem:[#allocation5 + $0x1bc] ss:$24 sps:$4 sm:$0xff]  }
 0x412   :  { %6243 = vmatprep.subr.bf16.mxu0 %v8820_v49  ;;  %6268 = vmatprep.subr.bf16.mxu1 %v8823_v59  ;;  %v8889_v49 = vld [vmem:[#allocation5 + $0x33c] ss:$24 sps:$4 sm:$0xff]   ;;  %v8884_v59 = vld [vmem:[#allocation5 + $0x1b8] ss:$24 sps:$4 sm:$0xff]  }
 0x415   :  { %6244 = vmatpush2.bf16.msra.mxu0 %v8818_v10  ;;  %6269 = vmatpush1.bf16.msra.mxu1 %v8821_v13  ;;  %v8892_v10 = vld [vmem:[#allocation5 + $0x18c] ss:$24 sps:$4 sm:$0xff]  }
 0x416   :  { %6245 = vmatprep.subr.bf16.mxu0 %v8826_v27  ;;  %6270 = vmatprep.subr.bf16.mxu1 %v8829_v32  ;;  %v8895_v13 = vld [vmem:[#allocation5 + $0x30c] ss:$24 sps:$4 sm:$0xff]   ;;  %v8890_v27 = vld [vmem:[#allocation5 + $0x188] ss:$24 sps:$4 sm:$0xff]  }
 0x417   :  { %v8893_v32 = vld [vmem:[#allocation5 + $0x308] ss:$24 sps:$4 sm:$0xff]  }
 0x419   :  { %6246 = vmatpush2.bf16.msra.mxu0 %v8824_v16  ;;  %6271 = vmatpush1.bf16.msra.mxu1 %v8827_v26  ;;  %v8898_v16 = vld [vmem:[#allocation5 + $0x5dc] ss:$24 sps:$4 sm:$0xff]  }
 0x41a   :  { %6247 = vmatprep.subr.bf16.mxu0 %v8832_v39  ;;  %6272 = vmatprep.subr.bf16.mxu1 %v8835_v14  ;;  %v8901_v26 = vld [vmem:[#allocation5 + $0x75c] ss:$24 sps:$4 sm:$0xff]   ;;  %v8896_v39 = vld [vmem:[#allocation5 + $0x5d8] ss:$24 sps:$4 sm:$0xff]  }
 0x41b   :  { %v8899_v14 = vld [vmem:[#allocation5 + $0x758] ss:$24 sps:$4 sm:$0xff]  }
 0x41d   :  { %6248 = vmatpush2.bf16.msra.mxu0 %v8830_v17  ;;  %6273 = vmatpush1.bf16.msra.mxu1 %v8833_v18  ;;  %v8904_v17 = vld [vmem:[#allocation5 + $0x5ac] ss:$24 sps:$4 sm:$0xff]  }
 0x41e   :  { %6249 = vmatprep.subr.bf16.mxu0 %v8838_v19  ;;  %6274 = vmatprep.subr.bf16.mxu1 %v8841_v21  ;;  %v8907_v18 = vld [vmem:[#allocation5 + $0x72c] ss:$24 sps:$4 sm:$0xff]  }
 0x421   :  { %6250 = vmatpush2.bf16.msra.mxu0 %v8836_v22  ;;  %6275 = vmatpush1.bf16.msra.mxu1 %v8839_v20  ;;  %v8902_v22 = vld [vmem:[#allocation5 + $0x5a8] ss:$24 sps:$4 sm:$0xff]  }
 0x422   :  { %6251 = vmatprep.subr.bf16.mxu0 %v8844_v23  ;;  %6276 = vmatprep.subr.bf16.mxu1 %v8847_v25  ;;  %v8905_v20 = vld [vmem:[#allocation5 + $0x728] ss:$24 sps:$4 sm:$0xff]   ;;  %v8910_v25 = vld [vmem:[#allocation5 + $0x57c] ss:$24 sps:$4 sm:$0xff]  }
 0x425   :  { %6252 = vmatpush2.bf16.msra.mxu0 %v8842_v28  ;;  %6277 = vmatpush1.bf16.msra.mxu1 %v8845_v30  ;;  %v8913_v28 = vld [vmem:[#allocation5 + $0x6fc] ss:$24 sps:$4 sm:$0xff]  }
 0x426   :  { %6278 = vmatprep.subr.bf16.mxu1 %v8850_v38  ;;  %6303 = vmatprep.subr.bf16.mxu0 %v8853_v40  ;;  %v8908_v40 = vld [vmem:[#allocation5 + $0x578] ss:$24 sps:$4 sm:$0xff]  }
 0x428   :  { %v3976_v47 = vpop.f32.mrf.mxu0  ;;  %6254 = vmatmul.mubr.bf16.vlgmr.msra.gmra.mxu0 %v10106_v36 }
 0x429   :  { %v10110_v48 = vadd.f32 %v3976_v47, %v10098_v2  ;;  %6279 = vmatpush2.bf16.msra.mxu1 %v8848_v31  ;;  %6304 = vmatpush1.bf16.msra.mxu0 %v8851_v1  ;;  %v8869_v2 = vld [vmem:[#allocation5 + $0x3c8] ss:$24 sps:$4 sm:$0xff]   ;;  %v8911_v31 = vld [vmem:[#allocation5 + $0x6f8] ss:$24 sps:$4 sm:$0xff]  }
 0x42a   :  { %6335 = vmatprep.mubr.bf16.mxu0 %v10064_v15  ;;  %v3978_v37 = vpop.f32.mrf.mxu0  ;;  %6280 = vmatprep.subr.bf16.mxu1 %v8856_v43  ;;  %v8916_v43 = vld [vmem:[#allocation5 + $0x54c] ss:$24 sps:$4 sm:$0xff]   ;;  %v8914_v47 = vld [vmem:[#allocation5 + $0x548] ss:$24 sps:$4 sm:$0xff]  }
 0x42b   :  { %v10114_v11 = vadd.f32 %v3978_v37, %v10102_v9  ;;  %6305 = vmatprep.subr.bf16.mxu0 %v8859_v46  ;;  %v8883_v9 = vld [vmem:[#allocation5 + $0x36c] ss:$24 sps:$4 sm:$0xff]   ;;  %v8920_v37 = vld [vmem:[#allocation5 + $0x518] ss:$24 sps:$4 sm:$0xff]  }
 0x42c   :  { %v3980_v53 = vpop.f32.mrf.mxu0  ;;  %v8919_v46 = vld [vmem:[#allocation5 + $0x6cc] ss:$24 sps:$4 sm:$0xff]  }
 0x42d   :  { %6281 = vmatpush2.bf16.msra.mxu1 %v8854_v51  ;;  %6306 = vmatpush1.bf16.msra.mxu0 %v8857_v50  ;;  %v8922_v51 = vld [vmem:[#allocation5 + $0x51c] ss:$24 sps:$4 sm:$0xff]   ;;  %v8926_v53 = vld [vmem:[#allocation5 + $0x4e8] ss:$24 sps:$4 sm:$0xff]  }
 0x42e   :  { %v3981_v55 = vpop.f32.mrf.mxu0  ;;  %6282 = vmatprep.subr.bf16.mxu1 %v8862_v5  ;;  %6307 = vmatprep.subr.bf16.mxu0 %v8865_v52  ;;  %v8925_v50 = vld [vmem:[#allocation5 + $0x69c] ss:$24 sps:$4 sm:$0xff]   ;;  %v8923_v5 = vld [vmem:[#allocation5 + $0x698] ss:$24 sps:$4 sm:$0xff]   ;;  %v8928_v52 = vld [vmem:[#allocation5 + $0x4ec] ss:$24 sps:$4 sm:$0xff]  }
 0x42f   :  { %v8937_v55 = vld [vmem:[#allocation5 + $0x63c] ss:$24 sps:$4 sm:$0xff]  }
 0x431   :  { %6283 = vmatpush2.bf16.msra.mxu1 %v8860_v54  ;;  %6308 = vmatpush1.bf16.msra.mxu0 %v8863_v3  ;;  %v8929_v54 = vld [vmem:[#allocation5 + $0x668] ss:$24 sps:$4 sm:$0xff]   ;;  %v8934_v3 = vld [vmem:[#allocation5 + $0x4bc] ss:$24 sps:$4 sm:$0xff]  }
 0x432   :  { %6284 = vmatprep.subr.bf16.mxu1 %v8868_v62  ;;  %6309 = vmatprep.subr.bf16.mxu0 %v8871_v63  ;;  %v8932_v62 = vld [vmem:[#allocation5 + $0x4b8] ss:$24 sps:$4 sm:$0xff]  }
 0x433   :  { %v8935_v63 = vld [vmem:[#allocation5 + $0x638] ss:$24 sps:$4 sm:$0xff]  }
 0x435   :  { %6285 = vmatpush2.bf16.msra.mxu1 %v8866_v0  ;;  %6310 = vmatpush1.bf16.msra.mxu0 %v8869_v2  ;;  %v8940_v0 = vld [vmem:[#allocation5 + $0x48c] ss:$24 sps:$4 sm:$0xff]  }
 0x436   :  { %6286 = vmatprep.subr.bf16.mxu1 %v8874_v41  ;;  %6311 = vmatprep.subr.bf16.mxu0 %v8877_v4  ;;  %v8943_v2 = vld [vmem:[#allocation5 + $0x60c] ss:$24 sps:$4 sm:$0xff]   ;;  %v8938_v41 = vld [vmem:[#allocation5 + $0x488] ss:$24 sps:$4 sm:$0xff]  }
 0x437   :  { %v8941_v4 = vld [vmem:[#allocation5 + $0x608] ss:$24 sps:$4 sm:$0xff]  }
 0x439   :  { %6287 = vmatpush2.bf16.msra.mxu1 %v8872_v7  ;;  %6312 = vmatpush1.bf16.msra.mxu0 %v8875_v34  ;;  %v8946_v7 = vld [vmem:[#allocation5 + $0x8dc] ss:$24 sps:$4 sm:$0xff]  }
 0x43a   :  { %6288 = vmatprep.subr.bf16.mxu1 %v8880_v8  ;;  %6313 = vmatprep.subr.bf16.mxu0 %v8883_v9  ;;  %v8949_v34 = vld [vmem:[#allocation5 + $0x164] ss:$24 sps:$4 sm:$0xff]   ;;  %v8944_v8 = vld [vmem:[#allocation5 + $0x8d8] ss:$24 sps:$4 sm:$0xff]  }
 0x43b   :  { %v8947_v9 = vld [vmem:[#allocation5 + $0x160] ss:$24 sps:$4 sm:$0xff]  }
 0x43d   :  { %6289 = vmatpush2.bf16.msra.mxu1 %v8878_v6  ;;  %6314 = vmatpush1.bf16.msra.mxu0 %v8881_v24  ;;  %v8952_v6 = vld [vmem:[#allocation5 + $0x8ac] ss:$24 sps:$4 sm:$0xff]  }
 0x43e   :  { %6290 = vmatprep.subr.bf16.mxu1 %v8886_v57  ;;  %6315 = vmatprep.subr.bf16.mxu0 %v8889_v49  ;;  %v8955_v24 = vld [vmem:[#allocation5 + $0x134] ss:$24 sps:$4 sm:$0xff]  }
 0x441   :  { %6291 = vmatpush2.bf16.msra.mxu1 %v8884_v59  ;;  %6316 = vmatpush1.bf16.msra.mxu0 %v8887_v45  ;;  %v8950_v59 = vld [vmem:[#allocation5 + $0x8a8] ss:$24 sps:$4 sm:$0xff]  }
 0x442   :  { %6292 = vmatprep.subr.bf16.mxu1 %v8892_v10  ;;  %6317 = vmatprep.subr.bf16.mxu0 %v8895_v13  ;;  %v8953_v45 = vld [vmem:[#allocation5 + $0x130] ss:$24 sps:$4 sm:$0xff]   ;;  %v8958_v13 = vld [vmem:[#allocation5 + $0x87c] ss:$24 sps:$4 sm:$0xff]  }
 0x445   :  { %6293 = vmatpush2.bf16.msra.mxu1 %v8890_v27  ;;  %6318 = vmatpush1.bf16.msra.mxu0 %v8893_v32  ;;  %v8961_v27 = vld [vmem:[#allocation5 + $0x104] ss:$24 sps:$4 sm:$0xff]  }
 0x446   :  { %6319 = vmatprep.subr.bf16.mxu0 %v8898_v16  ;;  %6344 = vmatprep.subr.bf16.mxu1 %v8901_v26  ;;  %v8956_v26 = vld [vmem:[#allocation5 + $0x878] ss:$24 sps:$4 sm:$0xff]  }
 0x448   :  { %v4017_v19 = vpop.f32.mrf.mxu1  ;;  %6295 = vmatmul.mubr.bf16.vlgmr.msra.gmra.mxu1 %v10080_v56 }
 0x449   :  { %v10118_v21 = vadd.f32 %v4017_v19, %v10110_v48  ;;  %6320 = vmatpush2.bf16.msra.mxu0 %v8896_v39  ;;  %6345 = vmatpush1.bf16.msra.mxu1 %v8899_v14  ;;  %v8917_v48 = vld [vmem:[#allocation5 + $0x6c8] ss:$24 sps:$4 sm:$0xff]  }
 0x44a   :  { %6376 = vmatprep.mubr.bf16.mxu1 %v10083_v12  ;;  %v4019_v23 = vpop.f32.mrf.mxu1  ;;  %6321 = vmatprep.subr.bf16.mxu0 %v8904_v17  ;;  %v8959_v39 = vld [vmem:[#allocation5 + $0x100] ss:$24 sps:$4 sm:$0xff]   ;;  %v8964_v17 = vld [vmem:[#allocation5 + $0x84c] ss:$24 sps:$4 sm:$0xff]   ;;  %v8965_v19 = vld [vmem:[#allocation5 + $0xd0] ss:$24 sps:$4 sm:$0xff]  }
 0x44b   :  { %v10122_v30 = vadd.f32 %v4019_v23, %v10114_v11  ;;  %6346 = vmatprep.subr.bf16.mxu1 %v8907_v18  ;;  %v8931_v11 = vld [vmem:[#allocation5 + $0x66c] ss:$24 sps:$4 sm:$0xff]   ;;  %v8971_v23 = vld [vmem:[#allocation5 + $0xa0] ss:$24 sps:$4 sm:$0xff]  }
 0x44c   :  { %v4021_v38 = vpop.f32.mrf.mxu1  ;;  %v8967_v18 = vld [vmem:[#allocation5 + $0xd4] ss:$24 sps:$4 sm:$0xff]  }
 0x44d   :  { %6322 = vmatpush2.bf16.msra.mxu0 %v8902_v22  ;;  %6347 = vmatpush1.bf16.msra.mxu1 %v8905_v20  ;;  %v8973_v22 = vld [vmem:[#allocation5 + $0xa4] ss:$24 sps:$4 sm:$0xff]   ;;  %v8968_v20 = vld [vmem:[#allocation5 + $0x818] ss:$24 sps:$4 sm:$0xff]  }
 0x44e   :  { %v4022_v1 = vpop.f32.mrf.mxu1  ;;  %6323 = vmatprep.subr.bf16.mxu0 %v8910_v25  ;;  %6348 = vmatprep.subr.bf16.mxu1 %v8913_v28  ;;  %v8976_v25 = vld [vmem:[#allocation5 + $0x7ec] ss:$24 sps:$4 sm:$0xff]   ;;  %v8977_v38 = vld [vmem:[#allocation5 + $0x70] ss:$24 sps:$4 sm:$0xff]  }
 0x44f   :  { %v8979_v28 = vld [vmem:[#allocation5 + $0x74] ss:$24 sps:$4 sm:$0xff]   ;;  %v8980_v1 = vld [vmem:[#allocation5 + $0x7b8] ss:$24 sps:$4 sm:$0xff]  }
 0x451   :  { %6324 = vmatpush2.bf16.msra.mxu0 %v8908_v40  ;;  %6349 = vmatpush1.bf16.msra.mxu1 %v8911_v31  ;;  %v8982_v40 = vld [vmem:[#allocation5 + $0x7bc] ss:$24 sps:$4 sm:$0xff]  }
 0x452   :  { %6325 = vmatprep.subr.bf16.mxu0 %v8916_v43  ;;  %6350 = vmatprep.subr.bf16.mxu1 %v8919_v46  ;;  %v8985_v31 = vld [vmem:[#allocation5 + $0x44] ss:$24 sps:$4 sm:$0xff]   ;;  %v8983_v43 = vld [vmem:[#allocation5 + $0x40] ss:$24 sps:$4 sm:$0xff]  }
 0x453   :  { %v8988_v46 = vld [vmem:[#allocation5 + $0x78c] ss:$24 sps:$4 sm:$0xff]  }
 0x455   :  { %6326 = vmatpush2.bf16.msra.mxu0 %v8914_v47  ;;  %6351 = vmatpush1.bf16.msra.mxu1 %v8917_v48  ;;  %v8991_v47 = vld [vmem:[#allocation5 + $0x14] ss:$24 sps:$4 sm:$0xff]   ;;  %v8986_v48 = vld [vmem:[#allocation5 + $0x788] ss:$24 sps:$4 sm:$0xff]  }
 0x456   :  { %6327 = vmatprep.subr.bf16.mxu0 %v8922_v51  ;;  %6352 = vmatprep.subr.bf16.mxu1 %v8925_v50  ;;  %v8989_v51 = vld [vmem:[#allocation5 + $0x10] ss:$24 sps:$4 sm:$0xff]   ;;  %v8994_v50 = vld [vmem:[#allocation5 + $0x2e4] ss:$24 sps:$4 sm:$0xff]  }
 0x459   :  { %6328 = vmatpush2.bf16.msra.mxu0 %v8920_v37  ;;  %6353 = vmatpush1.bf16.msra.mxu1 %v8923_v5  ;;  %v8997_v37 = vld [vmem:[#allocation5 + $0x464] ss:$24 sps:$4 sm:$0xff]   ;;  %v8992_v5 = vld [vmem:[#allocation5 + $0x2e0] ss:$24 sps:$4 sm:$0xff]  }
 0x45a   :  { %6329 = vmatprep.subr.bf16.mxu0 %v8928_v52  ;;  %6354 = vmatprep.subr.bf16.mxu1 %v8931_v11  ;;  %v8995_v52 = vld [vmem:[#allocation5 + $0x460] ss:$24 sps:$4 sm:$0xff]   ;;  %v9000_v11 = vld [vmem:[#allocation5 + $0x2b4] ss:$24 sps:$4 sm:$0xff]  }
 0x45d   :  { %6330 = vmatpush2.bf16.msra.mxu0 %v8926_v53  ;;  %6355 = vmatpush1.bf16.msra.mxu1 %v8929_v54  ;;  %v9003_v53 = vld [vmem:[#allocation5 + $0x434] ss:$24 sps:$4 sm:$0xff]  }
 0x45e   :  { %6331 = vmatprep.subr.bf16.mxu0 %v8934_v3  ;;  %6356 = vmatprep.subr.bf16.mxu1 %v8937_v55  ;;  %v8998_v55 = vld [vmem:[#allocation5 + $0x2b0] ss:$24 sps:$4 sm:$0xff]  }
 0x461   :  { %6332 = vmatpush2.bf16.msra.mxu0 %v8932_v62  ;;  %6357 = vmatpush1.bf16.msra.mxu1 %v8935_v63  ;;  %v9001_v62 = vld [vmem:[#allocation5 + $0x430] ss:$24 sps:$4 sm:$0xff]  }
 0x462   :  { %6333 = vmatprep.subr.bf16.mxu0 %v8940_v0  ;;  %6358 = vmatprep.subr.bf16.mxu1 %v8943_v2  ;;  %v9006_v0 = vld [vmem:[#allocation5 + $0x284] ss:$24 sps:$4 sm:$0xff]  }
 0x463   :  { %v9009_v2 = vld [vmem:[#allocation5 + $0x404] ss:$24 sps:$4 sm:$0xff]  }
 0x465   :  { %6334 = vmatpush2.bf16.msra.mxu0 %v8938_v41  ;;  %6359 = vmatpush1.bf16.msra.mxu1 %v8941_v4 }
 0x466   :  { %6360 = vmatprep.subr.bf16.mxu1 %v8946_v7  ;;  %6385 = vmatprep.subr.bf16.mxu0 %v8949_v34  ;;  %v9004_v7 = vld [vmem:[#allocation5 + $0x280] ss:$24 sps:$4 sm:$0xff]  }
 0x467   :  { %v9007_v34 = vld [vmem:[#allocation5 + $0x400] ss:$24 sps:$4 sm:$0xff]  }
 0x468   :  { %v4058_v57 = vpop.f32.mrf.mxu0  ;;  %6336 = vmatmul.mubr.bf16.vlgmr.msra.gmra.mxu0 %v10094_v61 }
 0x469   :  { %v10126_v49 = vadd.f32 %v4058_v57, %v10118_v21  ;;  %6361 = vmatpush2.bf16.msra.mxu1 %v8944_v8  ;;  %6386 = vmatpush1.bf16.msra.mxu0 %v8947_v9  ;;  %v8970_v21 = vld [vmem:[#allocation5 + $0x81c] ss:$24 sps:$4 sm:$0xff]  }
 0x46a   :  { %6417 = vmatprep.mubr.bf16.mxu0 %v10045_v35  ;;  %v4060_v10 = vpop.f32.mrf.mxu0  ;;  %6362 = vmatprep.subr.bf16.mxu1 %v8952_v6  ;;  %v8962_v35 = vld [vmem:[#allocation5 + $0x848] ss:$24 sps:$4 sm:$0xff]   ;;  %v9012_v9 = vld [vmem:[#allocation5 + $0x254] ss:$24 sps:$4 sm:$0xff]   ;;  %v9018_v57 = vld [vmem:[#allocation5 + $0x224] ss:$24 sps:$4 sm:$0xff]  }
 0x46b   :  { %v10130_v32 = vadd.f32 %v4060_v10, %v10122_v30  ;;  %6387 = vmatprep.subr.bf16.mxu0 %v8955_v24  ;;  %v8974_v30 = vld [vmem:[#allocation5 + $0x7e8] ss:$24 sps:$4 sm:$0xff]   ;;  %v9015_v6 = vld [vmem:[#allocation5 + $0x3d4] ss:$24 sps:$4 sm:$0xff]  }
 0x46c   :  { %v4062_v16 = vpop.f32.mrf.mxu0  ;;  %v9013_v24 = vld [vmem:[#allocation5 + $0x3d0] ss:$24 sps:$4 sm:$0xff]   ;;  %v9024_v10 = vld [vmem:[#allocation5 + $0x1f4] ss:$24 sps:$4 sm:$0xff]  }
 0x46d   :  { %6363 = vmatpush2.bf16.msra.mxu1 %v8950_v59  ;;  %6388 = vmatpush1.bf16.msra.mxu0 %v8953_v45  ;;  %v9016_v59 = vld [vmem:[#allocation5 + $0x220] ss:$24 sps:$4 sm:$0xff]   ;;  %v9030_v16 = vld [vmem:[#allocation5 + $0x1c4] ss:$24 sps:$4 sm:$0xff]  }
 0x46e   :  { %v4063_v14 = vpop.f32.mrf.mxu0  ;;  %6364 = vmatprep.subr.bf16.mxu1 %v8958_v13  ;;  %6389 = vmatprep.subr.bf16.mxu0 %v8961_v27  ;;  %v9019_v45 = vld [vmem:[#allocation5 + $0x3a0] ss:$24 sps:$4 sm:$0xff]   ;;  %v9027_v13 = vld [vmem:[#allocation5 + $0x374] ss:$24 sps:$4 sm:$0xff]   ;;  %v9022_v27 = vld [vmem:[#allocation5 + $0x1f0] ss:$24 sps:$4 sm:$0xff]  }
 0x46f   :  { %v9031_v14 = vld [vmem:[#allocation5 + $0x340] ss:$24 sps:$4 sm:$0xff]  }
 0x471   :  { %6365 = vmatpush2.bf16.msra.mxu1 %v8956_v26  ;;  %6390 = vmatpush1.bf16.msra.mxu0 %v8959_v39  ;;  %v9033_v26 = vld [vmem:[#allocation5 + $0x344] ss:$24 sps:$4 sm:$0xff]   ;;  %v9028_v39 = vld [vmem:[#allocation5 + $0x1c0] ss:$24 sps:$4 sm:$0xff]  }
 0x472   :  { %6366 = vmatprep.subr.bf16.mxu1 %v8964_v17  ;;  %6391 = vmatprep.subr.bf16.mxu0 %v8967_v18  ;;  %v9036_v17 = vld [vmem:[#allocation5 + $0x194] ss:$24 sps:$4 sm:$0xff]  }
 0x473   :  { %v9039_v18 = vld [vmem:[#allocation5 + $0x314] ss:$24 sps:$4 sm:$0xff]  }
 0x475   :  { %6367 = vmatpush2.bf16.msra.mxu1 %v8962_v35  ;;  %6392 = vmatpush1.bf16.msra.mxu0 %v8965_v19  ;;  %v9034_v35 = vld [vmem:[#allocation5 + $0x190] ss:$24 sps:$4 sm:$0xff]  }
 0x476   :  { %6368 = vmatprep.subr.bf16.mxu1 %v8970_v21  ;;  %6393 = vmatprep.subr.bf16.mxu0 %v8973_v22  ;;  %v9037_v19 = vld [vmem:[#allocation5 + $0x310] ss:$24 sps:$4 sm:$0xff]   ;;  %v9042_v21 = vld [vmem:[#allocation5 + $0x5e4] ss:$24 sps:$4 sm:$0xff]  }
 0x477   :  { %v9045_v22 = vld [vmem:[#allocation5 + $0x764] ss:$24 sps:$4 sm:$0xff]  }
 0x479   :  { %6369 = vmatpush2.bf16.msra.mxu1 %v8968_v20  ;;  %6394 = vmatpush1.bf16.msra.mxu0 %v8971_v23  ;;  %v9040_v20 = vld [vmem:[#allocation5 + $0x5e0] ss:$24 sps:$4 sm:$0xff]  }
 0x47a   :  { %6370 = vmatprep.subr.bf16.mxu1 %v8976_v25  ;;  %6395 = vmatprep.subr.bf16.mxu0 %v8979_v28  ;;  %v9043_v23 = vld [vmem:[#allocation5 + $0x760] ss:$24 sps:$4 sm:$0xff]   ;;  %v9048_v25 = vld [vmem:[#allocation5 + $0x5b4] ss:$24 sps:$4 sm:$0xff]  }
 0x47b   :  { %v9051_v28 = vld [vmem:[#allocation5 + $0x734] ss:$24 sps:$4 sm:$0xff]  }
 0x47d   :  { %6371 = vmatpush2.bf16.msra.mxu1 %v8974_v30  ;;  %6396 = vmatpush1.bf16.msra.mxu0 %v8977_v38  ;;  %v9046_v38 = vld [vmem:[#allocation5 + $0x5b0] ss:$24 sps:$4 sm:$0xff]  }
 0x47e   :  { %6372 = vmatprep.subr.bf16.mxu1 %v8982_v40  ;;  %6397 = vmatprep.subr.bf16.mxu0 %v8985_v31  ;;  %v9049_v40 = vld [vmem:[#allocation5 + $0x730] ss:$24 sps:$4 sm:$0xff]  }
 0x481   :  { %6373 = vmatpush2.bf16.msra.mxu1 %v8980_v1  ;;  %6398 = vmatpush1.bf16.msra.mxu0 %v8983_v43  ;;  %v9054_v1 = vld [vmem:[#allocation5 + $0x584] ss:$24 sps:$4 sm:$0xff]  }
 0x482   :  { %6374 = vmatprep.subr.bf16.mxu1 %v8988_v46  ;;  %6399 = vmatprep.subr.bf16.mxu0 %v8991_v47  ;;  %v9057_v43 = vld [vmem:[#allocation5 + $0x704] ss:$24 sps:$4 sm:$0xff]   ;;  %v9052_v47 = vld [vmem:[#allocation5 + $0x580] ss:$24 sps:$4 sm:$0xff]  }
 0x485   :  { %6375 = vmatpush2.bf16.msra.mxu1 %v8986_v48  ;;  %6400 = vmatpush1.bf16.msra.mxu0 %v8989_v51  ;;  %v9055_v48 = vld [vmem:[#allocation5 + $0x700] ss:$24 sps:$4 sm:$0xff]  }
 0x486   :  { %6401 = vmatprep.subr.bf16.mxu0 %v8994_v50  ;;  %6426 = vmatprep.subr.bf16.mxu1 %v8997_v37  ;;  %v9063_v50 = vld [vmem:[#allocation5 + $0x6d4] ss:$24 sps:$4 sm:$0xff]   ;;  %v9058_v37 = vld [vmem:[#allocation5 + $0x550] ss:$24 sps:$4 sm:$0xff]  }
 0x488   :  { %v4099_v54 = vpop.f32.mrf.mxu1  ;;  %6377 = vmatmul.mubr.bf16.vlgmr.msra.gmra.mxu1 %v10106_v36 }
 0x489   :  { %v10134_v3 = vadd.f32 %v4099_v54, %v10126_v49  ;;  %6402 = vmatpush2.bf16.msra.mxu0 %v8992_v5  ;;  %6427 = vmatpush1.bf16.msra.mxu1 %v8995_v52  ;;  %v9021_v49 = vld [vmem:[#allocation5 + $0x3a4] ss:$24 sps:$4 sm:$0xff]   ;;  %v9072_v54 = vld [vmem:[#allocation5 + $0x4f4] ss:$24 sps:$4 sm:$0xff]  }
 0x48a   :  { %6458 = vmatprep.mubr.bf16.mxu1 %v10064_v15  ;;  %v4101_v63 = vpop.f32.mrf.mxu1  ;;  %6403 = vmatprep.subr.bf16.mxu0 %v9000_v11  ;;  %v9010_v15 = vld [vmem:[#allocation5 + $0x250] ss:$24 sps:$4 sm:$0xff]   ;;  %v9066_v5 = vld [vmem:[#allocation5 + $0x524] ss:$24 sps:$4 sm:$0xff]   ;;  %v9064_v11 = vld [vmem:[#allocation5 + $0x520] ss:$24 sps:$4 sm:$0xff]  }
 0x48b   :  { %v10138_v41 = vadd.f32 %v4101_v63, %v10130_v32  ;;  %6428 = vmatprep.subr.bf16.mxu1 %v9003_v53  ;;  %v9025_v32 = vld [vmem:[#allocation5 + $0x370] ss:$24 sps:$4 sm:$0xff]   ;;  %v9069_v52 = vld [vmem:[#allocation5 + $0x6a4] ss:$24 sps:$4 sm:$0xff]   ;;  %v9067_v53 = vld [vmem:[#allocation5 + $0x6a0] ss:$24 sps:$4 sm:$0xff]  }
 0x48c   :  { %v4103_v4 = vpop.f32.mrf.mxu1  ;;  %v9073_v63 = vld [vmem:[#allocation5 + $0x670] ss:$24 sps:$4 sm:$0xff]  }
 0x48d   :  { %6404 = vmatpush2.bf16.msra.mxu0 %v8998_v55  ;;  %6429 = vmatpush1.bf16.msra.mxu1 %v9001_v62  ;;  %v9075_v55 = vld [vmem:[#allocation5 + $0x674] ss:$24 sps:$4 sm:$0xff]   ;;  %v9070_v62 = vld [vmem:[#allocation5 + $0x4f0] ss:$24 sps:$4 sm:$0xff]   ;;  %v9076_v4 = vld [vmem:[#allocation5 + $0x4c0] ss:$24 sps:$4 sm:$0xff]  }
 0x48e   :  { %v4104_v8 = vpop.f32.mrf.mxu1  ;;  %6405 = vmatprep.subr.bf16.mxu0 %v9006_v0  ;;  %6430 = vmatprep.subr.bf16.mxu1 %v9009_v2  ;;  %v9078_v0 = vld [vmem:[#allocation5 + $0x4c4] ss:$24 sps:$4 sm:$0xff]  }
 0x48f   :  { %v9081_v2 = vld [vmem:[#allocation5 + $0x644] ss:$24 sps:$4 sm:$0xff]   ;;  %v9087_v8 = vld [vmem:[#allocation5 + $0x614] ss:$24 sps:$4 sm:$0xff]  }
 0x491   :  { %6406 = vmatpush2.bf16.msra.mxu0 %v9004_v7  ;;  %6431 = vmatpush1.bf16.msra.mxu1 %v9007_v34  ;;  %v9079_v7 = vld [vmem:[#allocation5 + $0x640] ss:$24 sps:$4 sm:$0xff]   ;;  %v9084_v34 = vld [vmem:[#allocation5 + $0x494] ss:$24 sps:$4 sm:$0xff]  }
 0x492   :  { %6407 = vmatprep.subr.bf16.mxu0 %v9012_v9  ;;  %6432 = vmatprep.subr.bf16.mxu1 %v9015_v6  ;;  %v9082_v9 = vld [vmem:[#allocation5 + $0x490] ss:$24 sps:$4 sm:$0xff]  }
 0x493   :  { %v9085_v6 = vld [vmem:[#allocation5 + $0x610] ss:$24 sps:$4 sm:$0xff]  }
 0x495   :  { %6408 = vmatpush2.bf16.msra.mxu0 %v9010_v15  ;;  %6433 = vmatpush1.bf16.msra.mxu1 %v9013_v24  ;;  %v9090_v15 = vld [vmem:[#allocation5 + $0x8e4] ss:$24 sps:$4 sm:$0xff]  }
 0x496   :  { %6409 = vmatprep.subr.bf16.mxu0 %v9018_v57  ;;  %6434 = vmatprep.subr.bf16.mxu1 %v9021_v49  ;;  %v9106_v24 = vld [vmem:[#allocation22 + $0x78] sm:$0xff]  }
 0x497   :  { %v9088_v57 = vld [vmem:[#allocation5 + $0x8e0] ss:$24 sps:$4 sm:$0xff]  }
 0x498   :  { %v9107_v49 = vld [vmem:[#allocation22 + $0x38] sm:$0xff]  }
 0x499   :  { %6410 = vmatpush2.bf16.msra.mxu0 %v9016_v59  ;;  %6435 = vmatpush1.bf16.msra.mxu1 %v9019_v45  ;;  %v9093_v59 = vld [vmem:[#allocation5 + $0x8b4] ss:$24 sps:$4 sm:$0xff]  }
 0x49a   :  { %6411 = vmatprep.subr.bf16.mxu0 %v9024_v10  ;;  %6436 = vmatprep.subr.bf16.mxu1 %v9027_v13  ;;  %v9111_v45 = vld [vmem:[#allocation22 + $0x70] sm:$0xff]  }
 0x49b   :  { %v9091_v13 = vld [vmem:[#allocation5 + $0x8b0] ss:$24 sps:$4 sm:$0xff]  }
 0x49d   :  { %6412 = vmatpush2.bf16.msra.mxu0 %v9022_v27  ;;  %6437 = vmatpush1.bf16.msra.mxu1 %v9025_v32  ;;  %v9112_v27 = vld [vmem:[#allocation22 + $0x30] sm:$0xff]  }
 0x49e   :  { %6413 = vmatprep.subr.bf16.mxu0 %v9030_v16  ;;  %6438 = vmatprep.subr.bf16.mxu1 %v9033_v26  ;;  %v9096_v16 = vld [vmem:[#allocation5 + $0x884] ss:$24 sps:$4 sm:$0xff]   ;;  %v9116_v26 = vld [vmem:[#allocation22 + $0x68] sm:$0xff]  }
 0x4a1   :  { %6414 = vmatpush2.bf16.msra.mxu0 %v9028_v39  ;;  %6439 = vmatpush1.bf16.msra.mxu1 %v9031_v14  ;;  %v9094_v14 = vld [vmem:[#allocation5 + $0x880] ss:$24 sps:$4 sm:$0xff]  }
 0x4a2   :  { %6415 = vmatprep.subr.bf16.mxu0 %v9036_v17  ;;  %6440 = vmatprep.subr.bf16.mxu1 %v9039_v18  ;;  %v9117_v17 = vld [vmem:[#allocation22 + $0x28] sm:$0xff]  }
 0x4a5   :  { %6416 = vmatpush2.bf16.msra.mxu0 %v9034_v35  ;;  %6441 = vmatpush1.bf16.msra.mxu1 %v9037_v19  ;;  %v9099_v35 = vld [vmem:[#allocation5 + $0x854] ss:$24 sps:$4 sm:$0xff]   ;;  %v9097_v19 = vld [vmem:[#allocation5 + $0x850] ss:$24 sps:$4 sm:$0xff]  }
 0x4a6   :  { %6442 = vmatprep.subr.bf16.mxu1 %v9042_v21  ;;  %6467 = vmatprep.subr.bf16.mxu0 %v9045_v22  ;;  %v9119_v21 = vld [vmem:[#allocation22 + $0x20] sm:$0xff]  }
 0x4a7   :  { %v9102_v22 = vld [vmem:[#allocation5 + $0x824] ss:$24 sps:$4 sm:$0xff]  }
 0x4a8   :  { %v10140_v30 = vpop.f32.mrf.mxu0  ;;  %6418 = vmatmul.mubr.bf16.vlgmr.msra.gmra.mxu0 %v10080_v56  ;;  %v9060_v56 = vld [vmem:[#allocation5 + $0x554] ss:$24 sps:$4 sm:$0xff]  }
 0x4a9   :  { %6443 = vmatpush2.bf16.msra.mxu1 %v9040_v20  ;;  %6468 = vmatpush1.bf16.msra.mxu0 %v9043_v23  ;;  %v9120_v20 = vld [vmem:[#allocation22 + $0x58] sm:$0xff]  }
 0x4aa   :  { %6499 = vmatprep.mubr.bf16.mxu0 %v10083_v12  ;;  %v10144_v31 = vpop.f32.mrf.mxu0  ;;  %6444 = vmatprep.subr.bf16.mxu1 %v9048_v25  ;;  %v9061_v12 = vld [vmem:[#allocation5 + $0x6d0] ss:$24 sps:$4 sm:$0xff]   ;;  %v9100_v23 = vld [vmem:[#allocation5 + $0x820] ss:$24 sps:$4 sm:$0xff]  }
 0x4ab   :  { %6469 = vmatprep.subr.bf16.mxu0 %v9051_v28  ;;  %v9121_v25 = vld [vmem:[#allocation22 + $0x18] sm:$0xff]   ;;  %v9105_v28 = vld [vmem:[#allocation5 + $0x7f4] ss:$24 sps:$4 sm:$0xff]  }
 0x4ac   :  { %v6177_v46 = vpop.f32.mrf.mxu0 }
 0x4ad   :  { %6445 = vmatpush2.bf16.msra.mxu1 %v9046_v38  ;;  %6470 = vmatpush1.bf16.msra.mxu0 %v9049_v40  ;;  %v9122_v38 = vld [vmem:[#allocation22 + $0x50] sm:$0xff]   ;;  %v9124_v46 = vld [vmem:[#allocation22 + $0x48] sm:$0xff]  }
 0x4ae   :  { %v6178_v51 = vpop.f32.mrf.mxu0  ;;  %6446 = vmatprep.subr.bf16.mxu1 %v9054_v1  ;;  %6471 = vmatprep.subr.bf16.mxu0 %v9057_v43  ;;  %v9103_v40 = vld [vmem:[#allocation5 + $0x7f0] ss:$24 sps:$4 sm:$0xff]   ;;  %v9110_v43 = vld [vmem:[#allocation5 + $0x7c4] ss:$24 sps:$4 sm:$0xff]  }
 0x4af   :  { %v9123_v1 = vld [vmem:[#allocation22 + $0x10] sm:$0xff]   ;;  %v10151_v51 = vld [vmem:[#allocation19] sm:$0x3f] }
 0x4b1   :  { %6447 = vmatpush2.bf16.msra.mxu1 %v9052_v47  ;;  %6472 = vmatpush1.bf16.msra.mxu0 %v9055_v48  ;;  %v9108_v47 = vld [vmem:[#allocation5 + $0x7c0] ss:$24 sps:$4 sm:$0xff]   ;;  %v9125_v48 = vld [vmem:[#allocation22 + $0x8] sm:$0xff]  }
 0x4b2   :  { %6448 = vmatprep.subr.bf16.mxu1 %v9060_v56  ;;  %6473 = vmatprep.subr.bf16.mxu0 %v9063_v50  ;;  %v9115_v56 = vld [vmem:[#allocation5 + $0x794] ss:$24 sps:$4 sm:$0xff]   ;;  %v9126_v50 = vld [vmem:[#allocation22 + $0x40] sm:$0xff]  }
 0x4b5   :  { %6449 = vmatpush2.bf16.msra.mxu1 %v9058_v37  ;;  %6474 = vmatpush1.bf16.msra.mxu0 %v9061_v12  ;;  %v4672_v37 = vrot.slane %v10151_v51, %v9919_v58  ;;  %v9113_v12 = vld [vmem:[#allocation5 + $0x790] ss:$24 sps:$4 sm:$0xff]  }
 0x4b6   :  { %6450 = vmatprep.subr.bf16.mxu1 %v9066_v5  ;;  %6475 = vmatprep.subr.bf16.mxu0 %v9069_v52  ;;  %v9127_v5 = vld [vmem:[#allocation22] sm:$0xff]   ;;  %v9128_v52 = vld [vmem:[#allocation22 + $0xf8] sm:$0xff]  }
 0x4b9   :  { %6451 = vmatpush2.bf16.msra.mxu1 %v9064_v11  ;;  %6476 = vmatpush1.bf16.msra.mxu0 %v9067_v53  ;;  %v4676_v11 = vrot.slane %v10151_v51, %v9922_v60  ;;  %v6174_v53 = vadd.f32 %v10140_v30, %v4672_v37  ;;  %v9174_v37 = vld [vmem:[#allocation22 + $0x140] sm:$0xff]  }
 0x4ba   :  { %6452 = vmatprep.subr.bf16.mxu1 %v9072_v54  ;;  %6477 = vmatprep.subr.bf16.mxu0 %v9075_v55 }
 0x4bb   :  { %v6176_v54 = vadd.f32 %v10144_v31, %v4676_v11  ;;  %v9130_v31 = vld [vmem:[#allocation22 + $0xf0] sm:$0xff]  }
 0x4bd   :  { %6453 = vmatpush2.bf16.msra.mxu1 %v9070_v62  ;;  %6478 = vmatpush1.bf16.msra.mxu0 %v9073_v63 }
 0x4be   :  { %6454 = vmatprep.subr.bf16.mxu1 %v9078_v0  ;;  %6479 = vmatprep.subr.bf16.mxu0 %v9081_v2 }
 0x4c1   :  { %6455 = vmatpush2.bf16.msra.mxu1 %v9076_v4  ;;  %6480 = vmatpush1.bf16.msra.mxu0 %v9079_v7 }
 0x4c2   :  { %6456 = vmatprep.subr.bf16.mxu1 %v9084_v34  ;;  %6481 = vmatprep.subr.bf16.mxu0 %v9087_v8  ;;  %v9129_v8 = vld [vmem:[#allocation22 + $0xb8] sm:$0xff]  }
 0x4c5   :  { %6457 = vmatpush2.bf16.msra.mxu1 %v9082_v9  ;;  %6482 = vmatpush1.bf16.msra.mxu0 %v9085_v6  ;;  %v9131_v6 = vld [vmem:[#allocation22 + $0xb0] sm:$0xff]  }
 0x4c6   :  { %6483 = vmatprep.subr.bf16.mxu0 %v9090_v15  ;;  %8084 = vmatprep.subr.bf16.mxu1 %v9106_v24  ;;  %v9133_v15 = vld [vmem:[#allocation22 + $0xa8] sm:$0xff]   ;;  %v9134_v24 = vld [vmem:[#allocation22 + $0xe0] sm:$0xff]  }
 0x4c8   :  { %v10146_v10 = vpop.f32.mrf.mxu1  ;;  %6459 = vmatmul.mubr.bf16.vlgmr.msra.gmra.mxu1 %v10094_v61  ;;  %v9118_v61 = vld [vmem:[#allocation22 + $0x60] sm:$0xff]  }
 0x4c9   :  { %6484 = vmatpush2.bf16.msra.mxu0 %v9088_v57  ;;  %8085 = vmatpush3.bf16.msra.mxu1 %v9107_v49  ;;  %v6215_v55 = vadd.f32 %v10146_v10, %v6174_v53  ;;  %v9135_v57 = vld [vmem:[#allocation22 + $0xa0] sm:$0xff]   ;;  %v9137_v10 = vld [vmem:[#allocation22 + $0x98] sm:$0xff]  }
 0x4ca   :  { %v10149_v32 = vpop.f32.mrf.mxu1  ;;  %6485 = vmatprep.subr.bf16.mxu0 %v9093_v59  ;;  %8086 = vmatprep.subr.bf16.mxu1 %v9111_v45  ;;  %v9136_v59 = vld [vmem:[#allocation22 + $0xd8] sm:$0xff]  }
 0x4cb   :  { %v6217_v62 = vadd.f32 %v10149_v32, %v6176_v54 }
 0x4cc   :  { %v6218_v39 = vpop.f32.mrf.mxu1 }
 0x4cd   :  { %6486 = vmatpush2.bf16.msra.mxu0 %v9091_v13  ;;  %8087 = vmatpush3.bf16.msra.mxu1 %v9112_v27  ;;  %v9138_v27 = vld [vmem:[#allocation22 + $0xd0] sm:$0xff]  }
 0x4ce   :  { %v6219_v18 = vpop.f32.mrf.mxu1  ;;  %6487 = vmatprep.subr.bf16.mxu0 %v9096_v16  ;;  %8088 = vmatprep.subr.bf16.mxu1 %v9116_v26  ;;  %v9160_v16 = vld [vmem:[#allocation22 + $0x178] sm:$0xff]   ;;  %v9162_v39 = vld [vmem:[#allocation22 + $0x170] sm:$0xff]  }
 0x4cf   :  { %v9161_v26 = vld [vmem:[#allocation22 + $0x138] sm:$0xff]   ;;  %v9163_v18 = vld [vmem:[#allocation22 + $0x130] sm:$0xff]  }
 0x4d1   :  { %6488 = vmatpush2.bf16.msra.mxu0 %v9094_v14  ;;  %8089 = vmatpush3.bf16.msra.mxu1 %v9117_v17  ;;  %v9139_v14 = vld [vmem:[#allocation22 + $0x90] sm:$0xff]   ;;  %v9140_v17 = vld [vmem:[#allocation22 + $0xc8] sm:$0xff]  }
 0x4d2   :  { %6489 = vmatprep.subr.bf16.mxu0 %v9099_v35  ;;  %8090 = vmatprep.subr.bf16.mxu1 %v9118_v61  ;;  %v9164_v35 = vld [vmem:[#allocation22 + $0x168] sm:$0xff]  }
 0x4d3   :  { %v9141_v61 = vld [vmem:[#allocation22 + $0x88] sm:$0xff]  }
 0x4d5   :  { %6490 = vmatpush2.bf16.msra.mxu0 %v9097_v19  ;;  %8091 = vmatpush3.bf16.msra.mxu1 %v9119_v21  ;;  %v9142_v19 = vld [vmem:[#allocation22 + $0xc0] sm:$0xff]   ;;  %v9165_v21 = vld [vmem:[#allocation22 + $0x128] sm:$0xff]  }
 0x4d6   :  { %6491 = vmatprep.subr.bf16.mxu0 %v9102_v22  ;;  %8092 = vmatprep.subr.bf16.mxu1 %v9120_v20  ;;  %v9143_v22 = vld [vmem:[#allocation22 + $0x80] sm:$0xff]   ;;  %v9144_v20 = vld [vmem:[#allocation21 + $0x78] sm:$0xff]  }
 0x4d9   :  { %6492 = vmatpush2.bf16.msra.mxu0 %v9100_v23  ;;  %8093 = vmatpush3.bf16.msra.mxu1 %v9121_v25 }
 0x4da   :  { %6493 = vmatprep.subr.bf16.mxu0 %v9105_v28  ;;  %8094 = vmatprep.subr.bf16.mxu1 %v9122_v38  ;;  %v9166_v28 = vld [vmem:[#allocation22 + $0x160] sm:$0xff]  }
 0x4db   :  { %v9167_v38 = vld [vmem:[#allocation22 + $0x120] sm:$0xff]  }
 0x4dd   :  { %6494 = vmatpush2.bf16.msra.mxu0 %v9103_v40  ;;  %8095 = vmatpush3.bf16.msra.mxu1 %v9123_v1 }
 0x4de   :  { %6495 = vmatprep.subr.bf16.mxu0 %v9110_v43  ;;  %8096 = vmatprep.subr.bf16.mxu1 %v9124_v46  ;;  %v9168_v43 = vld [vmem:[#allocation22 + $0x158] sm:$0xff]  }
 0x4df   :  { %v9169_v46 = vld [vmem:[#allocation22 + $0x118] sm:$0xff]  }
 0x4e1   :  { %6496 = vmatpush2.bf16.msra.mxu0 %v9108_v47  ;;  %8097 = vmatpush3.bf16.msra.mxu1 %v9125_v48  ;;  %v9170_v47 = vld [vmem:[#allocation22 + $0x150] sm:$0xff]  }
 0x4e2   :  { %6497 = vmatprep.subr.bf16.mxu0 %v9115_v56  ;;  %8098 = vmatprep.subr.bf16.mxu1 %v9126_v50  ;;  %v9171_v48 = vld [vmem:[#allocation22 + $0x110] sm:$0xff]   ;;  %v9172_v56 = vld [vmem:[#allocation22 + $0x148] sm:$0xff]  }
 0x4e3   :  { %v9173_v50 = vld [vmem:[#allocation22 + $0x108] sm:$0xff]  }
 0x4e5   :  { %6498 = vmatpush2.bf16.msra.mxu0 %v9113_v12  ;;  %8099 = vmatpush3.bf16.msra.mxu1 %v9127_v5  ;;  %v9175_v12 = vld [vmem:[#allocation22 + $0x100] sm:$0xff]   ;;  %v4680_v5 = vrot.slane %v10151_v51, %v9933_v42 }
 0x4e6   :  { %8106 = vmatprep.subr.bf16.mxu1 %v9128_v52  ;;  %8128 = vmatprep.subr.bf16.mxu0 %v9160_v16  ;;  %v4684_v52 = vrot.slane %v10151_v51, %v9936_v44  ;;  %v6515_v44 = vpack.c.bf16 %v10138_v41, %v10138_v41  ;;  %v9158_v16 = vld [vmem:[#allocation21 + $0x40] sm:$0xff]  }
 0x4e8   :  { %v6255_v58 = vpop.f32.mrf.mxu0  ;;  %6500 = vmatmul.mubr.bf16.vlgmr.msra.gmra.mxu0 %v10106_v36  ;;  %v9132_v36 = vld [vmem:[#allocation22 + $0xe8] sm:$0xff]  }
 0x4e9   :  { %v6256_v63 = vadd.f32 %v6255_v58, %v6215_v55  ;;  %8129 = vmatpush3.bf16.msra.mxu0 %v9161_v26  ;;  %v9159_v26 = vld [vmem:[#allocation21] sm:$0xff]  }
 0x4ea   :  { %v6257_v0 = vpop.f32.mrf.mxu0  ;;  %8130 = vmatprep.subr.bf16.mxu0 %v9162_v39  ;;  %v6514_v39 = vpack.c.bf16 %v10134_v3, %v10134_v3 }
 0x4eb   :  { %v6258_v2 = vadd.f32 %v6257_v0, %v6217_v62  ;;  %9178 = vtanh.f32 %v6256_v63 }
 0x4ec   :  { %v6259_v4 = vpop.f32.mrf.mxu0 }
 0x4ed   :  { %9180 = vtanh.f32 %v6258_v2  ;;  %8131 = vmatpush3.bf16.msra.mxu0 %v9163_v18 }
 0x4ee   :  { %v6260_v60 = vpop.f32.mrf.mxu0  ;;  %8132 = vmatprep.subr.bf16.mxu0 %v9164_v35 }
 0x4f1   :  { %8133 = vmatpush3.bf16.msra.mxu0 %v9165_v21 }
 0x4f2   :  { %8134 = vmatprep.subr.bf16.mxu0 %v9166_v28 }
 0x4f5   :  { %8135 = vmatpush3.bf16.msra.mxu0 %v9167_v38 }
 0x4f6   :  { %8136 = vmatprep.subr.bf16.mxu0 %v9168_v43 }
 0x4f8   :  { %v9179_v30 = vpop.eup %9178 }
 0x4f9   :  { %v6548_v9 = vpack.c.bf16 %v9179_v30, %v9179_v30  ;;  %8137 = vmatpush3.bf16.msra.mxu0 %v9169_v46 }
 0x4fa   :  { %v9181_v7 = vpop.eup %9180  ;;  %8138 = vmatprep.subr.bf16.mxu0 %v9170_v47 }
 0x4fb   :  { %v6549_v34 = vpack.c.bf16 %v9181_v7, %v9181_v7 }
 0x4fd   :  { %6970 = vmatprep.mubr.bf16.mxu1 %v6549_v34  ;;  %8139 = vmatpush3.bf16.msra.mxu0 %v9171_v48  ;;  %v9145_v34 = vld [vmem:[#allocation21 + $0x38] sm:$0xff]  }
 0x4fe   :  { %6971 = vmatmul.mubr.bf16.vlgmr.msra.gmra.mxu1 %v6548_v9  ;;  %8140 = vmatprep.subr.bf16.mxu0 %v9172_v56  ;;  %v9147_v9 = vld [vmem:[#allocation21 + $0x30] sm:$0xff]  }
 0x4ff   :  { %8107 = vmatpush3.bf16.msra.mxu1 %v9129_v8  ;;  %v9146_v8 = vld [vmem:[#allocation21 + $0x70] sm:$0xff]  }
 0x500   :  { %8108 = vmatprep.subr.bf16.mxu1 %v9130_v31  ;;  %v9148_v31 = vld [vmem:[#allocation21 + $0x68] sm:$0xff]  }
 0x501   :  { %8141 = vmatpush3.bf16.msra.mxu0 %v9173_v50 }
 0x502   :  { %8142 = vmatprep.subr.bf16.mxu0 %v9174_v37 }
 0x503   :  { %8109 = vmatpush3.bf16.msra.mxu1 %v9131_v6  ;;  %v9149_v6 = vld [vmem:[#allocation21 + $0x28] sm:$0xff]  }
 0x504   :  { %8110 = vmatprep.subr.bf16.mxu1 %v9132_v36  ;;  %v9150_v36 = vld [vmem:[#allocation21 + $0x60] sm:$0xff]  }
 0x505   :  { %8143 = vmatpush3.bf16.msra.mxu0 %v9175_v12 }
 0x507   :  { %8111 = vmatpush3.bf16.msra.mxu1 %v9133_v15  ;;  %v9151_v15 = vld [vmem:[#allocation21 + $0x20] sm:$0xff]  }
 0x508   :  { %v6296_v49 = vpop.f32.mrf.mxu1  ;;  %8112 = vmatprep.subr.bf16.mxu1 %v9134_v24 }
 0x509   :  { %v6297_v11 = vadd.f32 %v6296_v49, %v4680_v5 }
 0x50a   :  { %v6298_v45 = vpop.f32.mrf.mxu1 }
 0x50b   :  { %8113 = vmatpush3.bf16.msra.mxu1 %v9135_v57  ;;  %v6299_v53 = vadd.f32 %v6298_v45, %v4684_v52  ;;  %v9152_v57 = vld [vmem:[#allocation21 + $0x58] sm:$0xff]   ;;  %v9154_v45 = vld [vmem:[#allocation21 + $0x50] sm:$0xff]  }
 0x50c   :  { %v6300_v13 = vpop.f32.mrf.mxu1  ;;  %8114 = vmatprep.subr.bf16.mxu1 %v9136_v59  ;;  %v9153_v59 = vld [vmem:[#allocation21 + $0x18] sm:$0xff]  }
 0x50d   :  { %v9155_v13 = vld [vmem:[#allocation21 + $0x10] sm:$0xff]  }
 0x50e   :  { %v6301_v32 = vpop.f32.mrf.mxu1 }
 0x50f   :  { %8115 = vmatpush3.bf16.msra.mxu1 %v9137_v10  ;;  %v9157_v32 = vld [vmem:[#allocation21 + $0x8] sm:$0xff]  }
 0x510   :  { %8116 = vmatprep.subr.bf16.mxu1 %v9138_v27  ;;  %v9156_v27 = vld [vmem:[#allocation21 + $0x48] sm:$0xff]  }
 0x513   :  { %8117 = vmatpush3.bf16.msra.mxu1 %v9139_v14 }
 0x514   :  { %8118 = vmatprep.subr.bf16.mxu1 %v9140_v17 }
 0x517   :  { %8119 = vmatpush3.bf16.msra.mxu1 %v9141_v61  ;;  %v4688_v61 = vrot.slane %v10151_v51, %v9949_v29 }
 0x518   :  { %8120 = vmatprep.subr.bf16.mxu1 %v9142_v19  ;;  %v4692_v19 = vrot.slane %v10151_v51, %v9952_v33 }
 0x51b   :  { %8121 = vmatpush3.bf16.msra.mxu1 %v9143_v22 }
 0x51c   :  { %8150 = vmatprep.subr.bf16.mxu1 %v9144_v20 }
 0x528   :  { %v6337_v23 = vpop.f32.mrf.mxu0 }
 0x529   :  { %v6338_v54 = vadd.f32 %v6337_v23, %v6297_v11 }
 0x52a   :  { %v6339_v25 = vpop.f32.mrf.mxu0 }
 0x52b   :  { %v6340_v58 = vadd.f32 %v6339_v25, %v6299_v53 }
 0x52c   :  { %v6341_v40 = vpop.f32.mrf.mxu0 }
 0x52e   :  { %v6342_v1 = vpop.f32.mrf.mxu0 }
 0x548   :  { %v6378_v55 = vpop.f32.mrf.mxu1 }
 0x549   :  { %v6379_v62 = vadd.f32 %v6378_v55, %v6338_v54 }
 0x54a   :  { %v6380_v63 = vpop.f32.mrf.mxu1 }
 0x54b   :  { %v6381_v0 = vadd.f32 %v6380_v63, %v6340_v58  ;;  %9182 = vtanh.f32 %v6379_v62 }
 0x54c   :  { %v6382_v2 = vpop.f32.mrf.mxu1 }
 0x54d   :  { %9184 = vtanh.f32 %v6381_v0 }
 0x54e   :  { %v6383_v4 = vpop.f32.mrf.mxu1 }
 0x558   :  { %v9183_v60 = vpop.eup %9182 }
 0x559   :  { %v6550_v42 = vpack.c.bf16 %v9183_v60, %v9183_v60 }
 0x55a   :  { %v9185_v30 = vpop.eup %9184 }
 0x55b   :  { %v6551_v7 = vpack.c.bf16 %v9185_v30, %v9185_v30 }
 0x55d   :  { %7010 = vmatprep.mubr.bf16.mxu1 %v6551_v7 }
 0x55e   :  { %7011 = vmatmul.mubr.bf16.vlgmr.msra.gmra.mxu1 %v6550_v42 }
 0x55f   :  { %8151 = vmatpush3.bf16.msra.mxu1 %v9145_v34  ;;  %7186 = vmatprep.mubr.bf16.mxu1 %v6515_v44  ;;  %v8046_v34 = vld [vmem:[#allocation24] ss:$0 sm:$0xff] }
 0x560   :  { %8152 = vmatprep.subr.bf16.mxu1 %v9146_v8 }
 0x563   :  { %8153 = vmatpush3.bf16.msra.mxu1 %v9147_v9 }
 0x564   :  { %8154 = vmatprep.subr.bf16.mxu1 %v9148_v31 }
 0x567   :  { %8155 = vmatpush3.bf16.msra.mxu1 %v9149_v6 }
 0x568   :  { %v6419_v24 = vpop.f32.mrf.mxu0  ;;  %8156 = vmatprep.subr.bf16.mxu1 %v9150_v36 }
 0x569   :  { %v6420_v21 = vadd.f32 %v6419_v24, %v4688_v61 }
 0x56a   :  { %v6421_v49 = vpop.f32.mrf.mxu0 }
 0x56b   :  { %8157 = vmatpush3.bf16.msra.mxu1 %v9151_v15  ;;  %v6422_v22 = vadd.f32 %v6421_v49, %v4692_v19 }
 0x56c   :  { %v6423_v41 = vpop.f32.mrf.mxu0  ;;  %8158 = vmatprep.subr.bf16.mxu1 %v9152_v57 }
 0x56e   :  { %v6424_v10 = vpop.f32.mrf.mxu0 }
 0x56f   :  { %8159 = vmatpush3.bf16.msra.mxu1 %v9153_v59 }
 0x570   :  { %8160 = vmatprep.subr.bf16.mxu1 %v9154_v45 }
 0x573   :  { %8161 = vmatpush3.bf16.msra.mxu1 %v9155_v13 }
 0x574   :  { %8162 = vmatprep.subr.bf16.mxu1 %v9156_v27 }
 0x577   :  { %8163 = vmatpush3.bf16.msra.mxu1 %v9157_v32 }
 0x578   :  { %8164 = vmatprep.subr.bf16.mxu1 %v9158_v16 }
 0x57b   :  { %8165 = vmatpush3.bf16.msra.mxu1 %v9159_v26 }
 0x57e   :  { %7187 = vmatmul.mubr.bf16.vlgmr.msra.gmra.mxu1 %v6514_v39 }
 0x588   :  { %v6460_v14 = vpop.f32.mrf.mxu1 }
 0x589   :  { %v6461_v20 = vadd.f32 %v6460_v14, %v6420_v21 }
 0x58a   :  { %v6462_v17 = vpop.f32.mrf.mxu1 }
 0x58b   :  { %v6463_v25 = vadd.f32 %v6462_v17, %v6422_v22 }
 0x58c   :  { %v6464_v18 = vpop.f32.mrf.mxu1 }
 0x58e   :  { %v6465_v35 = vpop.f32.mrf.mxu1 }
 0x5a8   :  { %v6501_v23 = vpop.f32.mrf.mxu0 }
 0x5a9   :  { %v6502_v28 = vadd.f32 %v6501_v23, %v6461_v20 }
 0x5aa   :  { %v6503_v38 = vpop.f32.mrf.mxu0 }
 0x5ab   :  { %v6504_v40 = vadd.f32 %v6503_v38, %v6463_v25  ;;  %9186 = vtanh.f32 %v6502_v28 }
 0x5ac   :  { %v6505_v3 = vpop.f32.mrf.mxu0 }
 0x5ad   :  { %9188 = vtanh.f32 %v6504_v40 }
 0x5ae   :  { %v6506_v1 = vpop.f32.mrf.mxu0 }
 0x5b8   :  { %v9187_v43 = vpop.eup %9186 }
 0x5b9   :  { %v6552_v48 = vpack.c.bf16 %v9187_v43, %v9187_v43 }
 0x5ba   :  { %v9189_v46 = vpop.eup %9188 }
 0x5bb   :  { %v6553_v47 = vpack.c.bf16 %v9189_v46, %v9189_v46 }
 0x5bd   :  { %7050 = vmatprep.mubr.bf16.mxu0 %v6553_v47 }
 0x5be   :  { %v8100_v29 = vpop.f32.mrf.mxu1  ;;  %7051 = vmatmul.mubr.bf16.vlgmr.msra.gmra.mxu0 %v6552_v48 }
 0x5c0   :  { %v8101_v33 = vpop.f32.mrf.mxu1 }
 0x5c1   :  { %v8102_v51 = vadd.f32 %v8101_v33, %v8100_v29 }
 0x5c2   :  { %v8103_v56 = vpop.f32.mrf.mxu1 }
 0x5c4   :  { %v8104_v50 = vpop.f32.mrf.mxu1 }
 0x61e   :  { %v8122_v37 = vpop.f32.mrf.mxu1 }
 0x620   :  { %v8123_v12 = vpop.f32.mrf.mxu1 }
 0x621   :  { %v8124_v5 = vadd.f32 %v8123_v12, %v8122_v37 }
 0x622   :  { %v8125_v52 = vpop.f32.mrf.mxu1 }
 0x623   :  { %v7013_v11 = vadd.f32 %v8124_v5, %v8102_v51 }
 0x624   :  { %v8126_v53 = vpop.f32.mrf.mxu1 }
 0x63e   :  { %v8166_v54 = vpop.f32.mrf.mxu1 }
 0x640   :  { %v8167_v55 = vpop.f32.mrf.mxu1 }
 0x641   :  { %v8168_v58 = vadd.f32 %v8167_v55, %v8166_v54 }
 0x642   :  { %v8169_v62 = vpop.f32.mrf.mxu1 }
 0x644   :  { %v8170_v63 = vpop.f32.mrf.mxu1 }
 0x67e   :  { %v8144_v0 = vpop.f32.mrf.mxu0 }
 0x680   :  { %v8145_v2 = vpop.f32.mrf.mxu0 }
 0x681   :  { %v8146_v4 = vadd.f32 %v8145_v2, %v8144_v0 }
 0x682   :  { %v8147_v60 = vpop.f32.mrf.mxu0 }
 0x683   :  { %v7053_v30 = vadd.f32 %v8146_v4, %v7013_v11 }
 0x684   :  { %v8148_v7 = vpop.f32.mrf.mxu0 }
 0x685   :  { %v7189_v42 = vadd.f32 %v8168_v58, %v7053_v30 }
 0x687   :  { %v7201_v8 = vadd.f32 %v8046_v34, %v7189_v42 }
 0x689   :  { %7202 = vst [vmem:[#allocation25] sm:$0x3] %v7201_v8 }
 0x68a   :  { %9485 = shalt.err (!%p9482_p4)
}
 0x68b   :  { %7212 = dma.vmem_to_hbm [thread:$0]  %s7210_s2, 32, %s10192_s15, [#allocation9]  }
 0x68c   :  { %9512 = dma.done.wait [#allocation9], 32  }
 0x68d   :  { %9513 = vsyncadd [#allocation9], 4294967264 }
 0x68e   :  { %7216 = vsyncpa [#allocation8], 1 }
 0x68f   :  { %7217 = vsyncpa [#allocation11], 1 }
 0x690   :  { %7218 = vsyncpa [#allocation14], 1 }
 0x691   :  { %7219 = vsyncpa [#allocation17], 1 }
 0x692   :  { %7220 = vsyncpa [#allocation20], 1 }
 0x693   :  { %7221 = vsyncpa [#allocation23], 1 }
 0x694   :  { %7222 = vsyncpa [#allocation9], 1 }
 0x695   :  { %7223 = vsyncmov [#allocation6] }
 0x698   :  { %s7224_s14 = vpop.sfrf %7223 }
 0x699   :  { %p8047_p5 = scmp.ne.s32.totalorder %s7224_s14, 0 }
 0x69b   :  { %7228 = shalt.err (%p8047_p5)  }
 0x69c   :  { %7230 = vsyncmov [#allocation6 + $0x1] }
 0x69f   :  { %s7231_s27 = vpop.sfrf %7230 }
 0x6a0   :  { %p8048_p6 = scmp.ne.s32.totalorder %s7231_s27, 0 }
 0x6a2   :  { %7235 = shalt.err (%p8048_p6)  }
 0x6a3   :  { %7237 = vsyncmov [#allocation6 + $0x2] }
 0x6a6   :  { %s7238_s13 = vpop.sfrf %7237 }
 0x6a7   :  { %p8049_p7 = scmp.ne.s32.totalorder %s7238_s13, 0 }
 0x6a9   :  { %7242 = shalt.err (%p8049_p7)  }

</bundles_post_ra>
